<compile_context>
chip_gen: v6e
topology: v6e:2x2x1
jax: 0.10.0
libtpu: 0.0.40
codegen_flags: <defaults>
</compile_context>

<pallas_src>
import jax
import jax.numpy as jnp
from jax.experimental import pallas as pl
from jax.experimental.pallas import tpu as pltpu

EPS = 0.1  # matches LNN.L(eps=0.1)


def _softplus(x):
    return jnp.maximum(x, 0.0) + jnp.log1p(jnp.exp(-jnp.abs(x)))


def _sigmoid(x):
    return 1.0 / (1.0 + jnp.exp(-x))


def _lnn_dynamics_kernel(z_ref, w1_ref, b1_ref, w2_ref, b2_ref, w3_ref, b3_ref,
                         w4_ref, w1t_ref, w2t_ref, w3t_ref, out_ref):
    """Fused LNN dynamics for one tile of state rows.

    For each row z = [q, v]:
      g     = d L_net / d z                              (reverse sweep)
      H_v   = d^2 L_net / (d v_j d z_i)                  (d JVP-over-VJP tangents)
      a     = (H_vv + 2*eps*I)^-1 (g_q - H_vq v)         (unrolled Gauss-Jordan)
      out   = [v, a]
    """
    f32 = jnp.float32
    tn, n = z_ref.shape            # tile rows, state dim (n = 2 * q_ndim)
    d = n // 2
    td = tn * d

    x = z_ref[...]
    w1 = w1_ref[...]
    w2 = w2_ref[...]
    w3 = w3_ref[...]
    w4 = w4_ref[...]               # (1, hidden) final linear row
    b1 = b1_ref[...]
    b2 = b2_ref[...]
    b3 = b3_ref[...]
    w1t = w1t_ref[...]
    w2t = w2t_ref[...]
    w3t = w3t_ref[...]

    def mm(a, b):
        return jnp.dot(a, b, preferred_element_type=f32)

    def stacked_mm(prim, tan, w):
        """Primal (tn, k) and tangent (d, tn, k) blocks in one MXU dispatch."""
        k = prim.shape[-1]
        res = mm(jnp.concatenate([prim, tan.reshape(td, k)], axis=0), w)
        return res[:tn], res[tn:].reshape(d, tn, w.shape[-1])

    # ----------------------- primal + tangent forward -----------------------
    # Tangent directions are the d canonical velocity basis vectors, so the
    # layer-1 tangent pre-activation is just the velocity rows of W1.
    a1 = mm(x, w1) + b1                         # (tn, h)
    s1 = _sigmoid(a1)
    h1 = _softplus(a1)
    w1v = w1[d:, :]                             # (d, h) tangent seed
    h1dot = s1[None, :, :] * w1v[:, None, :]    # (d, tn, h)

    a2, a2dot = stacked_mm(h1, h1dot, w2)
    a2 = a2 + b2
    s2 = _sigmoid(a2)
    h2 = _softplus(a2)
    h2dot = s2[None, :, :] * a2dot

    a3, a3dot = stacked_mm(h2, h2dot, w3)
    a3 = a3 + b3
    s3 = _sigmoid(a3)

    # ----------------------- reverse sweep (+ its tangent) ------------------
    d3 = s3 * w4                                           # (tn, h)
    d3dot = (s3 * (1.0 - s3) * w4)[None, :, :] * a3dot     # (d, tn, h)

    p2, p2dot = stacked_mm(d3, d3dot, w3t)
    d2 = s2 * p2
    d2dot = (s2 * (1.0 - s2) * p2)[None, :, :] * a2dot + s2[None, :, :] * p2dot

    p1, p1dot = stacked_mm(d2, d2dot, w2t)
    d1 = s1 * p1
    d1dot = (s1 * (1.0 - s1) * p1)[None, :, :] * w1v[:, None, :] \
        + s1[None, :, :] * p1dot

    g, hv = stacked_mm(d1, d1dot, w1t)          # g: (tn, n), hv: (d, tn, n)
    # hv[j, b, i] = d^2 L_net / (d v_j d z_i)

    # ------------------- Euler-Lagrange solve (unrolled, d x d) -------------
    v = x[:, d:]                                # (tn, d)
    g_q = g[:, :d]                              # (tn, d)  (eps reg has no q-grad)

    rows = []                                   # rows of H_vv (+ 2*eps*I)
    rhs = []                                    # g_q - H_vq @ v
    for j in range(d):
        hj = hv[j]                              # (tn, n)
        onehot_j = (jax.lax.broadcasted_iota(jnp.int32, (1, d), 1) == j)
        rows.append(hj[:, d:] + (2.0 * EPS) * onehot_j.astype(f32))
        rhs.append(g_q[:, j:j + 1]
                   - jnp.sum(hj[:, :d] * v, axis=-1, keepdims=True))

    # Gauss-Jordan elimination, statically unrolled (no pivoting; H_vv is
    # regularised by the 2*eps*I term from the eps*|v|^2 part of L).
    for k in range(d):
        inv_p = 1.0 / rows[k][:, k:k + 1]
        rows[k] = rows[k] * inv_p
        rhs[k] = rhs[k] * inv_p
        for i in range(d):
            if i != k:
                f = rows[i][:, k:k + 1]
                rows[i] = rows[i] - f * rows[k]
                rhs[i] = rhs[i] - f * rhs[k]

    accel = jnp.concatenate(rhs, axis=-1)       # (tn, d)
    out_ref[...] = jnp.concatenate([v, accel], axis=-1)


def lnn_dynamics(z, params, t=None):
    """Equivalent of LNN.forward(t, z): returns dz/dt, shape (N, 2*q_ndim)."""
    del t  # time-independent Lagrangian (as the module itself asserts)
    N, n = z.shape
    w1, b1, w2, b2, w3, b3, w4 = params
    # Host-side pre-transposed weights: keeps all XLU transposes out of the kernel.
    w1t, w2t, w3t = w1.T, w2.T, w3.T

    tile_n = min(N, 128)
    grid = (pl.cdiv(N, tile_n),)

    def tiled(shape):
        return pl.BlockSpec((tile_n,) + tuple(shape[1:]),
                            lambda i: (i,) + (0,) * (len(shape) - 1))

    def resident(shape):   # full-array block, constant index map -> stays in VMEM
        return pl.BlockSpec(tuple(shape), lambda i: (0,) * len(shape))

    return pl.pallas_call(
        _lnn_dynamics_kernel,
        grid=grid,
        in_specs=[tiled(z.shape),
                  resident(w1.shape), resident(b1.shape),
                  resident(w2.shape), resident(b2.shape),
                  resident(w3.shape), resident(b3.shape),
                  resident(w4.shape),
                  resident(w1t.shape), resident(w2t.shape), resident(w3t.shape)],
        out_specs=tiled((N, n)),
        out_shape=jax.ShapeDtypeStruct((N, n), jnp.float32),
        compiler_params=pltpu.CompilerParams(dimension_semantics=("parallel",)),
    )(z, w1, b1, w2, b2, w3, b3, w4, w1t, w2t, w3t)


# ------------------------------ pure-JAX reference ---------------------------
def _L_ref(z, params):
    w1, b1, w2, b2, w3, b3, w4 = params
    d = z.shape[-1] // 2
    h = _softplus(z @ w1 + b1[0])
    h = _softplus(h @ w2 + b2[0])
    h = _softplus(h @ w3 + b3[0])
    y = h @ w4[0]
    v = z[..., d:]
    return y + EPS * jnp.sum(v * v, axis=-1)


def _dynamics_ref(z, params):
    d = z.shape[-1] // 2

    def L_single(zi):
        return _L_ref(zi[None, :], params)[0]

    g = jax.vmap(jax.grad(L_single))(z)
    H = jax.vmap(jax.hessian(L_single))(z)
    v = z[:, d:]
    rhs = g[:, :d] - jnp.einsum('bij,bj->bi', H[:, d:, :d], v)
    a = jnp.linalg.solve(H[:, d:, d:], rhs[..., None])[..., 0]
    return jnp.concatenate([v, a], axis=-1)


if __name__ == "__main__":
    jax.config.update("jax_default_matmul_precision", "highest")

    # Small shapes consistent with the module: N x 2*q_ndim state, 3-layer MLP.
    N, q_ndim, hidden = 8, 4, 128
    n = 2 * q_ndim

    key = jax.random.PRNGKey(0)
    k = jax.random.split(key, 6)
    ortho = jax.nn.initializers.orthogonal()
    # FCsoftplus(zero_bias=True, orthogonal_init=True) x3 + final Linear(., 1).
    # Weights stored (in_features, out_features) so activations are x @ W + b.
    w1 = ortho(k[0], (n, hidden), jnp.float32)
    w2 = ortho(k[1], (hidden, hidden), jnp.float32)
    w3 = ortho(k[2], (hidden, hidden), jnp.float32)
    w4 = ortho(k[3], (1, hidden), jnp.float32)          # final layer (zero bias)
    b1 = jnp.zeros((1, hidden), jnp.float32)
    b2 = jnp.zeros((1, hidden), jnp.float32)
    b3 = jnp.zeros((1, hidden), jnp.float32)
    params = (w1, b1, w2, b2, w3, b3, w4)

    z = jax.random.normal(k[4], (N, n), jnp.float32)    # [q, qdot]
    t = jnp.zeros(())                                    # scalar time (unused)

    out = jax.jit(lnn_dynamics)(z, params, t)
    out = jax.block_until_ready(out)

    ref = _dynamics_ref(z, params)
    assert out.shape == (N, n)
    if not jnp.allclose(out, ref, rtol=5e-2, atol=5e-3):
        raise AssertionError(f"mismatch:\n{out}\nvs\n{ref}")
    print("KERNEL_OK")
</pallas_src>

<mosaic_0001>
module attributes {stable_mosaic.version = 11 : i64} {
  func.func @_lnn_dynamics_kernel(%arg0: i32, %arg1: memref<8x8xf32, #tpu.memory_space<vmem>>, %arg2: memref<8x128xf32, #tpu.memory_space<vmem>>, %arg3: memref<1x128xf32, #tpu.memory_space<vmem>>, %arg4: memref<128x128xf32, #tpu.memory_space<vmem>>, %arg5: memref<1x128xf32, #tpu.memory_space<vmem>>, %arg6: memref<128x128xf32, #tpu.memory_space<vmem>>, %arg7: memref<1x128xf32, #tpu.memory_space<vmem>>, %arg8: memref<1x128xf32, #tpu.memory_space<vmem>>, %arg9: memref<128x8xf32, #tpu.memory_space<vmem>>, %arg10: memref<128x128xf32, #tpu.memory_space<vmem>>, %arg11: memref<128x128xf32, #tpu.memory_space<vmem>>, %arg12: memref<8x8xf32, #tpu.memory_space<vmem>>) attributes {dimension_semantics = [#tpu.dimension_semantics<parallel>], iteration_bounds = array<i64: 1>, scalar_prefetch = 0 : i64, scratch_operands = 0 : i64, tpu.core_type = #tpu.core_type<tc>, window_params = [{transform_indices = @transform_0, window_bounds = array<i64: 8, 8>}, {pipeline_mode = #tpu.pipeline_mode<synchronous>, transform_indices = @transform_1, window_bounds = array<i64: 8, 128>}, {pipeline_mode = #tpu.pipeline_mode<synchronous>, transform_indices = @transform_2, window_bounds = array<i64: 1, 128>}, {pipeline_mode = #tpu.pipeline_mode<synchronous>, transform_indices = @transform_3, window_bounds = array<i64: 128, 128>}, {pipeline_mode = #tpu.pipeline_mode<synchronous>, transform_indices = @transform_4, window_bounds = array<i64: 1, 128>}, {pipeline_mode = #tpu.pipeline_mode<synchronous>, transform_indices = @transform_5, window_bounds = array<i64: 128, 128>}, {pipeline_mode = #tpu.pipeline_mode<synchronous>, transform_indices = @transform_6, window_bounds = array<i64: 1, 128>}, {pipeline_mode = #tpu.pipeline_mode<synchronous>, transform_indices = @transform_7, window_bounds = array<i64: 1, 128>}, {pipeline_mode = #tpu.pipeline_mode<synchronous>, transform_indices = @transform_8, window_bounds = array<i64: 128, 8>}, {pipeline_mode = #tpu.pipeline_mode<synchronous>, transform_indices = @transform_9, window_bounds = array<i64: 128, 128>}, {pipeline_mode = #tpu.pipeline_mode<synchronous>, transform_indices = @transform_10, window_bounds = array<i64: 128, 128>}, {transform_indices = @transform_11, window_bounds = array<i64: 8, 8>}]} {
    %c0 = arith.constant 0 : index
    %c0_0 = arith.constant 0 : index
    %0 = vector.load %arg1[%c0, %c0_0] : memref<8x8xf32, #tpu.memory_space<vmem>>, vector<8x8xf32>
    %c0_1 = arith.constant 0 : index
    %c0_2 = arith.constant 0 : index
    %1 = vector.load %arg2[%c0_1, %c0_2] : memref<8x128xf32, #tpu.memory_space<vmem>>, vector<8x128xf32>
    %c0_3 = arith.constant 0 : index
    %c0_4 = arith.constant 0 : index
    %2 = vector.load %arg4[%c0_3, %c0_4] : memref<128x128xf32, #tpu.memory_space<vmem>>, vector<128x128xf32>
    %c0_5 = arith.constant 0 : index
    %c0_6 = arith.constant 0 : index
    %3 = vector.load %arg6[%c0_5, %c0_6] : memref<128x128xf32, #tpu.memory_space<vmem>>, vector<128x128xf32>
    %c0_7 = arith.constant 0 : index
    %c0_8 = arith.constant 0 : index
    %4 = vector.load %arg8[%c0_7, %c0_8] : memref<1x128xf32, #tpu.memory_space<vmem>>, vector<1x128xf32>
    %c0_9 = arith.constant 0 : index
    %c0_10 = arith.constant 0 : index
    %5 = vector.load %arg3[%c0_9, %c0_10] : memref<1x128xf32, #tpu.memory_space<vmem>>, vector<1x128xf32>
    %c0_11 = arith.constant 0 : index
    %c0_12 = arith.constant 0 : index
    %6 = vector.load %arg5[%c0_11, %c0_12] : memref<1x128xf32, #tpu.memory_space<vmem>>, vector<1x128xf32>
    %c0_13 = arith.constant 0 : index
    %c0_14 = arith.constant 0 : index
    %7 = vector.load %arg7[%c0_13, %c0_14] : memref<1x128xf32, #tpu.memory_space<vmem>>, vector<1x128xf32>
    %c0_15 = arith.constant 0 : index
    %c0_16 = arith.constant 0 : index
    %8 = vector.load %arg9[%c0_15, %c0_16] : memref<128x8xf32, #tpu.memory_space<vmem>>, vector<128x8xf32>
    %c0_17 = arith.constant 0 : index
    %c0_18 = arith.constant 0 : index
    %9 = vector.load %arg10[%c0_17, %c0_18] : memref<128x128xf32, #tpu.memory_space<vmem>>, vector<128x128xf32>
    %c0_19 = arith.constant 0 : index
    %c0_20 = arith.constant 0 : index
    %10 = vector.load %arg11[%c0_19, %c0_20] : memref<128x128xf32, #tpu.memory_space<vmem>>, vector<128x128xf32>
    %cst = arith.constant dense<0.000000e+00> : vector<8x128xf32>
    %11 = tpu.matmul %0, %1, %cst {dimension_numbers = #tpu.dot_dimension_numbers<[1], [0], [0], [1], [0, 0, 1, 1], [], []>, precision = #tpu.contract_precision<fp32>} : vector<8x8xf32>, vector<8x128xf32>, vector<8x128xf32> -> vector<8x128xf32>
    %12 = vector.broadcast %5 : vector<1x128xf32> to vector<8x128xf32>
    %13 = arith.addf %11, %12 : vector<8x128xf32>
    %cst_21 = arith.constant 0.000000e+00 : f32
    %14 = vector.broadcast %cst_21 : f32 to vector<8x128xf32>
    %15 = arith.subf %14, %13 : vector<8x128xf32>
    %16 = math.exp %15 : vector<8x128xf32>
    %cst_22 = arith.constant 1.000000e+00 : f32
    %17 = vector.broadcast %cst_22 : f32 to vector<8x128xf32>
    %18 = arith.addf %17, %16 : vector<8x128xf32>
    %cst_23 = arith.constant 1.000000e+00 : f32
    %19 = vector.broadcast %cst_23 : f32 to vector<8x128xf32>
    %20 = arith.divf %19, %18 : vector<8x128xf32>
    %cst_24 = arith.constant 0.000000e+00 : f32
    %21 = vector.broadcast %cst_24 : f32 to vector<8x128xf32>
    %22 = arith.maximumf %13, %21 : vector<8x128xf32>
    %23 = math.absf %13 : vector<8x128xf32>
    %cst_25 = arith.constant 0.000000e+00 : f32
    %24 = vector.broadcast %cst_25 : f32 to vector<8x128xf32>
    %25 = arith.subf %24, %23 : vector<8x128xf32>
    %26 = math.exp %25 : vector<8x128xf32>
    %27 = math.log1p %26 : vector<8x128xf32>
    %28 = arith.addf %22, %27 : vector<8x128xf32>
    %29 = vector.extract_strided_slice %1 {offsets = [4, 0], sizes = [4, 128], strides = [1, 1]} : vector<8x128xf32> to vector<4x128xf32>
    %30 = vector.shape_cast %20 : vector<8x128xf32> to vector<1x8x128xf32>
    %31 = vector.shape_cast %29 : vector<4x128xf32> to vector<4x1x128xf32>
    %32 = vector.broadcast %30 : vector<1x8x128xf32> to vector<4x8x128xf32>
    %33 = vector.broadcast %31 : vector<4x1x128xf32> to vector<4x8x128xf32>
    %34 = arith.mulf %32, %33 : vector<4x8x128xf32>
    %35 = vector.shape_cast %34 : vector<4x8x128xf32> to vector<32x128xf32>
    %36 = tpu.concatenate %28, %35 in 0 : vector<8x128xf32>, vector<32x128xf32> -> vector<40x128xf32>
    %cst_26 = arith.constant dense<0.000000e+00> : vector<40x128xf32>
    %37 = tpu.matmul %36, %2, %cst_26 {dimension_numbers = #tpu.dot_dimension_numbers<[1], [0], [0], [1], [0, 0, 1, 1], [], []>, precision = #tpu.contract_precision<fp32>} : vector<40x128xf32>, vector<128x128xf32>, vector<40x128xf32> -> vector<40x128xf32>
    %38 = vector.extract_strided_slice %37 {offsets = [0, 0], sizes = [8, 128], strides = [1, 1]} : vector<40x128xf32> to vector<8x128xf32>
    %39 = vector.extract_strided_slice %37 {offsets = [8, 0], sizes = [32, 128], strides = [1, 1]} : vector<40x128xf32> to vector<32x128xf32>
    %40 = vector.shape_cast %39 : vector<32x128xf32> to vector<4x8x128xf32>
    %41 = vector.broadcast %6 : vector<1x128xf32> to vector<8x128xf32>
    %42 = arith.addf %38, %41 : vector<8x128xf32>
    %cst_27 = arith.constant 0.000000e+00 : f32
    %43 = vector.broadcast %cst_27 : f32 to vector<8x128xf32>
    %44 = arith.subf %43, %42 : vector<8x128xf32>
    %45 = math.exp %44 : vector<8x128xf32>
    %cst_28 = arith.constant 1.000000e+00 : f32
    %46 = vector.broadcast %cst_28 : f32 to vector<8x128xf32>
    %47 = arith.addf %46, %45 : vector<8x128xf32>
    %cst_29 = arith.constant 1.000000e+00 : f32
    %48 = vector.broadcast %cst_29 : f32 to vector<8x128xf32>
    %49 = arith.divf %48, %47 : vector<8x128xf32>
    %cst_30 = arith.constant 0.000000e+00 : f32
    %50 = vector.broadcast %cst_30 : f32 to vector<8x128xf32>
    %51 = arith.maximumf %42, %50 : vector<8x128xf32>
    %52 = math.absf %42 : vector<8x128xf32>
    %cst_31 = arith.constant 0.000000e+00 : f32
    %53 = vector.broadcast %cst_31 : f32 to vector<8x128xf32>
    %54 = arith.subf %53, %52 : vector<8x128xf32>
    %55 = math.exp %54 : vector<8x128xf32>
    %56 = math.log1p %55 : vector<8x128xf32>
    %57 = arith.addf %51, %56 : vector<8x128xf32>
    %58 = vector.shape_cast %49 : vector<8x128xf32> to vector<1x8x128xf32>
    %59 = vector.broadcast %58 : vector<1x8x128xf32> to vector<4x8x128xf32>
    %60 = arith.mulf %59, %40 : vector<4x8x128xf32>
    %61 = vector.shape_cast %60 : vector<4x8x128xf32> to vector<32x128xf32>
    %62 = tpu.concatenate %57, %61 in 0 : vector<8x128xf32>, vector<32x128xf32> -> vector<40x128xf32>
    %cst_32 = arith.constant dense<0.000000e+00> : vector<40x128xf32>
    %63 = tpu.matmul %62, %3, %cst_32 {dimension_numbers = #tpu.dot_dimension_numbers<[1], [0], [0], [1], [0, 0, 1, 1], [], []>, precision = #tpu.contract_precision<fp32>} : vector<40x128xf32>, vector<128x128xf32>, vector<40x128xf32> -> vector<40x128xf32>
    %64 = vector.extract_strided_slice %63 {offsets = [0, 0], sizes = [8, 128], strides = [1, 1]} : vector<40x128xf32> to vector<8x128xf32>
    %65 = vector.extract_strided_slice %63 {offsets = [8, 0], sizes = [32, 128], strides = [1, 1]} : vector<40x128xf32> to vector<32x128xf32>
    %66 = vector.shape_cast %65 : vector<32x128xf32> to vector<4x8x128xf32>
    %67 = vector.broadcast %7 : vector<1x128xf32> to vector<8x128xf32>
    %68 = arith.addf %64, %67 : vector<8x128xf32>
    %cst_33 = arith.constant 0.000000e+00 : f32
    %69 = vector.broadcast %cst_33 : f32 to vector<8x128xf32>
    %70 = arith.subf %69, %68 : vector<8x128xf32>
    %71 = math.exp %70 : vector<8x128xf32>
    %cst_34 = arith.constant 1.000000e+00 : f32
    %72 = vector.broadcast %cst_34 : f32 to vector<8x128xf32>
    %73 = arith.addf %72, %71 : vector<8x128xf32>
    %cst_35 = arith.constant 1.000000e+00 : f32
    %74 = vector.broadcast %cst_35 : f32 to vector<8x128xf32>
    %75 = arith.divf %74, %73 : vector<8x128xf32>
    %76 = vector.broadcast %4 : vector<1x128xf32> to vector<8x128xf32>
    %77 = arith.mulf %75, %76 : vector<8x128xf32>
    %cst_36 = arith.constant 1.000000e+00 : f32
    %78 = vector.broadcast %cst_36 : f32 to vector<8x128xf32>
    %79 = arith.subf %78, %75 : vector<8x128xf32>
    %80 = arith.mulf %75, %79 : vector<8x128xf32>
    %81 = vector.broadcast %4 : vector<1x128xf32> to vector<8x128xf32>
    %82 = arith.mulf %80, %81 : vector<8x128xf32>
    %83 = vector.shape_cast %82 : vector<8x128xf32> to vector<1x8x128xf32>
    %84 = vector.broadcast %83 : vector<1x8x128xf32> to vector<4x8x128xf32>
    %85 = arith.mulf %84, %66 : vector<4x8x128xf32>
    %86 = vector.shape_cast %85 : vector<4x8x128xf32> to vector<32x128xf32>
    %87 = tpu.concatenate %77, %86 in 0 : vector<8x128xf32>, vector<32x128xf32> -> vector<40x128xf32>
    %cst_37 = arith.constant dense<0.000000e+00> : vector<40x128xf32>
    %88 = tpu.matmul %87, %10, %cst_37 {dimension_numbers = #tpu.dot_dimension_numbers<[1], [0], [0], [1], [0, 0, 1, 1], [], []>, precision = #tpu.contract_precision<fp32>} : vector<40x128xf32>, vector<128x128xf32>, vector<40x128xf32> -> vector<40x128xf32>
    %89 = vector.extract_strided_slice %88 {offsets = [0, 0], sizes = [8, 128], strides = [1, 1]} : vector<40x128xf32> to vector<8x128xf32>
    %90 = vector.extract_strided_slice %88 {offsets = [8, 0], sizes = [32, 128], strides = [1, 1]} : vector<40x128xf32> to vector<32x128xf32>
    %91 = vector.shape_cast %90 : vector<32x128xf32> to vector<4x8x128xf32>
    %92 = arith.mulf %49, %89 : vector<8x128xf32>
    %cst_38 = arith.constant 1.000000e+00 : f32
    %93 = vector.broadcast %cst_38 : f32 to vector<8x128xf32>
    %94 = arith.subf %93, %49 : vector<8x128xf32>
    %95 = arith.mulf %49, %94 : vector<8x128xf32>
    %96 = arith.mulf %95, %89 : vector<8x128xf32>
    %97 = vector.shape_cast %96 : vector<8x128xf32> to vector<1x8x128xf32>
    %98 = vector.broadcast %97 : vector<1x8x128xf32> to vector<4x8x128xf32>
    %99 = arith.mulf %98, %40 : vector<4x8x128xf32>
    %100 = vector.shape_cast %49 : vector<8x128xf32> to vector<1x8x128xf32>
    %101 = vector.broadcast %100 : vector<1x8x128xf32> to vector<4x8x128xf32>
    %102 = arith.mulf %101, %91 : vector<4x8x128xf32>
    %103 = arith.addf %99, %102 : vector<4x8x128xf32>
    %104 = vector.shape_cast %103 : vector<4x8x128xf32> to vector<32x128xf32>
    %105 = tpu.concatenate %92, %104 in 0 : vector<8x128xf32>, vector<32x128xf32> -> vector<40x128xf32>
    %cst_39 = arith.constant dense<0.000000e+00> : vector<40x128xf32>
    %106 = tpu.matmul %105, %9, %cst_39 {dimension_numbers = #tpu.dot_dimension_numbers<[1], [0], [0], [1], [0, 0, 1, 1], [], []>, precision = #tpu.contract_precision<fp32>} : vector<40x128xf32>, vector<128x128xf32>, vector<40x128xf32> -> vector<40x128xf32>
    %107 = vector.extract_strided_slice %106 {offsets = [0, 0], sizes = [8, 128], strides = [1, 1]} : vector<40x128xf32> to vector<8x128xf32>
    %108 = vector.extract_strided_slice %106 {offsets = [8, 0], sizes = [32, 128], strides = [1, 1]} : vector<40x128xf32> to vector<32x128xf32>
    %109 = vector.shape_cast %108 : vector<32x128xf32> to vector<4x8x128xf32>
    %110 = arith.mulf %20, %107 : vector<8x128xf32>
    %cst_40 = arith.constant 1.000000e+00 : f32
    %111 = vector.broadcast %cst_40 : f32 to vector<8x128xf32>
    %112 = arith.subf %111, %20 : vector<8x128xf32>
    %113 = arith.mulf %20, %112 : vector<8x128xf32>
    %114 = arith.mulf %113, %107 : vector<8x128xf32>
    %115 = vector.shape_cast %114 : vector<8x128xf32> to vector<1x8x128xf32>
    %116 = vector.shape_cast %29 : vector<4x128xf32> to vector<4x1x128xf32>
    %117 = vector.broadcast %115 : vector<1x8x128xf32> to vector<4x8x128xf32>
    %118 = vector.broadcast %116 : vector<4x1x128xf32> to vector<4x8x128xf32>
    %119 = arith.mulf %117, %118 : vector<4x8x128xf32>
    %120 = vector.shape_cast %20 : vector<8x128xf32> to vector<1x8x128xf32>
    %121 = vector.broadcast %120 : vector<1x8x128xf32> to vector<4x8x128xf32>
    %122 = arith.mulf %121, %109 : vector<4x8x128xf32>
    %123 = arith.addf %119, %122 : vector<4x8x128xf32>
    %124 = vector.shape_cast %123 : vector<4x8x128xf32> to vector<32x128xf32>
    %125 = tpu.concatenate %110, %124 in 0 : vector<8x128xf32>, vector<32x128xf32> -> vector<40x128xf32>
    %cst_41 = arith.constant dense<0.000000e+00> : vector<40x8xf32>
    %126 = tpu.matmul %125, %8, %cst_41 {dimension_numbers = #tpu.dot_dimension_numbers<[1], [0], [0], [1], [0, 0, 1, 1], [], []>, precision = #tpu.contract_precision<fp32>} : vector<40x128xf32>, vector<128x8xf32>, vector<40x8xf32> -> vector<40x8xf32>
    %127 = vector.extract_strided_slice %126 {offsets = [0, 0], sizes = [8, 8], strides = [1, 1]} : vector<40x8xf32> to vector<8x8xf32>
    %128 = vector.extract_strided_slice %126 {offsets = [8, 0], sizes = [32, 8], strides = [1, 1]} : vector<40x8xf32> to vector<32x8xf32>
    %129 = vector.shape_cast %128 : vector<32x8xf32> to vector<4x8x8xf32>
    %130 = vector.extract_strided_slice %0 {offsets = [0, 4], sizes = [8, 4], strides = [1, 1]} : vector<8x8xf32> to vector<8x4xf32>
    %131 = vector.extract_strided_slice %127 {offsets = [0, 0], sizes = [8, 4], strides = [1, 1]} : vector<8x8xf32> to vector<8x4xf32>
    %132 = vector.extract_strided_slice %129 {offsets = [0, 0, 0], sizes = [1, 8, 8], strides = [1, 1, 1]} : vector<4x8x8xf32> to vector<1x8x8xf32>
    %133 = vector.shape_cast %132 : vector<1x8x8xf32> to vector<8x8xf32>
    %134 = tpu.iota {dimensions = array<i32: 1>} : vector<1x4xi32>
    %c0_i32 = arith.constant 0 : i32
    %135 = vector.broadcast %c0_i32 : i32 to vector<1x4xi32>
    %136 = arith.cmpi eq, %134, %135 : vector<1x4xi32>
    %137 = vector.extract_strided_slice %133 {offsets = [0, 4], sizes = [8, 4], strides = [1, 1]} : vector<8x8xf32> to vector<8x4xf32>
    %138 = arith.extui %136 : vector<1x4xi1> to vector<1x4xi32>
    %139 = arith.sitofp %138 : vector<1x4xi32> to vector<1x4xf32>
    %cst_42 = arith.constant 2.000000e-01 : f32
    %140 = vector.broadcast %cst_42 : f32 to vector<1x4xf32>
    %141 = arith.mulf %140, %139 : vector<1x4xf32>
    %142 = vector.broadcast %141 : vector<1x4xf32> to vector<8x4xf32>
    %143 = arith.addf %137, %142 : vector<8x4xf32>
    %144 = vector.extract_strided_slice %131 {offsets = [0, 0], sizes = [8, 1], strides = [1, 1]} : vector<8x4xf32> to vector<8x1xf32>
    %145 = vector.extract_strided_slice %133 {offsets = [0, 0], sizes = [8, 4], strides = [1, 1]} : vector<8x8xf32> to vector<8x4xf32>
    %146 = arith.mulf %145, %130 : vector<8x4xf32>
    %cst_43 = arith.constant dense<0.000000e+00> : vector<8xf32>
    %147 = vector.multi_reduction <add>, %146, %cst_43 [1] : vector<8x4xf32> to vector<8xf32>
    %148 = vector.shape_cast %147 : vector<8xf32> to vector<8x1xf32>
    %149 = arith.subf %144, %148 : vector<8x1xf32>
    %150 = vector.extract_strided_slice %129 {offsets = [1, 0, 0], sizes = [1, 8, 8], strides = [1, 1, 1]} : vector<4x8x8xf32> to vector<1x8x8xf32>
    %151 = vector.shape_cast %150 : vector<1x8x8xf32> to vector<8x8xf32>
    %152 = tpu.iota {dimensions = array<i32: 1>} : vector<1x4xi32>
    %c1_i32 = arith.constant 1 : i32
    %153 = vector.broadcast %c1_i32 : i32 to vector<1x4xi32>
    %154 = arith.cmpi eq, %152, %153 : vector<1x4xi32>
    %155 = vector.extract_strided_slice %151 {offsets = [0, 4], sizes = [8, 4], strides = [1, 1]} : vector<8x8xf32> to vector<8x4xf32>
    %156 = arith.extui %154 : vector<1x4xi1> to vector<1x4xi32>
    %157 = arith.sitofp %156 : vector<1x4xi32> to vector<1x4xf32>
    %cst_44 = arith.constant 2.000000e-01 : f32
    %158 = vector.broadcast %cst_44 : f32 to vector<1x4xf32>
    %159 = arith.mulf %158, %157 : vector<1x4xf32>
    %160 = vector.broadcast %159 : vector<1x4xf32> to vector<8x4xf32>
    %161 = arith.addf %155, %160 : vector<8x4xf32>
    %162 = vector.extract_strided_slice %131 {offsets = [0, 1], sizes = [8, 1], strides = [1, 1]} : vector<8x4xf32> to vector<8x1xf32>
    %163 = vector.extract_strided_slice %151 {offsets = [0, 0], sizes = [8, 4], strides = [1, 1]} : vector<8x8xf32> to vector<8x4xf32>
    %164 = arith.mulf %163, %130 : vector<8x4xf32>
    %cst_45 = arith.constant dense<0.000000e+00> : vector<8xf32>
    %165 = vector.multi_reduction <add>, %164, %cst_45 [1] : vector<8x4xf32> to vector<8xf32>
    %166 = vector.shape_cast %165 : vector<8xf32> to vector<8x1xf32>
    %167 = arith.subf %162, %166 : vector<8x1xf32>
    %168 = vector.extract_strided_slice %129 {offsets = [2, 0, 0], sizes = [1, 8, 8], strides = [1, 1, 1]} : vector<4x8x8xf32> to vector<1x8x8xf32>
    %169 = vector.shape_cast %168 : vector<1x8x8xf32> to vector<8x8xf32>
    %170 = tpu.iota {dimensions = array<i32: 1>} : vector<1x4xi32>
    %c2_i32 = arith.constant 2 : i32
    %171 = vector.broadcast %c2_i32 : i32 to vector<1x4xi32>
    %172 = arith.cmpi eq, %170, %171 : vector<1x4xi32>
    %173 = vector.extract_strided_slice %169 {offsets = [0, 4], sizes = [8, 4], strides = [1, 1]} : vector<8x8xf32> to vector<8x4xf32>
    %174 = arith.extui %172 : vector<1x4xi1> to vector<1x4xi32>
    %175 = arith.sitofp %174 : vector<1x4xi32> to vector<1x4xf32>
    %cst_46 = arith.constant 2.000000e-01 : f32
    %176 = vector.broadcast %cst_46 : f32 to vector<1x4xf32>
    %177 = arith.mulf %176, %175 : vector<1x4xf32>
    %178 = vector.broadcast %177 : vector<1x4xf32> to vector<8x4xf32>
    %179 = arith.addf %173, %178 : vector<8x4xf32>
    %180 = vector.extract_strided_slice %131 {offsets = [0, 2], sizes = [8, 1], strides = [1, 1]} : vector<8x4xf32> to vector<8x1xf32>
    %181 = vector.extract_strided_slice %169 {offsets = [0, 0], sizes = [8, 4], strides = [1, 1]} : vector<8x8xf32> to vector<8x4xf32>
    %182 = arith.mulf %181, %130 : vector<8x4xf32>
    %cst_47 = arith.constant dense<0.000000e+00> : vector<8xf32>
    %183 = vector.multi_reduction <add>, %182, %cst_47 [1] : vector<8x4xf32> to vector<8xf32>
    %184 = vector.shape_cast %183 : vector<8xf32> to vector<8x1xf32>
    %185 = arith.subf %180, %184 : vector<8x1xf32>
    %186 = vector.extract_strided_slice %129 {offsets = [3, 0, 0], sizes = [1, 8, 8], strides = [1, 1, 1]} : vector<4x8x8xf32> to vector<1x8x8xf32>
    %187 = vector.shape_cast %186 : vector<1x8x8xf32> to vector<8x8xf32>
    %188 = tpu.iota {dimensions = array<i32: 1>} : vector<1x4xi32>
    %c3_i32 = arith.constant 3 : i32
    %189 = vector.broadcast %c3_i32 : i32 to vector<1x4xi32>
    %190 = arith.cmpi eq, %188, %189 : vector<1x4xi32>
    %191 = vector.extract_strided_slice %187 {offsets = [0, 4], sizes = [8, 4], strides = [1, 1]} : vector<8x8xf32> to vector<8x4xf32>
    %192 = arith.extui %190 : vector<1x4xi1> to vector<1x4xi32>
    %193 = arith.sitofp %192 : vector<1x4xi32> to vector<1x4xf32>
    %cst_48 = arith.constant 2.000000e-01 : f32
    %194 = vector.broadcast %cst_48 : f32 to vector<1x4xf32>
    %195 = arith.mulf %194, %193 : vector<1x4xf32>
    %196 = vector.broadcast %195 : vector<1x4xf32> to vector<8x4xf32>
    %197 = arith.addf %191, %196 : vector<8x4xf32>
    %198 = vector.extract_strided_slice %131 {offsets = [0, 3], sizes = [8, 1], strides = [1, 1]} : vector<8x4xf32> to vector<8x1xf32>
    %199 = vector.extract_strided_slice %187 {offsets = [0, 0], sizes = [8, 4], strides = [1, 1]} : vector<8x8xf32> to vector<8x4xf32>
    %200 = arith.mulf %199, %130 : vector<8x4xf32>
    %cst_49 = arith.constant dense<0.000000e+00> : vector<8xf32>
    %201 = vector.multi_reduction <add>, %200, %cst_49 [1] : vector<8x4xf32> to vector<8xf32>
    %202 = vector.shape_cast %201 : vector<8xf32> to vector<8x1xf32>
    %203 = arith.subf %198, %202 : vector<8x1xf32>
    %204 = vector.extract_strided_slice %143 {offsets = [0, 0], sizes = [8, 1], strides = [1, 1]} : vector<8x4xf32> to vector<8x1xf32>
    %cst_50 = arith.constant 1.000000e+00 : f32
    %205 = vector.broadcast %cst_50 : f32 to vector<8x1xf32>
    %206 = arith.divf %205, %204 : vector<8x1xf32>
    %207 = vector.broadcast %206 : vector<8x1xf32> to vector<8x4xf32>
    %208 = arith.mulf %143, %207 : vector<8x4xf32>
    %209 = arith.mulf %149, %206 : vector<8x1xf32>
    %210 = vector.extract_strided_slice %161 {offsets = [0, 0], sizes = [8, 1], strides = [1, 1]} : vector<8x4xf32> to vector<8x1xf32>
    %211 = vector.broadcast %210 : vector<8x1xf32> to vector<8x4xf32>
    %212 = arith.mulf %211, %208 : vector<8x4xf32>
    %213 = arith.subf %161, %212 : vector<8x4xf32>
    %214 = arith.mulf %210, %209 : vector<8x1xf32>
    %215 = arith.subf %167, %214 : vector<8x1xf32>
    %216 = vector.extract_strided_slice %179 {offsets = [0, 0], sizes = [8, 1], strides = [1, 1]} : vector<8x4xf32> to vector<8x1xf32>
    %217 = vector.broadcast %216 : vector<8x1xf32> to vector<8x4xf32>
    %218 = arith.mulf %217, %208 : vector<8x4xf32>
    %219 = arith.subf %179, %218 : vector<8x4xf32>
    %220 = arith.mulf %216, %209 : vector<8x1xf32>
    %221 = arith.subf %185, %220 : vector<8x1xf32>
    %222 = vector.extract_strided_slice %197 {offsets = [0, 0], sizes = [8, 1], strides = [1, 1]} : vector<8x4xf32> to vector<8x1xf32>
    %223 = vector.broadcast %222 : vector<8x1xf32> to vector<8x4xf32>
    %224 = arith.mulf %223, %208 : vector<8x4xf32>
    %225 = arith.subf %197, %224 : vector<8x4xf32>
    %226 = arith.mulf %222, %209 : vector<8x1xf32>
    %227 = arith.subf %203, %226 : vector<8x1xf32>
    %228 = vector.extract_strided_slice %213 {offsets = [0, 1], sizes = [8, 1], strides = [1, 1]} : vector<8x4xf32> to vector<8x1xf32>
    %cst_51 = arith.constant 1.000000e+00 : f32
    %229 = vector.broadcast %cst_51 : f32 to vector<8x1xf32>
    %230 = arith.divf %229, %228 : vector<8x1xf32>
    %231 = vector.broadcast %230 : vector<8x1xf32> to vector<8x4xf32>
    %232 = arith.mulf %213, %231 : vector<8x4xf32>
    %233 = arith.mulf %215, %230 : vector<8x1xf32>
    %234 = vector.extract_strided_slice %208 {offsets = [0, 1], sizes = [8, 1], strides = [1, 1]} : vector<8x4xf32> to vector<8x1xf32>
    %235 = vector.broadcast %234 : vector<8x1xf32> to vector<8x4xf32>
    %236 = arith.mulf %235, %232 : vector<8x4xf32>
    %237 = arith.subf %208, %236 : vector<8x4xf32>
    %238 = arith.mulf %234, %233 : vector<8x1xf32>
    %239 = arith.subf %209, %238 : vector<8x1xf32>
    %240 = vector.extract_strided_slice %219 {offsets = [0, 1], sizes = [8, 1], strides = [1, 1]} : vector<8x4xf32> to vector<8x1xf32>
    %241 = vector.broadcast %240 : vector<8x1xf32> to vector<8x4xf32>
    %242 = arith.mulf %241, %232 : vector<8x4xf32>
    %243 = arith.subf %219, %242 : vector<8x4xf32>
    %244 = arith.mulf %240, %233 : vector<8x1xf32>
    %245 = arith.subf %221, %244 : vector<8x1xf32>
    %246 = vector.extract_strided_slice %225 {offsets = [0, 1], sizes = [8, 1], strides = [1, 1]} : vector<8x4xf32> to vector<8x1xf32>
    %247 = vector.broadcast %246 : vector<8x1xf32> to vector<8x4xf32>
    %248 = arith.mulf %247, %232 : vector<8x4xf32>
    %249 = arith.subf %225, %248 : vector<8x4xf32>
    %250 = arith.mulf %246, %233 : vector<8x1xf32>
    %251 = arith.subf %227, %250 : vector<8x1xf32>
    %252 = vector.extract_strided_slice %243 {offsets = [0, 2], sizes = [8, 1], strides = [1, 1]} : vector<8x4xf32> to vector<8x1xf32>
    %cst_52 = arith.constant 1.000000e+00 : f32
    %253 = vector.broadcast %cst_52 : f32 to vector<8x1xf32>
    %254 = arith.divf %253, %252 : vector<8x1xf32>
    %255 = vector.broadcast %254 : vector<8x1xf32> to vector<8x4xf32>
    %256 = arith.mulf %243, %255 : vector<8x4xf32>
    %257 = arith.mulf %245, %254 : vector<8x1xf32>
    %258 = vector.extract_strided_slice %237 {offsets = [0, 2], sizes = [8, 1], strides = [1, 1]} : vector<8x4xf32> to vector<8x1xf32>
    %259 = vector.broadcast %258 : vector<8x1xf32> to vector<8x4xf32>
    %260 = arith.mulf %259, %256 : vector<8x4xf32>
    %261 = arith.subf %237, %260 : vector<8x4xf32>
    %262 = arith.mulf %258, %257 : vector<8x1xf32>
    %263 = arith.subf %239, %262 : vector<8x1xf32>
    %264 = vector.extract_strided_slice %232 {offsets = [0, 2], sizes = [8, 1], strides = [1, 1]} : vector<8x4xf32> to vector<8x1xf32>
    %265 = vector.broadcast %264 : vector<8x1xf32> to vector<8x4xf32>
    %266 = arith.mulf %265, %256 : vector<8x4xf32>
    %267 = arith.subf %232, %266 : vector<8x4xf32>
    %268 = arith.mulf %264, %257 : vector<8x1xf32>
    %269 = arith.subf %233, %268 : vector<8x1xf32>
    %270 = vector.extract_strided_slice %249 {offsets = [0, 2], sizes = [8, 1], strides = [1, 1]} : vector<8x4xf32> to vector<8x1xf32>
    %271 = vector.broadcast %270 : vector<8x1xf32> to vector<8x4xf32>
    %272 = arith.mulf %271, %256 : vector<8x4xf32>
    %273 = arith.subf %249, %272 : vector<8x4xf32>
    %274 = arith.mulf %270, %257 : vector<8x1xf32>
    %275 = arith.subf %251, %274 : vector<8x1xf32>
    %276 = vector.extract_strided_slice %273 {offsets = [0, 3], sizes = [8, 1], strides = [1, 1]} : vector<8x4xf32> to vector<8x1xf32>
    %cst_53 = arith.constant 1.000000e+00 : f32
    %277 = vector.broadcast %cst_53 : f32 to vector<8x1xf32>
    %278 = arith.divf %277, %276 : vector<8x1xf32>
    %279 = arith.mulf %275, %278 : vector<8x1xf32>
    %280 = vector.extract_strided_slice %261 {offsets = [0, 3], sizes = [8, 1], strides = [1, 1]} : vector<8x4xf32> to vector<8x1xf32>
    %281 = arith.mulf %280, %279 : vector<8x1xf32>
    %282 = arith.subf %263, %281 : vector<8x1xf32>
    %283 = vector.extract_strided_slice %267 {offsets = [0, 3], sizes = [8, 1], strides = [1, 1]} : vector<8x4xf32> to vector<8x1xf32>
    %284 = arith.mulf %283, %279 : vector<8x1xf32>
    %285 = arith.subf %269, %284 : vector<8x1xf32>
    %286 = vector.extract_strided_slice %256 {offsets = [0, 3], sizes = [8, 1], strides = [1, 1]} : vector<8x4xf32> to vector<8x1xf32>
    %287 = arith.mulf %286, %279 : vector<8x1xf32>
    %288 = arith.subf %257, %287 : vector<8x1xf32>
    %289 = tpu.concatenate %282, %285, %288, %279 in 1 : vector<8x1xf32>, vector<8x1xf32>, vector<8x1xf32>, vector<8x1xf32> -> vector<8x4xf32>
    %290 = tpu.concatenate %130, %289 in 1 : vector<8x4xf32>, vector<8x4xf32> -> vector<8x8xf32>
    %c0_54 = arith.constant 0 : index
    %c0_55 = arith.constant 0 : index
    %291 = vector.load %arg12[%c0_54, %c0_55] : memref<8x8xf32, #tpu.memory_space<vmem>>, vector<8x8xf32>
    tpu.vector_store %arg12[%c0_54, %c0_55], %290 {strides = array<i32>} : memref<8x8xf32, #tpu.memory_space<vmem>>, vector<8x8xf32>,
    return
  }
  func.func @transform_0(%arg0: i32) -> (i32, i32) {
    %c0_i32 = arith.constant 0 : i32
    %c0_i32_0 = arith.constant 0 : i32
    return %arg0, %c0_i32 : i32, i32
  }
  func.func @transform_1(%arg0: i32) -> (i32, i32) {
    %c0_i32 = arith.constant 0 : i32
    %c0_i32_0 = arith.constant 0 : i32
    %c0_i32_1 = arith.constant 0 : i32
    return %c0_i32, %c0_i32_0 : i32, i32
  }
  func.func @transform_2(%arg0: i32) -> (i32, i32) {
    %c0_i32 = arith.constant 0 : i32
    %c0_i32_0 = arith.constant 0 : i32
    %c0_i32_1 = arith.constant 0 : i32
    return %c0_i32, %c0_i32_0 : i32, i32
  }
  func.func @transform_3(%arg0: i32) -> (i32, i32) {
    %c0_i32 = arith.constant 0 : i32
    %c0_i32_0 = arith.constant 0 : i32
    %c0_i32_1 = arith.constant 0 : i32
    return %c0_i32, %c0_i32_0 : i32, i32
  }
  func.func @transform_4(%arg0: i32) -> (i32, i32) {
    %c0_i32 = arith.constant 0 : i32
    %c0_i32_0 = arith.constant 0 : i32
    %c0_i32_1 = arith.constant 0 : i32
    return %c0_i32, %c0_i32_0 : i32, i32
  }
  func.func @transform_5(%arg0: i32) -> (i32, i32) {
    %c0_i32 = arith.constant 0 : i32
    %c0_i32_0 = arith.constant 0 : i32
    %c0_i32_1 = arith.constant 0 : i32
    return %c0_i32, %c0_i32_0 : i32, i32
  }
  func.func @transform_6(%arg0: i32) -> (i32, i32) {
    %c0_i32 = arith.constant 0 : i32
    %c0_i32_0 = arith.constant 0 : i32
    %c0_i32_1 = arith.constant 0 : i32
    return %c0_i32, %c0_i32_0 : i32, i32
  }
  func.func @transform_7(%arg0: i32) -> (i32, i32) {
    %c0_i32 = arith.constant 0 : i32
    %c0_i32_0 = arith.constant 0 : i32
    %c0_i32_1 = arith.constant 0 : i32
    return %c0_i32, %c0_i32_0 : i32, i32
  }
  func.func @transform_8(%arg0: i32) -> (i32, i32) {
    %c0_i32 = arith.constant 0 : i32
    %c0_i32_0 = arith.constant 0 : i32
    %c0_i32_1 = arith.constant 0 : i32
    return %c0_i32, %c0_i32_0 : i32, i32
  }
  func.func @transform_9(%arg0: i32) -> (i32, i32) {
    %c0_i32 = arith.constant 0 : i32
    %c0_i32_0 = arith.constant 0 : i32
    %c0_i32_1 = arith.constant 0 : i32
    return %c0_i32, %c0_i32_0 : i32, i32
  }
  func.func @transform_10(%arg0: i32) -> (i32, i32) {
    %c0_i32 = arith.constant 0 : i32
    %c0_i32_0 = arith.constant 0 : i32
    %c0_i32_1 = arith.constant 0 : i32
    return %c0_i32, %c0_i32_0 : i32, i32
  }
  func.func @transform_11(%arg0: i32) -> (i32, i32) {
    %c0_i32 = arith.constant 0 : i32
    %c0_i32_0 = arith.constant 0 : i32
    return %arg0, %c0_i32 : i32, i32
  }
}

</mosaic_0001>

<bundles_post_ra>
// kernel: lnn_dynamics.1
= control target key start
LH: loop header
LB: loop body
LE: loop exit
PB: predicated region body
PF: predicated region fallthrough
CT: control target
= control target key end

     0   :  { %v10182_v2 = vmov 0.0   ;;  %vm131_vm0 = vcmask 64512   ;;  %s10144_s0 = inlined_call_operand.vmem [shape: f32[8,8], index: 0, kind: input, shape index: {}]   ;;  %s10145_s1 = inlined_call_operand.vmem [shape: f32[8,128], index: 1, kind: input, shape index: {}]   ;;  %s10146_s2 = inlined_call_operand.vmem [shape: f32[1,128], index: 2, kind: input, shape index: {}]   ;;  %s10147_s3 = inlined_call_operand.vmem [shape: f32[128,128], index: 3, kind: input, shape index: {}]   ;;  %s10148_s4 = inlined_call_operand.vmem [shape: f32[1,128], index: 4, kind: input, shape index: {}]   ;;  %s10149_s5 = inlined_call_operand.vmem [shape: f32[128,128], index: 5, kind: input, shape index: {}]   ;;  %s10150_s6 = inlined_call_operand.vmem [shape: f32[1,128], index: 6, kind: input, shape index: {}]   ;;  %s10151_s7 = inlined_call_operand.vmem [shape: f32[1,128], index: 7, kind: input, shape index: {}]   ;;  %s10152_s8 = inlined_call_operand.vmem [shape: f32[128,8], index: 8, kind: input, shape index: {}]   ;;  %s10153_s9 = inlined_call_operand.vmem [shape: f32[128,128], index: 9, kind: input, shape index: {}]   ;;  %s10154_s10 = inlined_call_operand.vmem [shape: f32[128,128], index: 10, kind: input, shape index: {}]   ;;  %s10155_s11 = inlined_call_operand.hbm [shape: f32[8,8], index: 11, kind: output, shape index: {}]  }
   0x1   :  { %v7330_v0 = vld [vmem:[%s10145_s1] sm:$0xff]  ;;  %5740 = vmatprep.subr.mxu0 %v10182_v2  ;;  %5745 = vmatprep.subr.mxu1 %v10182_v2 }
   0x2   :  { %v39_v1 = vld [vmem:[%s10144_s0] sm:$0xff]  ;;  %v166_v3 = vand.u32 4294901760, %v7330_v0 }
   0x3   :  { %16 = vsyncpa [#allocation3], 0  ;;  %vm7253_vm1 = vmmov 0   ;;  %v133_v4 = vsel %vm131_vm0, %v39_v1, 0  ;;  %v56_v14 = vld [vmem:[%s10147_s3 + $0x78] sm:$0xff]  ;;  %v55_v16 = vld [vmem:[%s10147_s3 + $0x70] sm:$0xff] }
   0x4   :  { %5742 = vmatprep.mubr.msk.f32.mxu0 %vm7253_vm1, %v10182_v2  ;;  %5747 = vmatprep.mubr.msk.f32.mxu1 %vm7253_vm1, %v10182_v2  ;;  %v243_v5 = vsub.f32 %v7330_v0, %v166_v3  ;;  %v201_v6 = vand.u32 4294901760, %v133_v4  ;;  %v7365_v15 = vand.u32 4294901760, %v56_v14  ;;  %v7373_v18 = vand.u32 4294901760, %v55_v16  ;;  %v54_v19 = vld [vmem:[%s10147_s3 + $0x68] sm:$0xff]  ;;  %v53_v23 = vld [vmem:[%s10147_s3 + $0x60] sm:$0xff]  ;;  %v52_v28 = vld [vmem:[%s10147_s3 + $0x58] sm:$0xff] }
   0x5   :  { %5741 = vmatpush3.msra.mxu0 %v166_v3  ;;  %v7384_v22 = vand.u32 4294901760, %v54_v19  ;;  %v7398_v27 = vand.u32 4294901760, %v53_v23  ;;  %v7413_v33 = vand.u32 4294901760, %v52_v28  ;;  %v51_v34 = vld [vmem:[%s10147_s3 + $0x50] sm:$0xff]  ;;  %v50_v40 = vld [vmem:[%s10147_s3 + $0x48] sm:$0xff]  ;;  %v49_v46 = vld [vmem:[%s10147_s3 + $0x40] sm:$0xff] }
   0x6   :  { %5750 = vmatprep.subr.mxu0 %v10182_v2  ;;  %v244_v7 = vand.u32 4294901760, %v243_v5  ;;  %v202_v8 = vsub.f32 %v133_v4, %v201_v6  ;;  %v7371_v17 = vsub.f32 %v56_v14, %v7365_v15  ;;  %v7382_v21 = vsub.f32 %v55_v16, %v7373_v18  ;;  %v48_v52 = vld [vmem:[%s10147_s3 + $0x38] sm:$0xff]  ;;  %v47_v58 = vld [vmem:[%s10147_s3 + $0x30] sm:$0xff]  ;;  %v46_v1 = vld [vmem:[%s10147_s3 + $0x28] sm:$0xff]  ;;  %s7255_s19 = smov 124   ;;  %s7256_s20 = smov 4  }
   0x7   :  { %v7396_v26 = vsub.f32 %v54_v19, %v7384_v22  ;;  %v7410_v32 = vsub.f32 %v53_v23, %v7398_v27  ;;  %v7423_v38 = vand.u32 4294901760, %v51_v34  ;;  %v7427_v39 = vsub.f32 %v52_v28, %v7413_v33  ;;  %v44_v14 = vld [vmem:[%s10147_s3 + $0x18] sm:$0xff]  ;;  %s7261_s1 = smov 126   ;;  %s7262_s21 = smov 127  }
   0x8   :  { %v245_v9 = vsub.f32 %v243_v5, %v244_v7  ;;  %v203_v10 = vand.u32 4294901760, %v202_v8  ;;  %v786_v20 = vand.u32 4294901760, %v7371_v17  ;;  %v793_v25 = vand.u32 4294901760, %v7382_v21  ;;  %s7264_s22 = smov 122   ;;  %s7266_s23 = smov [#allocation2]  }
   0x9   :  { %v800_v31 = vand.u32 4294901760, %v7396_v26  ;;  %v807_v37 = vand.u32 4294901760, %v7410_v32  ;;  %v7437_v43 = vsub.f32 %v51_v34, %v7423_v38  ;;  %v7439_v44 = vand.u32 4294901760, %v50_v40  ;;  %s5082_s24 = sshll.u32 %s7266_s23, 4  ;;  %s5083_s24 = int_to_ptr.vmem [resolvable:$true] %s5082_s24 }
   0xa   :  { %v246_v11 = vand.u32 4294901760, %v245_v9  ;;  %v204_v12 = vsub.f32 %v202_v8, %v203_v10  ;;  %v787_v24 = vsub.f32 %v7371_v17, %v786_v20  ;;  %v794_v30 = vsub.f32 %v7382_v21, %v793_v25  ;;  %s7230_s25 = scalar_lea.vmem %s5083_s24, 128  ;;  %p7235_p1 = scmp.lt.s32.totalorder %s5083_s24, %s5083_s24 }
   0xb   :  { %v801_v36 = vsub.f32 %v7396_v26, %v800_v31  ;;  %v808_v42 = vsub.f32 %v7410_v32, %v807_v37  ;;  %v814_v45 = vand.u32 4294901760, %v7427_v39  ;;  %v821_v48 = vand.u32 4294901760, %v7437_v43  ;;  %p7231_p0 = scmp.ne.s32.totalorder %s5083_s24, %s7230_s25  ;;  %p7236_p2 = scmp.lt.s32.totalorder %s7230_s25, %s7230_s25 }
   0xc   :  { %5746 = vmatpush3.msra.mxu1 %v246_v11  ;;  %v205_v13 = vand.u32 4294901760, %v204_v12  ;;  %v788_v29 = vand.u32 4294901760, %v787_v24  ;;  %v795_v35 = vand.u32 4294901760, %v794_v30  ;;  %v7450_v49 = vsub.f32 %v50_v40, %v7439_v44 }
   0xd   :  { %5748 = vmatmul.mubr.f32.vlgmr.msra.gmra.mxu1 %v201_v6  ;;  %5755 = vmatprep.subr.mxu1 %v10182_v2  ;;  %v802_v41 = vand.u32 4294901760, %v801_v36  ;;  %v809_v47 = vand.u32 4294901760, %v808_v42  ;;  %v7452_v50 = vand.u32 4294901760, %v49_v46  ;;  %v815_v51 = vsub.f32 %v7427_v39, %v814_v45  ;;  %p7237_p3 = por %p7236_p2, %p7235_p1 }
   0xe   :  { %5743 = vmatmul.mubr.f32.vlgmr.msra.gmra.mxu0 %v205_v13  ;;  %5756 = vmatpush3.msra.mxu1 %v166_v3  ;;  %v822_v53 = vsub.f32 %v7437_v43, %v821_v48  ;;  %v828_v54 = vand.u32 4294901760, %v7450_v49  ;;  %v7470_v56 = vand.u32 4294901760, %v48_v52  ;;  %v7486_v63 = vand.u32 4294901760, %v47_v58 }
   0xf   :  { %5751 = vmatpush3.msra.mxu0 %v243_v5  ;;  %5752 = vmatprep.mubr.msk.f32.mxu0 %vm7253_vm1, %v10182_v2  ;;  %v7468_v55 = vsub.f32 %v49_v46, %v7452_v50  ;;  %v816_v57 = vand.u32 4294901760, %v815_v51  ;;  %v7527_v24 = vand.u32 4294901760, %v44_v14  ;;  %vm4823_vm6 = vcmask 31744   ;;  %p7238_p4 = pnand %p7237_p3, %p7231_p0 }
  0x10   :  { %5757 = vmatprep.mubr.msk.f32.mxu1 %vm7253_vm1, %v10182_v2  ;;  %5760 = vmatprep.subr.mxu0 %v10182_v2  ;;  %v823_v59 = vand.u32 4294901760, %v822_v53  ;;  %v829_v60 = vsub.f32 %v7450_v49, %v828_v54  ;;  %v7483_v62 = vsub.f32 %v48_v52, %v7470_v56  ;;  %v41_v53 = vld [vmem:[%s10147_s3] sm:$0xff]  ;;  %vm5064_vm9 = vcmask 7168  }
  0x11   :  { %5758 = vmatmul.mubr.f32.vlgmr.msra.gmra.mxu1 %v203_v10  ;;  %5765 = vmatprep.subr.mxu1 %v10182_v2  ;;  %v10164_v61 = vand.u32 4294901760, %v7468_v55  ;;  %vm5066_vm10 = vcmask 15360   ;;  %vm5068_vm11 = vcmask 23552  }
  0x12   :  { %5753 = vmatmul.mubr.f32.vlgmr.msra.gmra.mxu0 %v202_v8  ;;  %5766 = vmatpush3.msra.mxu1 %v166_v3  ;;  %v830_v3 = vand.u32 4294901760, %v829_v60  ;;  %v10163_v5 = vand.u32 4294901760, %v7483_v62  ;;  %v45_v8 = vld [vmem:[%s10147_s3 + $0x20] sm:$0xff]  ;;  %v7572_v60 = vand.u32 4294901760, %v41_v53 }
  0x13   :  { %5761 = vmatpush3.msra.mxu0 %v244_v7  ;;  %5762 = vmatprep.mubr.msk.f32.mxu0 %vm7253_vm1, %v10182_v2  ;;  %v836_v4 = vsub.f32 %v7468_v55, %v10164_v61  ;;  %v7501_v7 = vsub.f32 %v47_v58, %v7486_v63  ;;  %v7514_v12 = vand.u32 4294901760, %v45_v8 }
  0x14   :  { %5767 = vmatprep.mubr.msk.f32.mxu1 %vm7253_vm1, %v10182_v2  ;;  %5817 = vmatprep.subr.mxu1 %v10182_v2  ;;  %v843_v10 = vsub.f32 %v7483_v62, %v10163_v5 }
  0x15   :  { %5768 = vmatmul.mubr.f32.vlgmr.msra.gmra.mxu1 %v201_v6  ;;  %5770 = vmatprep.subr.mxu0 %v10182_v2  ;;  %v837_v9 = vand.u32 4294901760, %v836_v4  ;;  %v10162_v13 = vand.u32 4294901760, %v7501_v7  ;;  %v7525_v23 = vsub.f32 %v45_v8, %v7514_v12  ;;  %v7584_v8 = vsub.f32 %v41_v53, %v7572_v60 }
  0x16   :  { %5763 = vmatmul.mubr.f32.vlgmr.msra.gmra.mxu0 %v201_v6  ;;  %5849 = vmatprep.mubr.msk.f32.mxu1 %vm7253_vm1, %v10182_v2  ;;  %v7497_v6 = vand.u32 4294901760, %v46_v1  ;;  %v844_v16 = vand.u32 4294901760, %v843_v10 }
  0x17   :  { %5802 = vmatprep.mubr.msk.f32.mxu0 %vm7253_vm1, %v10182_v2  ;;  %5771 = vmatpush3.msra.mxu0 %v7365_v15  ;;  %v850_v28 = vsub.f32 %v7501_v7, %v10162_v13  ;;  %v10160_v34 = vand.u32 4294901760, %v7525_v23 }
  0x18   :  { %5772 = vmatprep.subr.mxu0 %v10182_v2  ;;  %5818 = vmatpush3.msra.mxu1 %v788_v29  ;;  %v7512_v11 = vsub.f32 %v46_v1, %v7497_v6  ;;  %v43_v29 = vld [vmem:[%s10147_s3 + $0x10] sm:$0xff] }
  0x19   :  { %5773 = vmatpush3.msra.mxu0 %v7373_v18  ;;  %5819 = vmatprep.subr.mxu1 %v10182_v2  ;;  %v7545_v36 = vand.u32 4294901760, %v43_v29  ;;  %v851_v40 = vand.u32 4294901760, %v850_v28  ;;  %v864_v46 = vsub.f32 %v7525_v23, %v10160_v34 }
  0x1a   :  { %5774 = vmatprep.subr.mxu0 %v10182_v2  ;;  %5820 = vmatpush3.msra.mxu1 %v795_v35  ;;  %v10161_v19 = vand.u32 4294901760, %v7512_v11  ;;  %v7543_v35 = vsub.f32 %v44_v14, %v7527_v24  ;;  %v10156_v14 = vand.u32 4294901760, %v7584_v8 }
  0x1b   :  { %5775 = vmatpush3.msra.mxu0 %v7384_v22  ;;  %5821 = vmatprep.subr.mxu1 %v10182_v2  ;;  %v7558_v51 = vsub.f32 %v43_v29, %v7545_v36 }
  0x1c   :  { %5776 = vmatprep.subr.mxu0 %v10182_v2  ;;  %5822 = vmatpush3.msra.mxu1 %v802_v41  ;;  %v857_v30 = vsub.f32 %v7512_v11, %v10161_v19  ;;  %v42_v41 = vld [vmem:[%s10147_s3 + $0x8] sm:$0xff]  ;;  %v892_v28 = vsub.f32 %v7584_v8, %v10156_v14 }
  0x1d   :  { %5777 = vmatpush3.msra.mxu0 %v7398_v27  ;;  %5823 = vmatprep.subr.mxu1 %v10182_v2  ;;  %v7561_v52 = vand.u32 4294901760, %v42_v41 }
  0x1e   :  { %5778 = vmatprep.subr.mxu0 %v10182_v2  ;;  %5824 = vmatpush3.msra.mxu1 %v809_v47  ;;  %v858_v42 = vand.u32 4294901760, %v857_v30  ;;  %v10159_v47 = vand.u32 4294901760, %v7543_v35  ;;  %v893_v30 = vand.u32 4294901760, %v892_v28 }
  0x1f   :  { %5779 = vmatpush3.msra.mxu0 %v7413_v33  ;;  %5825 = vmatprep.subr.mxu1 %v10182_v2  ;;  %v7576_v1 = vsub.f32 %v42_v41, %v7561_v52 }
  0x20   :  { %5780 = vmatprep.subr.mxu0 %v10182_v2  ;;  %5826 = vmatpush3.msra.mxu1 %v816_v57  ;;  %v865_v57 = vand.u32 4294901760, %v864_v46  ;;  %v871_v58 = vsub.f32 %v7543_v35, %v10159_v47 }
  0x21   :  { %5781 = vmatpush3.msra.mxu0 %v7423_v38  ;;  %5827 = vmatprep.subr.mxu1 %v10182_v2 }
  0x22   :  { %5782 = vmatprep.subr.mxu0 %v10182_v2  ;;  %5828 = vmatpush3.msra.mxu1 %v823_v59  ;;  %v10158_v59 = vand.u32 4294901760, %v7558_v51 }
  0x23   :  { %5783 = vmatpush3.msra.mxu0 %v7439_v44  ;;  %5829 = vmatprep.subr.mxu1 %v10182_v2 }
  0x24   :  { %5784 = vmatprep.subr.mxu0 %v10182_v2  ;;  %5830 = vmatpush3.msra.mxu1 %v830_v3  ;;  %v872_v3 = vand.u32 4294901760, %v871_v58  ;;  %v878_v4 = vsub.f32 %v7558_v51, %v10158_v59 }
  0x25   :  { %5785 = vmatpush3.msra.mxu0 %v7452_v50  ;;  %5831 = vmatprep.subr.mxu1 %v10182_v2 }
  0x26   :  { %5786 = vmatprep.subr.mxu0 %v10182_v2  ;;  %5832 = vmatpush3.msra.mxu1 %v837_v9  ;;  %v10157_v9 = vand.u32 4294901760, %v7576_v1  ;;  %v879_v10 = vand.u32 4294901760, %v878_v4 }
  0x27   :  { %5787 = vmatpush3.msra.mxu0 %v7470_v56  ;;  %5833 = vmatprep.subr.mxu1 %v10182_v2 }
  0x28   :  { %5788 = vmatprep.subr.mxu0 %v10182_v2  ;;  %5834 = vmatpush3.msra.mxu1 %v844_v16  ;;  %v885_v16 = vsub.f32 %v7576_v1, %v10157_v9 }
  0x29   :  { %5789 = vmatpush3.msra.mxu0 %v7486_v63  ;;  %5835 = vmatprep.subr.mxu1 %v10182_v2 }
  0x2a   :  { %5790 = vmatprep.subr.mxu0 %v10182_v2  ;;  %5836 = vmatpush3.msra.mxu1 %v851_v40  ;;  %v886_v29 = vand.u32 4294901760, %v885_v16  ;;  %v5090_v40 = vld [vmem:[%s10146_s2] ss:$0 sm:$0xff] }
  0x2b   :  { %5791 = vmatpush3.msra.mxu0 %v7497_v6  ;;  %5837 = vmatprep.subr.mxu1 %v10182_v2 }
  0x2c   :  { %5792 = vmatprep.subr.mxu0 %v10182_v2  ;;  %5838 = vmatpush3.msra.mxu1 %v858_v42 }
  0x2d   :  { %5793 = vmatpush3.msra.mxu0 %v7514_v12  ;;  %5839 = vmatprep.subr.mxu1 %v10182_v2 }
  0x2e   :  { %5794 = vmatprep.subr.mxu0 %v10182_v2  ;;  %5840 = vmatpush3.msra.mxu1 %v865_v57 }
  0x2f   :  { %5795 = vmatpush3.msra.mxu0 %v7527_v24  ;;  %5841 = vmatprep.subr.mxu1 %v10182_v2 }
  0x30   :  { %5796 = vmatprep.subr.mxu0 %v10182_v2  ;;  %5842 = vmatpush3.msra.mxu1 %v872_v3 }
  0x31   :  { %5797 = vmatpush3.msra.mxu0 %v7545_v36  ;;  %5843 = vmatprep.subr.mxu1 %v10182_v2 }
  0x32   :  { %5798 = vmatprep.subr.mxu0 %v10182_v2  ;;  %5844 = vmatpush3.msra.mxu1 %v879_v10 }
  0x33   :  { %5799 = vmatpush3.msra.mxu0 %v7561_v52  ;;  %5845 = vmatprep.subr.mxu1 %v10182_v2 }
  0x34   :  { %5800 = vmatprep.subr.mxu0 %v10182_v2  ;;  %5846 = vmatpush3.msra.mxu1 %v886_v29 }
  0x35   :  { %5801 = vmatpush3.msra.mxu0 %v7572_v60  ;;  %5847 = vmatprep.subr.mxu1 %v10182_v2 }
  0x36   :  { %5864 = vmatprep.subr.mxu0 %v10182_v2  ;;  %5848 = vmatpush3.msra.mxu1 %v893_v30 }
  0x37   :  { %5911 = vmatprep.subr.mxu1 %v10182_v2 }
  0xcd   :  { %v283_v41 = vpop.f32.mrf.mxu1 }
  0xce   :  { %v207_v42 = vpop.f32.mrf.mxu0 }
  0xcf   :  { %v208_v46 = vadd.f32 %v5090_v40, %v207_v42  ;;  %v5749_v53 = vpop.f32.mrf.mxu1 }
  0xd0   :  { %v5744_v57 = vpop.f32.mrf.mxu0 }
  0xd1   :  { %v284_v58 = vadd.f32 %v283_v41, %v208_v46  ;;  %v431_v3 = vpop.f32.mrf.mxu1  ;;  %v7254_v41 = vmov 1966171168   ;;  %v10165_v46 = vlaneseq }
  0xd2   :  { %v357_v4 = vpop.f32.mrf.mxu0  ;;  %v605_v42 = vunpack.c.l.s4 %v7254_v41 }
  0xd3   :  { %v358_v10 = vadd.f32 %v357_v4, %v284_v58  ;;  %v5759_v16 = vpop.f32.mrf.mxu1  ;;  %v608_v4 = vshrl.u32 %v10165_v46, 7 }
  0xd4   :  { %v5754_v28 = vpop.f32.mrf.mxu0 }
  0xd5   :  { %v432_v29 = vadd.f32 %v431_v3, %v358_v10  ;;  %v577_v14 = vpop.f32.mrf.mxu1  ;;  %v606_v3 = vunpack.c.0.s8 %v605_v42 }
  0xd6   :  { %v505_v30 = vpop.f32.mrf.mxu0 }
  0xd7   :  { %v506_v9 = vadd.f32 %v505_v30, %v432_v29  ;;  %v5769_v59 = vpop.f32.mrf.mxu1 }
  0xd8   :  { %v5764_v47 = vpop.f32.mrf.mxu0 }
  0xd9   :  { %v578_v34 = vadd.f32 %v577_v14, %v506_v9  ;;  %v603_v47 = vcombine.high %v7330_v0, %v7330_v0 }
  0xdb   :  { %v581_v19 = vsub.f32 0.0, %v578_v34  ;;  %v588_v13 = vand.u32 2147483647, %v578_v34  ;;  %v587_v0 = vmax.f32 %v578_v34, 0.0 }
  0xdd   :  { %v582_v5 = vmul.f32 1.442695, %v581_v19  ;;  %v589_v61 = vsub.f32 0.0, %v588_v13  ;;  %v609_v19 = vsub.s32 %v606_v3, %v608_v4 }
  0xdf   :  { %7201 = vpow2.f32 %v582_v5  ;;  %v590_v40 = vmul.f32 1.442695, %v589_v61  ;;  %v610_v13 = vrot.slane %v603_v47, %v609_v19  ;;  %v630_v5 = vsub.s32 0, %v608_v4 }
  0xe1   :  { %7203 = vpow2.f32 %v590_v40  ;;  %v618_v9 = vrot.slane %v610_v13, %v609_v19  ;;  %v611_v10 = vcombine.high %v610_v13, %v610_v13 }
  0xe3   :  { %v7608_v14 = vrot.slane %v618_v9, %v630_v5  ;;  %v625_v41 = vrot.slane %v611_v10, %v609_v19  ;;  %v626_v47 = vcombine.high %v618_v9, %v618_v9 }
  0xe5   :  { %10260 = vst [vmem:[#allocation5_spill] sm:$0xff] %v7608_v14  ;;  %v627_v9 = vcombine.high %v625_v41, %v625_v41 }
  0xec   :  { %v7202_v53 = vpop.eup %7201 }
  0xed   :  { %v584_v57 = vadd.f32 1.0, %v7202_v53 }
  0xee   :  { %v7204_v58 = vpop.eup %7203 }
  0xef   :  { %7205 = vrcp.f32 %v584_v57  ;;  %v592_v59 = vadd.f32 1.0, %v7204_v58  ;;  %v595_v61 = vmul.f32 -0.5, %v7204_v58  ;;  %v598_v29 = vand.u32 2147483647, %v7204_v58 }
  0xf0   :  { %v7614_v57 = vrot.slane %v625_v41, %v630_v5  ;;  %v7650_v41 = vrot.slane %v627_v9, %v630_v5 }
  0xf1   :  { %7207 = vlog2.f32 %v592_v59  ;;  %v596_v16 = vadd.f32 1.0, %v595_v61  ;;  %vm599_vm2 = vcmp.lt.f32.partialorder %v598_v29, 0.0004427343 }
  0xf2   :  { %10262 = vst [vmem:[#allocation7_spill] sm:$0xff] %v7614_v57  ;;  %10264 = vst [vmem:[#allocation9_spill] sm:$0xff] %v7650_v41 }
  0xf3   :  { %v597_v53 = vmul.f32 %v7204_v58, %v596_v16  ;;  %v7629_v58 = vrot.slane %v626_v47, %v630_v5 }
  0xf5   :  { %10263 = vst [vmem:[#allocation8_spill] sm:$0xff] %v7629_v58 }
  0xfc   :  { %v7610_v28 = vpop.eup %7205 }
  0xfd   :  { %10261 = vst [vmem:[#allocation6_spill] sm:$0xff] %v7610_v28  ;;  %v648_v40 = vmul.f32 %v7610_v28, %v7608_v14  ;;  %v649_v61 = vmul.f32 %v7610_v28, %v7614_v57  ;;  %v651_v5 = vmul.f32 %v7610_v28, %v7650_v41 }
  0xfe   :  { %v7208_v30 = vpop.eup %7207 }
  0xff   :  { %v594_v42 = vmul.f32 0.6931472, %v7208_v30  ;;  %v7616_v59 = vand.u32 4294901760, %v648_v40  ;;  %v7636_v16 = vand.u32 4294901760, %v649_v61  ;;  %v7681_v9 = vand.u32 4294901760, %v651_v5 }
 0x101   :  { %v600_v3 = vsel %vm599_vm2, %v597_v53, %v594_v42  ;;  %v7627_v34 = vsub.f32 %v648_v40, %v7616_v59  ;;  %v650_v40 = vmul.f32 %v7610_v28, %v7629_v58  ;;  %v7654_v53 = vsub.f32 %v649_v61, %v7636_v16 }
 0x102   :  { %v601_v4 = vadd.f32 %v600_v3, %v587_v0 }
 0x103   :  { %v745_v30 = vand.u32 4294901760, %v7627_v34  ;;  %v7661_v3 = vand.u32 4294901760, %v650_v40 }
 0x104   :  { %v7618_v13 = vand.u32 4294901760, %v601_v4 }
 0x105   :  { %v746_v0 = vsub.f32 %v7627_v34, %v745_v30  ;;  %v7676_v61 = vsub.f32 %v650_v40, %v7661_v3 }
 0x106   :  { %5850 = vmatmul.mubr.f32.vlgmr.msra.gmra.mxu1 %v7618_v13  ;;  %v7624_v19 = vsub.f32 %v601_v4, %v7618_v13  ;;  %v755_v4 = vand.u32 4294901760, %v7654_v53 }
 0x107   :  { %5912 = vmatpush3.msra.mxu1 %v7365_v15  ;;  %5852 = vmatprep.mubr.msk.f32.mxu1 %vm7253_vm1, %v10182_v2  ;;  %v747_v47 = vand.u32 4294901760, %v746_v0  ;;  %v765_v40 = vand.u32 4294901760, %v7676_v61 }
 0x108   :  { %5913 = vmatprep.subr.mxu1 %v10182_v2  ;;  %v735_v10 = vand.u32 4294901760, %v7624_v19 }
 0x109   :  { %5914 = vmatpush3.msra.mxu1 %v7373_v18 }
 0x10a   :  { %5915 = vmatprep.subr.mxu1 %v10182_v2  ;;  %5853 = vmatmul.mubr.f32.gmra.mxu1 %v7616_v59  ;;  %v736_v29 = vsub.f32 %v7624_v19, %v735_v10 }
 0x10b   :  { %5916 = vmatpush3.msra.mxu1 %v7384_v22  ;;  %5855 = vmatprep.mubr.msk.f32.mxu1 %vm7253_vm1, %v10182_v2 }
 0x10c   :  { %5917 = vmatprep.subr.mxu1 %v10182_v2  ;;  %v737_v42 = vand.u32 4294901760, %v736_v29  ;;  %v756_v29 = vsub.f32 %v7654_v53, %v755_v4 }
 0x10d   :  { %5918 = vmatpush3.msra.mxu1 %v7398_v27 }
 0x10e   :  { %5919 = vmatprep.subr.mxu1 %v10182_v2  ;;  %5803 = vmatmul.mubr.f32.vlgmr.msra.gmra.mxu0 %v737_v42  ;;  %v7695_v42 = vsub.f32 %v651_v5, %v7681_v9  ;;  %v757_v0 = vand.u32 4294901760, %v756_v29 }
 0x10f   :  { %5856 = vmatmul.mubr.f32.gmra.mxu1 %v7636_v16  ;;  %5865 = vmatpush3.msra.mxu0 %v7371_v17  ;;  %v10266_v17 = vand.u32 4294901760, %v7483_v62 }
 0x110   :  { %5920 = vmatpush3.msra.mxu1 %v7413_v33  ;;  %5866 = vmatprep.subr.mxu0 %v10182_v2  ;;  %v775_v5 = vand.u32 4294901760, %v7695_v42 }
 0x111   :  { %5921 = vmatprep.subr.mxu1 %v10182_v2  ;;  %5867 = vmatpush3.msra.mxu0 %v7382_v21  ;;  %v10269_v21 = vand.u32 4294901760, %v7525_v23 }
 0x112   :  { %5922 = vmatpush3.msra.mxu1 %v7423_v38  ;;  %5805 = vmatprep.mubr.msk.f32.mxu0 %vm7253_vm1, %v10182_v2 }
 0x113   :  { %5858 = vmatprep.mubr.msk.f32.mxu1 %vm7253_vm1, %v10182_v2  ;;  %5868 = vmatprep.subr.mxu0 %v10182_v2 }
 0x114   :  { %5923 = vmatprep.subr.mxu1 %v10182_v2  ;;  %5806 = vmatmul.mubr.f32.gmra.mxu0 %v747_v47  ;;  %v766_v47 = vsub.f32 %v7676_v61, %v765_v40 }
 0x115   :  { %5859 = vmatmul.mubr.f32.gmra.mxu1 %v7661_v3  ;;  %5869 = vmatpush3.msra.mxu0 %v7396_v26  ;;  %v10272_v26 = vand.u32 4294901760, %v7576_v1 }
 0x116   :  { %5924 = vmatpush3.msra.mxu1 %v7439_v44  ;;  %5870 = vmatprep.subr.mxu0 %v10182_v2  ;;  %v767_v29 = vand.u32 4294901760, %v766_v47 }
 0x117   :  { %5925 = vmatprep.subr.mxu1 %v10182_v2  ;;  %5871 = vmatpush3.msra.mxu0 %v7410_v32 }
 0x118   :  { %5926 = vmatpush3.msra.mxu1 %v7452_v50  ;;  %5808 = vmatprep.mubr.msk.f32.mxu0 %vm7253_vm1, %v10182_v2 }
 0x119   :  { %5861 = vmatprep.mubr.msk.f32.mxu1 %vm7253_vm1, %v10182_v2  ;;  %5872 = vmatprep.subr.mxu0 %v10182_v2 }
 0x11a   :  { %5927 = vmatprep.subr.mxu1 %v10182_v2  ;;  %5809 = vmatmul.mubr.f32.gmra.mxu0 %v757_v0  ;;  %v776_v0 = vsub.f32 %v7695_v42, %v775_v5 }
 0x11b   :  { %5862 = vmatmul.mubr.f32.gmra.mxu1 %v7681_v9  ;;  %5873 = vmatpush3.msra.mxu0 %v7427_v39  ;;  %v70_v39 = vld [vmem:[%s10149_s5 + $0x68] sm:$0xff] }
 0x11c   :  { %5928 = vmatpush3.msra.mxu1 %v7470_v56  ;;  %5874 = vmatprep.subr.mxu0 %v10182_v2  ;;  %v777_v47 = vand.u32 4294901760, %v776_v0 }
 0x11d   :  { %5929 = vmatprep.subr.mxu1 %v10182_v2  ;;  %5875 = vmatpush3.msra.mxu0 %v7437_v43 }
 0x11e   :  { %5930 = vmatpush3.msra.mxu1 %v7486_v63  ;;  %5811 = vmatprep.mubr.msk.f32.mxu0 %vm7253_vm1, %v10182_v2 }
 0x11f   :  { %5876 = vmatprep.subr.mxu0 %v10182_v2  ;;  %5931 = vmatprep.subr.mxu1 %v10182_v2 }
 0x120   :  { %5812 = vmatmul.mubr.f32.gmra.mxu0 %v767_v29  ;;  %5932 = vmatpush3.msra.mxu1 %v7497_v6 }
 0x121   :  { %5877 = vmatpush3.msra.mxu0 %v7450_v49  ;;  %5933 = vmatprep.subr.mxu1 %v10182_v2 }
 0x122   :  { %5878 = vmatprep.subr.mxu0 %v10182_v2  ;;  %5934 = vmatpush3.msra.mxu1 %v7514_v12 }
 0x123   :  { %5879 = vmatpush3.msra.mxu0 %v7468_v55  ;;  %5814 = vmatprep.mubr.msk.f32.mxu0 %vm7253_vm1, %v10182_v2 }
 0x124   :  { %5880 = vmatprep.subr.mxu0 %v10182_v2  ;;  %5935 = vmatprep.subr.mxu1 %v10182_v2 }
 0x125   :  { %5815 = vmatmul.mubr.f32.gmra.mxu0 %v777_v47  ;;  %5936 = vmatpush3.msra.mxu1 %v7527_v24 }
 0x126   :  { %5881 = vmatpush3.msra.mxu0 %v7483_v62  ;;  %5937 = vmatprep.subr.mxu1 %v10182_v2 }
 0x127   :  { %5882 = vmatprep.subr.mxu0 %v10182_v2  ;;  %5938 = vmatpush3.msra.mxu1 %v7545_v36 }
 0x128   :  { %5883 = vmatpush3.msra.mxu0 %v7501_v7  ;;  %5939 = vmatprep.subr.mxu1 %v10182_v2 }
 0x129   :  { %5884 = vmatprep.subr.mxu0 %v10182_v2  ;;  %5940 = vmatpush3.msra.mxu1 %v7561_v52 }
 0x12a   :  { %5885 = vmatpush3.msra.mxu0 %v7512_v11  ;;  %5941 = vmatprep.subr.mxu1 %v10182_v2 }
 0x12b   :  { %5886 = vmatprep.subr.mxu0 %v10182_v2  ;;  %5942 = vmatpush3.msra.mxu1 %v7572_v60 }
 0x12c   :  { %5887 = vmatpush3.msra.mxu0 %v7525_v23  ;;  %5943 = vmatprep.mubr.msk.f32.mxu1 %vm7253_vm1, %v10182_v2 }
 0x12d   :  { %5888 = vmatprep.subr.mxu0 %v10182_v2  ;;  %5944 = vmatmul.mubr.f32.vlgmr.msra.gmra.mxu1 %v735_v10 }
 0x12e   :  { %6005 = vmatprep.subr.mxu1 %v10182_v2  ;;  %5889 = vmatpush3.msra.mxu0 %v7543_v35 }
 0x12f   :  { %6006 = vmatpush3.msra.mxu1 %v7365_v15  ;;  %5890 = vmatprep.subr.mxu0 %v10182_v2  ;;  %v10265_v15 = vand.u32 4294901760, %v7468_v55 }
 0x130   :  { %6007 = vmatprep.subr.mxu1 %v10182_v2  ;;  %5891 = vmatpush3.msra.mxu0 %v7558_v51 }
 0x131   :  { %5946 = vmatprep.mubr.msk.f32.mxu1 %vm7253_vm1, %v10182_v2  ;;  %6008 = vmatpush3.msra.mxu1 %v7373_v18  ;;  %v10267_v18 = vand.u32 4294901760, %v7501_v7 }
 0x132   :  { %5892 = vmatprep.subr.mxu0 %v10182_v2  ;;  %5947 = vmatmul.mubr.f32.gmra.mxu1 %v745_v30 }
 0x133   :  { %6009 = vmatprep.subr.mxu1 %v10182_v2  ;;  %5893 = vmatpush3.msra.mxu0 %v7576_v1 }
 0x134   :  { %6010 = vmatpush3.msra.mxu1 %v7384_v22  ;;  %5894 = vmatprep.subr.mxu0 %v10182_v2  ;;  %v10270_v22 = vand.u32 4294901760, %v7543_v35 }
 0x135   :  { %6011 = vmatprep.subr.mxu1 %v10182_v2  ;;  %5895 = vmatpush3.msra.mxu0 %v7584_v8 }
 0x136   :  { %5896 = vmatprep.mubr.msk.f32.mxu0 %vm7253_vm1, %v10182_v2  ;;  %5949 = vmatprep.mubr.msk.f32.mxu1 %vm7253_vm1, %v10182_v2 }
 0x137   :  { %6012 = vmatpush3.msra.mxu1 %v7398_v27  ;;  %5897 = vmatmul.mubr.f32.vlgmr.msra.gmra.mxu0 %v7624_v19  ;;  %v10273_v27 = vand.u32 4294901760, %v7584_v8  ;;  %v65_v19 = vld [vmem:[%s10149_s5 + $0x40] sm:$0xff] }
 0x138   :  { %5950 = vmatmul.mubr.f32.gmra.mxu1 %v755_v4  ;;  %5958 = vmatprep.subr.mxu0 %v10182_v2  ;;  %v7995_v30 = vand.u32 4294901760, %v65_v19 }
 0x139   :  { %6013 = vmatprep.subr.mxu1 %v10182_v2  ;;  %5959 = vmatpush3.msra.mxu0 %v786_v20  ;;  %v10268_v20 = vand.u32 4294901760, %v7512_v11 }
 0x13a   :  { %6014 = vmatpush3.msra.mxu1 %v7413_v33  ;;  %5960 = vmatprep.subr.mxu0 %v10182_v2  ;;  %v71_v33 = vld [vmem:[%s10149_s5 + $0x70] sm:$0xff] }
 0x13b   :  { %6015 = vmatprep.subr.mxu1 %v10182_v2  ;;  %5899 = vmatprep.mubr.msk.f32.mxu0 %vm7253_vm1, %v10182_v2 }
 0x13c   :  { %5952 = vmatprep.mubr.msk.f32.mxu1 %vm7253_vm1, %v10182_v2  ;;  %5961 = vmatpush3.msra.mxu0 %v793_v25  ;;  %v10271_v25 = vand.u32 4294901760, %v7558_v51 }
 0x13d   :  { %6016 = vmatpush3.msra.mxu1 %v7423_v38  ;;  %5900 = vmatmul.mubr.f32.gmra.mxu0 %v7627_v34  ;;  %v7916_v38 = vand.u32 4294901760, %v71_v33 }
 0x13e   :  { %5953 = vmatmul.mubr.f32.gmra.mxu1 %v765_v40  ;;  %5962 = vmatprep.subr.mxu0 %v10182_v2 }
 0x13f   :  { %6017 = vmatprep.subr.mxu1 %v10182_v2  ;;  %5963 = vmatpush3.msra.mxu0 %v800_v31  ;;  %v72_v31 = vld [vmem:[%s10149_s5 + $0x78] sm:$0xff] }
 0x140   :  { %6018 = vmatpush3.msra.mxu1 %v7439_v44  ;;  %5964 = vmatprep.subr.mxu0 %v10182_v2  ;;  %v7908_v32 = vand.u32 4294901760, %v72_v31  ;;  %v7925_v44 = vsub.f32 %v71_v33, %v7916_v38 }
 0x141   :  { %6019 = vmatprep.subr.mxu1 %v10182_v2  ;;  %5902 = vmatprep.mubr.msk.f32.mxu0 %vm7253_vm1, %v10182_v2 }
 0x142   :  { %5955 = vmatprep.mubr.msk.f32.mxu1 %vm7253_vm1, %v10182_v2  ;;  %5965 = vmatpush3.msra.mxu0 %v807_v37  ;;  %v7914_v37 = vsub.f32 %v72_v31, %v7908_v32 }
 0x143   :  { %6020 = vmatpush3.msra.mxu1 %v7452_v50  ;;  %5903 = vmatmul.mubr.f32.gmra.mxu0 %v7654_v53  ;;  %v10180_v50 = vand.u32 4294901760, %v7925_v44 }
 0x144   :  { %5956 = vmatmul.mubr.f32.gmra.mxu1 %v775_v5  ;;  %5966 = vmatprep.subr.mxu0 %v10182_v2  ;;  %v10181_v43 = vand.u32 4294901760, %v7914_v37  ;;  %v63_v5 = vld [vmem:[%s10149_s5 + $0x30] sm:$0xff] }
 0x145   :  { %6021 = vmatprep.subr.mxu1 %v10182_v2  ;;  %5967 = vmatpush3.msra.mxu0 %v814_v45  ;;  %v7927_v45 = vand.u32 4294901760, %v70_v39 }
 0x146   :  { %6022 = vmatpush3.msra.mxu1 %v7470_v56  ;;  %5968 = vmatprep.subr.mxu0 %v10182_v2  ;;  %v1632_v49 = vsub.f32 %v7914_v37, %v10181_v43  ;;  %v68_v56 = vld [vmem:[%s10149_s5 + $0x58] sm:$0xff] }
 0x147   :  { %6023 = vmatprep.subr.mxu1 %v10182_v2  ;;  %5905 = vmatprep.mubr.msk.f32.mxu0 %vm7253_vm1, %v10182_v2  ;;  %v7956_v11 = vand.u32 4294901760, %v68_v56 }
 0x148   :  { %5969 = vmatpush3.msra.mxu0 %v821_v48  ;;  %6024 = vmatpush3.msra.mxu1 %v7486_v63  ;;  %v69_v48 = vld [vmem:[%s10149_s5 + $0x60] sm:$0xff]  ;;  %v1633_v62 = vand.u32 4294901760, %v1632_v49  ;;  %v1639_v63 = vsub.f32 %v7925_v44, %v10180_v50 }
 0x149   :  { %5906 = vmatmul.mubr.f32.gmra.mxu0 %v7676_v61  ;;  %5970 = vmatprep.subr.mxu0 %v10182_v2  ;;  %v7941_v55 = vand.u32 4294901760, %v69_v48  ;;  %v7970_v51 = vsub.f32 %v68_v56, %v7956_v11  ;;  %v60_v56 = vld [vmem:[%s10149_s5 + $0x18] sm:$0xff] }
 0x14a   :  { %6025 = vmatprep.subr.mxu1 %v10182_v2  ;;  %5971 = vmatpush3.msra.mxu0 %v828_v54  ;;  %v7939_v54 = vsub.f32 %v70_v39, %v7927_v45  ;;  %v1640_v23 = vand.u32 4294901760, %v1639_v63 }
 0x14b   :  { %6026 = vmatpush3.msra.mxu1 %v7497_v6  ;;  %5972 = vmatprep.subr.mxu0 %v10182_v2  ;;  %v7953_v7 = vsub.f32 %v69_v48, %v7941_v55 }
 0x14c   :  { %6027 = vmatprep.subr.mxu1 %v10182_v2  ;;  %5908 = vmatprep.mubr.msk.f32.mxu0 %vm7253_vm1, %v10182_v2  ;;  %v10179_v6 = vand.u32 4294901760, %v7939_v54 }
 0x14d   :  { %5973 = vmatpush3.msra.mxu0 %v10265_v15  ;;  %6028 = vmatpush3.msra.mxu1 %v7514_v12  ;;  %v67_v12 = vld [vmem:[%s10149_s5 + $0x50] sm:$0xff]  ;;  %v10178_v35 = vand.u32 4294901760, %v7953_v7 }
 0x14e   :  { %5909 = vmatmul.mubr.f32.gmra.mxu0 %v7695_v42  ;;  %5974 = vmatprep.subr.mxu0 %v10182_v2 }
 0x14f   :  { %6029 = vmatprep.subr.mxu1 %v10182_v2  ;;  %5975 = vmatpush3.msra.mxu0 %v10266_v17  ;;  %v1653_v1 = vsub.f32 %v7953_v7, %v10178_v35  ;;  %v8029_v17 = vand.u32 4294901760, %v63_v5 }
 0x150   :  { %6030 = vmatpush3.msra.mxu1 %v7527_v24  ;;  %5976 = vmatprep.subr.mxu0 %v10182_v2  ;;  %v1646_v24 = vsub.f32 %v7939_v54, %v10179_v6 }
 0x151   :  { %6031 = vmatprep.subr.mxu1 %v10182_v2  ;;  %5977 = vmatpush3.msra.mxu0 %v10267_v18  ;;  %v1654_v34 = vand.u32 4294901760, %v1653_v1  ;;  %v62_v18 = vld [vmem:[%s10149_s5 + $0x28] sm:$0xff] }
 0x152   :  { %6032 = vmatpush3.msra.mxu1 %v7545_v36  ;;  %5978 = vmatprep.subr.mxu0 %v10182_v2  ;;  %v7966_v36 = vand.u32 4294901760, %v67_v12 }
 0x153   :  { %6033 = vmatprep.subr.mxu1 %v10182_v2  ;;  %5979 = vmatpush3.msra.mxu0 %v10268_v20 }
 0x154   :  { %6034 = vmatpush3.msra.mxu1 %v7561_v52  ;;  %5980 = vmatprep.subr.mxu0 %v10182_v2  ;;  %v66_v52 = vld [vmem:[%s10149_s5 + $0x48] sm:$0xff]  ;;  %v7980_v8 = vsub.f32 %v67_v12, %v7966_v36 }
 0x155   :  { %6035 = vmatprep.subr.mxu1 %v10182_v2  ;;  %5981 = vmatpush3.msra.mxu0 %v10269_v21 }
 0x156   :  { %6036 = vmatpush3.msra.mxu1 %v7572_v60  ;;  %6037 = vmatprep.mubr.msk.f32.mxu1 %vm7253_vm1, %v10182_v2  ;;  %v1647_v60 = vand.u32 4294901760, %v1646_v24  ;;  %v10176_v10 = vand.u32 4294901760, %v7980_v8 }
 0x157   :  { %5982 = vmatprep.subr.mxu0 %v10182_v2  ;;  %6038 = vmatmul.mubr.f32.vlgmr.msra.gmra.mxu1 %v7618_v13 }
 0x158   :  { %5983 = vmatpush3.msra.mxu0 %v10270_v22  ;;  %6040 = vmatprep.mubr.msk.f32.mxu1 %vm7253_vm1, %v10182_v2  ;;  %v1667_v4 = vsub.f32 %v7980_v8, %v10176_v10 }
 0x159   :  { %5984 = vmatprep.subr.mxu0 %v10182_v2  ;;  %5990 = vmatprep.mubr.msk.f32.mxu0 %vm7253_vm1, %v10182_v2 }
 0x15a   :  { %5985 = vmatpush3.msra.mxu0 %v10271_v25  ;;  %6099 = vmatprep.subr.mxu1 %v10182_v2  ;;  %v1668_v29 = vand.u32 4294901760, %v1667_v4  ;;  %v8040_v25 = vand.u32 4294901760, %v62_v18 }
 0x15b   :  { %5986 = vmatprep.subr.mxu0 %v10182_v2  ;;  %6041 = vmatmul.mubr.f32.gmra.mxu1 %v7616_v59 }
 0x15c   :  { %5987 = vmatpush3.msra.mxu0 %v10272_v26  ;;  %6043 = vmatprep.mubr.msk.f32.mxu1 %vm7253_vm1, %v10182_v2  ;;  %v8044_v26 = vsub.f32 %v63_v5, %v8029_v17  ;;  %v8055_v39 = vsub.f32 %v62_v18, %v8040_v25  ;;  %v57_v18 = vld [vmem:[%s10149_s5] sm:$0xff] }
 0x15d   :  { %5988 = vmatprep.subr.mxu0 %v10182_v2  ;;  %6100 = vmatpush3.msra.mxu1 %v1633_v62 }
 0x15e   :  { %5989 = vmatpush3.msra.mxu0 %v10273_v27  ;;  %6101 = vmatprep.subr.mxu1 %v10182_v2  ;;  %v61_v27 = vld [vmem:[%s10149_s5 + $0x20] sm:$0xff]  ;;  %v10172_v49 = vand.u32 4294901760, %v8044_v26  ;;  %v10170_v63 = vand.u32 4294901760, %v8055_v39 }
 0x15f   :  { %5991 = vmatmul.mubr.f32.vlgmr.msra.gmra.mxu0 %v7618_v13  ;;  %6044 = vmatmul.mubr.f32.gmra.mxu1 %v7636_v16  ;;  %v10177_v13 = vand.u32 4294901760, %v7970_v51  ;;  %v8057_v48 = vand.u32 4294901760, %v61_v27 }
 0x160   :  { %5993 = vmatprep.mubr.msk.f32.mxu0 %vm7253_vm1, %v10182_v2  ;;  %6046 = vmatprep.mubr.msk.f32.mxu1 %vm7253_vm1, %v10182_v2  ;;  %v1695_v24 = vsub.f32 %v8044_v26, %v10172_v49 }
 0x161   :  { %6052 = vmatprep.subr.mxu0 %v10182_v2  ;;  %6102 = vmatpush3.msra.mxu1 %v1640_v23  ;;  %v1660_v53 = vsub.f32 %v7970_v51, %v10177_v13  ;;  %v8068_v12 = vsub.f32 %v61_v27, %v8057_v48  ;;  %v8070_v23 = vand.u32 4294901760, %v60_v56 }
 0x162   :  { %6053 = vmatpush3.msra.mxu0 %v7908_v32  ;;  %6103 = vmatprep.subr.mxu1 %v10182_v2 }
 0x163   :  { %5994 = vmatmul.mubr.f32.gmra.mxu0 %v7616_v59  ;;  %6047 = vmatmul.mubr.f32.gmra.mxu1 %v7661_v3  ;;  %v7982_v59 = vand.u32 4294901760, %v66_v52  ;;  %v1661_v42 = vand.u32 4294901760, %v1660_v53  ;;  %v10169_v1 = vand.u32 4294901760, %v8068_v12  ;;  %v1696_v53 = vand.u32 4294901760, %v1695_v24 }
 0x164   :  { %5996 = vmatprep.mubr.msk.f32.mxu0 %vm7253_vm1, %v10182_v2  ;;  %6049 = vmatprep.mubr.msk.f32.mxu1 %vm7253_vm1, %v10182_v2 }
 0x165   :  { %6054 = vmatprep.subr.mxu0 %v10182_v2  ;;  %6104 = vmatpush3.msra.mxu1 %v1647_v60  ;;  %v1702_v60 = vsub.f32 %v8055_v39, %v10170_v63 }
 0x166   :  { %6055 = vmatpush3.msra.mxu0 %v7916_v38  ;;  %6105 = vmatprep.subr.mxu1 %v10182_v2 }
 0x167   :  { %5997 = vmatmul.mubr.f32.gmra.mxu0 %v7636_v16  ;;  %6050 = vmatmul.mubr.f32.gmra.mxu1 %v7681_v9  ;;  %v7993_v16 = vsub.f32 %v66_v52, %v7982_v59  ;;  %v59_v52 = vld [vmem:[%s10149_s5 + $0x10] sm:$0xff]  ;;  %v1703_v4 = vand.u32 4294901760, %v1702_v60 }
 0x168   :  { %5999 = vmatprep.mubr.msk.f32.mxu0 %vm7253_vm1, %v10182_v2  ;;  %6131 = vmatprep.mubr.msk.f32.mxu1 %vm7253_vm1, %v10182_v2 }
 0x169   :  { %6056 = vmatprep.subr.mxu0 %v10182_v2  ;;  %6106 = vmatpush3.msra.mxu1 %v1654_v34  ;;  %v10175_v61 = vand.u32 4294901760, %v7993_v16  ;;  %v8088_v34 = vand.u32 4294901760, %v59_v52 }
 0x16a   :  { %6057 = vmatpush3.msra.mxu0 %v7927_v45  ;;  %6107 = vmatprep.subr.mxu1 %v10182_v2 }
 0x16b   :  { %6000 = vmatmul.mubr.f32.gmra.mxu0 %v7661_v3  ;;  %6058 = vmatprep.subr.mxu0 %v10182_v2  ;;  %v64_v3 = vld [vmem:[%s10149_s5 + $0x38] sm:$0xff]  ;;  %v1674_v0 = vsub.f32 %v7993_v16, %v10175_v61 }
 0x16c   :  { %6002 = vmatprep.mubr.msk.f32.mxu0 %vm7253_vm1, %v10182_v2  ;;  %6059 = vmatpush3.msra.mxu0 %v7941_v55  ;;  %v8013_v40 = vand.u32 4294901760, %v64_v3 }
 0x16d   :  { %6060 = vmatprep.subr.mxu0 %v10182_v2  ;;  %6108 = vmatpush3.msra.mxu1 %v1661_v42  ;;  %v1675_v20 = vand.u32 4294901760, %v1674_v0  ;;  %v1709_v42 = vsub.f32 %v8068_v12, %v10169_v1 }
 0x16e   :  { %6061 = vmatpush3.msra.mxu0 %v7956_v11  ;;  %v8026_v15 = vsub.f32 %v64_v3, %v8013_v40  ;;  %6109 = vmatprep.subr.mxu1 %v10182_v2  ;;  %v58_v3 = vld [vmem:[%s10149_s5 + $0x8] sm:$0xff]  ;;  %s7263_s5 = smov 123  }
 0x16f   :  { %6003 = vmatmul.mubr.f32.gmra.mxu0 %v7681_v9  ;;  %6062 = vmatprep.subr.mxu0 %v10182_v2  ;;  %v8011_v9 = vsub.f32 %v65_v19, %v7995_v30  ;;  %v8086_v19 = vsub.f32 %v60_v56, %v8070_v23  ;;  %v8104_v0 = vand.u32 4294901760, %v58_v3 }
 0x170   :  { %6084 = vmatprep.mubr.msk.f32.mxu0 %vm7253_vm1, %v10182_v2  ;;  %6063 = vmatpush3.msra.mxu0 %v7966_v36  ;;  %v10173_v22 = vand.u32 4294901760, %v8026_v15 }
 0x171   :  { %6064 = vmatprep.subr.mxu0 %v10182_v2  ;;  %v10174_v47 = vand.u32 4294901760, %v8011_v9  ;;  %6110 = vmatpush3.msra.mxu1 %v1668_v29  ;;  %v10167_v5 = vand.u32 4294901760, %v8086_v19  ;;  %v8101_v29 = vsub.f32 %v59_v52, %v8088_v34  ;;  %v8119_v56 = vsub.f32 %v58_v3, %v8104_v0 }
 0x172   :  { %6065 = vmatpush3.msra.mxu0 %v7982_v59  ;;  %6111 = vmatprep.subr.mxu1 %v10182_v2  ;;  %v1688_v33 = vsub.f32 %v8026_v15, %v10173_v22 }
 0x173   :  { %6066 = vmatprep.subr.mxu0 %v10182_v2  ;;  %v1681_v21 = vsub.f32 %v8011_v9, %v10174_v47  ;;  %6112 = vmatpush3.msra.mxu1 %v1675_v20  ;;  %v1716_v27 = vsub.f32 %v8086_v19, %v10167_v5 }
 0x174   :  { %6067 = vmatpush3.msra.mxu0 %v7995_v30  ;;  %6113 = vmatprep.subr.mxu1 %v10182_v2  ;;  %v1689_v62 = vand.u32 4294901760, %v1688_v33  ;;  %v8115_v33 = vand.u32 4294901760, %v57_v18 }
 0x175   :  { %6068 = vmatprep.subr.mxu0 %v10182_v2  ;;  %v1682_v31 = vand.u32 4294901760, %v1681_v21  ;;  %v1710_v21 = vand.u32 4294901760, %v1709_v42  ;;  %v1717_v24 = vand.u32 4294901760, %v1716_v27 }
 0x176   :  { %6069 = vmatpush3.msra.mxu0 %v8013_v40  ;;  %v8127_v60 = vsub.f32 %v57_v18, %v8115_v33 }
 0x177   :  { %6070 = vmatprep.subr.mxu0 %v10182_v2  ;;  %6114 = vmatpush3.msra.mxu1 %v1682_v31  ;;  %v10166_v31 = vand.u32 4294901760, %v8101_v29 }
 0x178   :  { %6071 = vmatpush3.msra.mxu0 %v8029_v17  ;;  %6115 = vmatprep.subr.mxu1 %v10182_v2  ;;  %v10171_v42 = vand.u32 4294901760, %v8127_v60 }
 0x179   :  { %6072 = vmatprep.subr.mxu0 %v10182_v2  ;;  %6116 = vmatpush3.msra.mxu1 %v1689_v62  ;;  %v1723_v52 = vsub.f32 %v8101_v29, %v10166_v31 }
 0x17a   :  { %6073 = vmatpush3.msra.mxu0 %v8040_v25  ;;  %6117 = vmatprep.subr.mxu1 %v10182_v2 }
 0x17b   :  { %6074 = vmatprep.subr.mxu0 %v10182_v2  ;;  %6118 = vmatpush3.msra.mxu1 %v1696_v53  ;;  %v10168_v53 = vand.u32 4294901760, %v8119_v56 }
 0x17c   :  { %6075 = vmatpush3.msra.mxu0 %v8057_v48  ;;  %6119 = vmatprep.subr.mxu1 %v10182_v2 }
 0x17d   :  { %6076 = vmatprep.subr.mxu0 %v10182_v2  ;;  %6120 = vmatpush3.msra.mxu1 %v1703_v4  ;;  %v1724_v4 = vand.u32 4294901760, %v1723_v52  ;;  %v1730_v18 = vsub.f32 %v8119_v56, %v10168_v53 }
 0x17e   :  { %6077 = vmatpush3.msra.mxu0 %v8070_v23  ;;  %6121 = vmatprep.subr.mxu1 %v10182_v2 }
 0x17f   :  { %6078 = vmatprep.subr.mxu0 %v10182_v2  ;;  %6122 = vmatpush3.msra.mxu1 %v1710_v21  ;;  %v1737_v21 = vsub.f32 %v8127_v60, %v10171_v42 }
 0x180   :  { %6079 = vmatpush3.msra.mxu0 %v8088_v34  ;;  %6123 = vmatprep.subr.mxu1 %v10182_v2 }
 0x181   :  { %6080 = vmatprep.subr.mxu0 %v10182_v2  ;;  %6124 = vmatpush3.msra.mxu1 %v1717_v24  ;;  %v1738_v52 = vand.u32 4294901760, %v1737_v21 }
 0x182   :  { %6081 = vmatpush3.msra.mxu0 %v8104_v0  ;;  %6125 = vmatprep.subr.mxu1 %v10182_v2 }
 0x183   :  { %6082 = vmatprep.subr.mxu0 %v10182_v2  ;;  %6126 = vmatpush3.msra.mxu1 %v1724_v4 }
 0x184   :  { %6083 = vmatpush3.msra.mxu0 %v8115_v33  ;;  %6127 = vmatprep.subr.mxu1 %v10182_v2 }
 0x185   :  { %6146 = vmatprep.subr.mxu0 %v10182_v2 }
 0x1c6   :  { %v930_v20 = vpop.f32.mrf.mxu1 }
 0x1c8   :  { %v5851_v62 = vpop.f32.mrf.mxu1 }
 0x1c9   :  { %v1731_v62 = vand.u32 4294901760, %v1730_v18 }
 0x1ca   :  { %v936_v3 = vpop.f32.mrf.mxu1 }
 0x1cb   :  { %6128 = vmatpush3.msra.mxu1 %v1731_v62 }
 0x1cc   :  { %v5854_v27 = vpop.f32.mrf.mxu1  ;;  %6129 = vmatprep.subr.mxu1 %v10182_v2 }
 0x1cd   :  { %6130 = vmatpush3.msra.mxu1 %v1738_v52 }
 0x1ce   :  { %v739_v46 = vpop.f32.mrf.mxu0  ;;  %6193 = vmatprep.subr.mxu1 %v10182_v2 }
 0x1cf   :  { %v931_v31 = vadd.f32 %v930_v20, %v739_v46  ;;  %v942_v5 = vpop.f32.mrf.mxu1 }
 0x1d0   :  { %v5804_v24 = vpop.f32.mrf.mxu0 }
 0x1d1   :  { %v5857_v53 = vpop.f32.mrf.mxu1 }
 0x1d4   :  { %v749_v27 = vpop.f32.mrf.mxu0 }
 0x1d5   :  { %v937_v1 = vadd.f32 %v936_v3, %v749_v27  ;;  %v948_v63 = vpop.f32.mrf.mxu1 }
 0x1d6   :  { %v5807_v42 = vpop.f32.mrf.mxu0 }
 0x1d7   :  { %v5860_v4 = vpop.f32.mrf.mxu1 }
 0x1da   :  { %v759_v18 = vpop.f32.mrf.mxu0 }
 0x1db   :  { %v943_v49 = vadd.f32 %v942_v5, %v759_v18  ;;  %v954_v22 = vpop.f32.mrf.mxu1 }
 0x1dc   :  { %v5810_v47 = vpop.f32.mrf.mxu0 }
 0x1dd   :  { %v5863_v21 = vpop.f32.mrf.mxu1 }
 0x1e0   :  { %v769_v46 = vpop.f32.mrf.mxu0 }
 0x1e1   :  { %v949_v20 = vadd.f32 %v948_v63, %v769_v46 }
 0x1e2   :  { %v5813_v62 = vpop.f32.mrf.mxu0 }
 0x1e5   :  { %v779_v24 = vpop.f32.mrf.mxu0 }
 0x1e6   :  { %v955_v61 = vadd.f32 %v954_v22, %v779_v24 }
 0x1e7   :  { %v5816_v10 = vpop.f32.mrf.mxu0 }
 0x1ed   :  { %v1175_v53 = vpop.f32.mrf.mxu1 }
 0x1ef   :  { %v5945_v52 = vpop.f32.mrf.mxu1 }
 0x1f2   :  { %v1183_v13 = vpop.f32.mrf.mxu1 }
 0x1f4   :  { %v5948_v35 = vpop.f32.mrf.mxu1 }
 0x1f7   :  { %v1058_v6 = vpop.f32.mrf.mxu0 }
 0x1f8   :  { %v1191_v3 = vpop.f32.mrf.mxu1 }
 0x1f9   :  { %v5898_v27 = vpop.f32.mrf.mxu0 }
 0x1fa   :  { %v5951_v42 = vpop.f32.mrf.mxu1 }
 0x1fd   :  { %v1065_v4 = vpop.f32.mrf.mxu0 }
 0x1fe   :  { %v1066_v50 = vadd.f32 %v1065_v4, %v937_v1  ;;  %v1199_v5 = vpop.f32.mrf.mxu1 }
 0x1ff   :  { %v5901_v18 = vpop.f32.mrf.mxu0 }
 0x200   :  { %v5954_v47 = vpop.f32.mrf.mxu1  ;;  %v1184_v21 = vadd.f32 %v1183_v13, %v1066_v50  ;;  %v1059_v18 = vadd.f32 %v1058_v6, %v931_v31 }
 0x202   :  { %v1176_v13 = vadd.f32 %v1175_v53, %v1059_v18 }
 0x203   :  { %v1072_v43 = vpop.f32.mrf.mxu0 }
 0x204   :  { %v1073_v63 = vadd.f32 %v1072_v43, %v943_v49  ;;  %v1207_v46 = vpop.f32.mrf.mxu1 }
 0x205   :  { %v5904_v62 = vpop.f32.mrf.mxu0 }
 0x206   :  { %v5957_v22 = vpop.f32.mrf.mxu1  ;;  %v1192_v10 = vadd.f32 %v1191_v3, %v1073_v63 }
 0x209   :  { %v1079_v24 = vpop.f32.mrf.mxu0 }
 0x20a   :  { %v1080_v52 = vadd.f32 %v1079_v24, %v949_v20  ;;  %v5091_v20 = vld [vmem:[%s10148_s4] ss:$0 sm:$0xff]  ;;  %s7265_s4 = smov 121  }
 0x20b   :  { %v5907_v2 = vpop.f32.mrf.mxu0 }
 0x20c   :  { %v1200_v35 = vadd.f32 %v1199_v5, %v1080_v52 }
 0x20e   :  { %v1086_v41 = vpop.f32.mrf.mxu0 }
 0x20f   :  { %v1087_v58 = vadd.f32 %v1086_v41, %v955_v61 }
 0x210   :  { %v5910_v27 = vpop.f32.mrf.mxu0 }
 0x211   :  { %v8145_v42 = vadd.f32 %v1207_v46, %v1087_v58 }
 0x217   :  { %v1437_v1 = vpop.f32.mrf.mxu1 }
 0x219   :  { %v6039_v4 = vpop.f32.mrf.mxu1 }
 0x21b   :  { %v1443_v47 = vpop.f32.mrf.mxu1 }
 0x21d   :  { %v6042_v50 = vpop.f32.mrf.mxu1 }
 0x21f   :  { %v1326_v43 = vpop.f32.mrf.mxu0  ;;  %v1449_v49 = vpop.f32.mrf.mxu1 }
 0x220   :  { %v1327_v62 = vadd.f32 %v1326_v43, %v1176_v13 }
 0x221   :  { %v5992_v2 = vpop.f32.mrf.mxu0  ;;  %v6045_v3 = vpop.f32.mrf.mxu1 }
 0x222   :  { %v1438_v5 = vadd.f32 %v1437_v1, %v1327_v62 }
 0x223   :  { %v1332_v41 = vpop.f32.mrf.mxu0  ;;  %v1455_v61 = vpop.f32.mrf.mxu1 }
 0x224   :  { %v1471_v58 = vadd.f32 %v5091_v20, %v1438_v5 }
 0x225   :  { %v5995_v63 = vpop.f32.mrf.mxu0  ;;  %v6048_v46 = vpop.f32.mrf.mxu1 }
 0x226   :  { %v1472_v22 = vsub.f32 0.0, %v1471_v58  ;;  %v1479_v6 = vand.u32 2147483647, %v1471_v58  ;;  %v1333_v63 = vadd.f32 %v1332_v41, %v1184_v21 }
 0x227   :  { %v1338_v31 = vpop.f32.mrf.mxu0  ;;  %v1461_v24 = vpop.f32.mrf.mxu1 }
 0x228   :  { %v1473_v53 = vmul.f32 1.442695, %v1472_v22  ;;  %v1480_v52 = vsub.f32 0.0, %v1479_v6 }
 0x229   :  { %v5998_v27 = vpop.f32.mrf.mxu0  ;;  %v6051_v4 = vpop.f32.mrf.mxu1 }
 0x22a   :  { %7209 = vpow2.f32 %v1473_v53  ;;  %v1481_v18 = vmul.f32 1.442695, %v1480_v52  ;;  %v8152_v27 = vadd.f32 %v1443_v47, %v1333_v63  ;;  %v1339_v4 = vadd.f32 %v1338_v31, %v1192_v10 }
 0x22b   :  { %v1344_v50 = vpop.f32.mrf.mxu0 }
 0x22c   :  { %7211 = vpow2.f32 %v1481_v18  ;;  %10274 = vst [vmem:[#allocation10_spill] sm:$0xff] %v8152_v27  ;;  %v8158_v21 = vadd.f32 %v1449_v49, %v1339_v4  ;;  %v1345_v47 = vadd.f32 %v1344_v50, %v1200_v35 }
 0x22d   :  { %v6001_v13 = vpop.f32.mrf.mxu0 }
 0x22e   :  { %10275 = vst [vmem:[#allocation11_spill] sm:$0xff] %v8158_v21  ;;  %v8176_v31 = vadd.f32 %v1455_v61, %v1345_v47 }
 0x22f   :  { %v1350_v43 = vpop.f32.mrf.mxu0 }
 0x230   :  { %10277 = vst [vmem:[#allocation12_spill] sm:$0xff] %v8176_v31  ;;  %v1351_v50 = vadd.f32 %v1350_v43, %v8145_v42 }
 0x231   :  { %v6004_v1 = vpop.f32.mrf.mxu0 }
 0x232   :  { %v1478_v1 = vmax.f32 %v1471_v58, 0.0  ;;  %v10276_v58 = vmov 0.0  }
 0x237   :  { %v7210_v62 = vpop.eup %7209 }
 0x238   :  { %v1475_v2 = vadd.f32 1.0, %v7210_v62 }
 0x239   :  { %v7212_v20 = vpop.eup %7211 }
 0x23a   :  { %7213 = vrcp.f32 %v1475_v2  ;;  %v1483_v3 = vadd.f32 1.0, %v7212_v20  ;;  %v1486_v5 = vmul.f32 -0.5, %v7212_v20  ;;  %v1489_v6 = vand.u32 2147483647, %v7212_v20 }
 0x23c   :  { %7215 = vlog2.f32 %v1483_v3  ;;  %v1487_v46 = vadd.f32 1.0, %v1486_v5  ;;  %vm1490_vm3 = vcmp.lt.f32.partialorder %v1489_v6, 0.0004427343  ;;  %v8197_v6 = vadd.f32 %v1461_v24, %v1351_v50 }
 0x23e   :  { %v1488_v13 = vmul.f32 %v7212_v20, %v1487_v46  ;;  %10278 = vst [vmem:[#allocation13_spill] sm:$0xff] %v8197_v6 }
 0x247   :  { %v8150_v22 = vpop.eup %7213 }
 0x248   :  { %v1493_v52 = vmul.f32 %v8150_v22, %v8152_v27  ;;  %v1494_v41 = vmul.f32 %v8150_v22, %v8158_v21  ;;  %v1495_v20 = vmul.f32 %v8150_v22, %v8176_v31  ;;  %v1496_v4 = vmul.f32 %v8150_v22, %v8197_v6 }
 0x249   :  { %v7216_v53 = vpop.eup %7215 }
 0x24a   :  { %v1485_v18 = vmul.f32 0.6931472, %v7216_v53  ;;  %v8156_v3 = vand.u32 4294901760, %v1493_v52  ;;  %v8174_v49 = vand.u32 4294901760, %v1494_v41  ;;  %v8200_v53 = vand.u32 4294901760, %v1495_v20 }
 0x24c   :  { %v1491_v62 = vsel %vm1490_vm3, %v1488_v13, %v1485_v18  ;;  %v8165_v63 = vsub.f32 %v1493_v52, %v8156_v3  ;;  %v8194_v42 = vsub.f32 %v1494_v41, %v8174_v49  ;;  %v8216_v18 = vsub.f32 %v1495_v20, %v8200_v53 }
 0x24d   :  { %v1492_v2 = vadd.f32 %v1491_v62, %v1478_v1  ;;  %v8221_v1 = vand.u32 4294901760, %v1496_v4 }
 0x24e   :  { %v1590_v46 = vand.u32 4294901760, %v8165_v63  ;;  %v1600_v24 = vand.u32 4294901760, %v8194_v42 }
 0x24f   :  { %v8162_v5 = vand.u32 4294901760, %v1492_v2  ;;  %v8236_v41 = vsub.f32 %v1496_v4, %v8221_v1 }
 0x250   :  { %v1591_v52 = vsub.f32 %v8165_v63, %v1590_v46  ;;  %v1601_v62 = vsub.f32 %v8194_v42, %v1600_v24 }
 0x251   :  { %6132 = vmatmul.mubr.f32.vlgmr.msra.gmra.mxu1 %v8162_v5  ;;  %v8169_v10 = vsub.f32 %v1492_v2, %v8162_v5  ;;  %v1610_v2 = vand.u32 4294901760, %v8216_v18  ;;  %v1620_v20 = vand.u32 4294901760, %v8236_v41 }
 0x252   :  { %6194 = vmatpush3.msra.mxu1 %v7908_v32  ;;  %6134 = vmatprep.mubr.msk.f32.mxu1 %vm7253_vm1, %v10276_v58  ;;  %v1592_v13 = vand.u32 4294901760, %v1591_v52  ;;  %v1602_v47 = vand.u32 4294901760, %v1601_v62 }
 0x253   :  { %6195 = vmatprep.subr.mxu1 %v10276_v58  ;;  %v1580_v35 = vand.u32 4294901760, %v8169_v10  ;;  %v1611_v50 = vsub.f32 %v8216_v18, %v1610_v2 }
 0x254   :  { %6196 = vmatpush3.msra.mxu1 %v7916_v38 }
 0x255   :  { %6197 = vmatprep.subr.mxu1 %v10276_v58  ;;  %6135 = vmatmul.mubr.f32.gmra.mxu1 %v8156_v3  ;;  %v1581_v61 = vsub.f32 %v8169_v10, %v1580_v35 }
 0x256   :  { %6198 = vmatpush3.msra.mxu1 %v7927_v45  ;;  %6137 = vmatprep.mubr.msk.f32.mxu1 %vm7253_vm1, %v10276_v58 }
 0x257   :  { %6199 = vmatprep.subr.mxu1 %v10276_v58  ;;  %v1582_v43 = vand.u32 4294901760, %v1581_v61  ;;  %v1612_v61 = vand.u32 4294901760, %v1611_v50 }
 0x258   :  { %6200 = vmatpush3.msra.mxu1 %v7941_v55 }
 0x259   :  { %6201 = vmatprep.subr.mxu1 %v10276_v58  ;;  %6085 = vmatmul.mubr.f32.vlgmr.msra.gmra.mxu0 %v1582_v43  ;;  %v1621_v43 = vsub.f32 %v8236_v41, %v1620_v20 }
 0x25a   :  { %6138 = vmatmul.mubr.f32.gmra.mxu1 %v8174_v49  ;;  %6147 = vmatpush3.msra.mxu0 %v7914_v37 }
 0x25b   :  { %6202 = vmatpush3.msra.mxu1 %v7956_v11  ;;  %6148 = vmatprep.subr.mxu0 %v10276_v58  ;;  %v1622_v52 = vand.u32 4294901760, %v1621_v43 }
 0x25c   :  { %6203 = vmatprep.subr.mxu1 %v10276_v58  ;;  %6149 = vmatpush3.msra.mxu0 %v7925_v44 }
 0x25d   :  { %6204 = vmatpush3.msra.mxu1 %v7966_v36  ;;  %6087 = vmatprep.mubr.msk.f32.mxu0 %vm7253_vm1, %v10276_v58 }
 0x25e   :  { %6140 = vmatprep.mubr.msk.f32.mxu1 %vm7253_vm1, %v10276_v58  ;;  %6150 = vmatprep.subr.mxu0 %v10276_v58 }
 0x25f   :  { %6205 = vmatprep.subr.mxu1 %v10276_v58  ;;  %6088 = vmatmul.mubr.f32.gmra.mxu0 %v1592_v13 }
 0x260   :  { %6141 = vmatmul.mubr.f32.gmra.mxu1 %v8200_v53  ;;  %6151 = vmatpush3.msra.mxu0 %v7939_v54 }
 0x261   :  { %6206 = vmatpush3.msra.mxu1 %v7982_v59  ;;  %6152 = vmatprep.subr.mxu0 %v10276_v58 }
 0x262   :  { %6207 = vmatprep.subr.mxu1 %v10276_v58  ;;  %6153 = vmatpush3.msra.mxu0 %v7953_v7 }
 0x263   :  { %6208 = vmatpush3.msra.mxu1 %v7995_v30  ;;  %6090 = vmatprep.mubr.msk.f32.mxu0 %vm7253_vm1, %v10276_v58 }
 0x264   :  { %6143 = vmatprep.mubr.msk.f32.mxu1 %vm7253_vm1, %v10276_v58  ;;  %6154 = vmatprep.subr.mxu0 %v10276_v58 }
 0x265   :  { %6209 = vmatprep.subr.mxu1 %v10276_v58  ;;  %6091 = vmatmul.mubr.f32.gmra.mxu0 %v1602_v47 }
 0x266   :  { %6144 = vmatmul.mubr.f32.gmra.mxu1 %v8221_v1  ;;  %6155 = vmatpush3.msra.mxu0 %v7970_v51 }
 0x267   :  { %6210 = vmatpush3.msra.mxu1 %v8013_v40  ;;  %6156 = vmatprep.subr.mxu0 %v10276_v58 }
 0x268   :  { %6211 = vmatprep.subr.mxu1 %v10276_v58  ;;  %6157 = vmatpush3.msra.mxu0 %v7980_v8 }
 0x269   :  { %6212 = vmatpush3.msra.mxu1 %v8029_v17  ;;  %6093 = vmatprep.mubr.msk.f32.mxu0 %vm7253_vm1, %v10276_v58 }
 0x26a   :  { %6158 = vmatprep.subr.mxu0 %v10276_v58  ;;  %6213 = vmatprep.subr.mxu1 %v10276_v58 }
 0x26b   :  { %6094 = vmatmul.mubr.f32.gmra.mxu0 %v1612_v61  ;;  %6214 = vmatpush3.msra.mxu1 %v8040_v25 }
 0x26c   :  { %6159 = vmatpush3.msra.mxu0 %v7993_v16  ;;  %6215 = vmatprep.subr.mxu1 %v10276_v58 }
 0x26d   :  { %6160 = vmatprep.subr.mxu0 %v10276_v58  ;;  %6216 = vmatpush3.msra.mxu1 %v8057_v48 }
 0x26e   :  { %6161 = vmatpush3.msra.mxu0 %v8011_v9  ;;  %6096 = vmatprep.mubr.msk.f32.mxu0 %vm7253_vm1, %v10276_v58 }
 0x26f   :  { %6162 = vmatprep.subr.mxu0 %v10276_v58  ;;  %6217 = vmatprep.subr.mxu1 %v10276_v58 }
 0x270   :  { %6097 = vmatmul.mubr.f32.gmra.mxu0 %v1622_v52  ;;  %6218 = vmatpush3.msra.mxu1 %v8070_v23  ;;  %v116_v52 = vld [vmem:[%s10154_s10 + $0x38] sm:$0xff] }
 0x271   :  { %6163 = vmatpush3.msra.mxu0 %v8026_v15  ;;  %6219 = vmatprep.subr.mxu1 %v10276_v58 }
 0x272   :  { %6164 = vmatprep.subr.mxu0 %v10276_v58  ;;  %6220 = vmatpush3.msra.mxu1 %v8088_v34 }
 0x273   :  { %6165 = vmatpush3.msra.mxu0 %v8044_v26  ;;  %6221 = vmatprep.subr.mxu1 %v10276_v58 }
 0x274   :  { %6166 = vmatprep.subr.mxu0 %v10276_v58  ;;  %6222 = vmatpush3.msra.mxu1 %v8104_v0 }
 0x275   :  { %6167 = vmatpush3.msra.mxu0 %v8055_v39  ;;  %6223 = vmatprep.subr.mxu1 %v10276_v58 }
 0x276   :  { %6168 = vmatprep.subr.mxu0 %v10276_v58  ;;  %6224 = vmatpush3.msra.mxu1 %v8115_v33 }
 0x277   :  { %6169 = vmatpush3.msra.mxu0 %v8068_v12  ;;  %6225 = vmatprep.mubr.msk.f32.mxu1 %vm7253_vm1, %v10276_v58 }
 0x278   :  { %6170 = vmatprep.subr.mxu0 %v10276_v58  ;;  %6226 = vmatmul.mubr.f32.vlgmr.msra.gmra.mxu1 %v1580_v35 }
 0x279   :  { %6287 = vmatprep.subr.mxu1 %v10276_v58  ;;  %6171 = vmatpush3.msra.mxu0 %v8086_v19 }
 0x27a   :  { %6288 = vmatpush3.msra.mxu1 %v7908_v32  ;;  %6172 = vmatprep.subr.mxu0 %v10276_v58  ;;  %v10279_v32 = vand.u32 4294901760, %v7914_v37  ;;  %v10281_v37 = vand.u32 4294901760, %v7939_v54  ;;  %v10284_v54 = vand.u32 4294901760, %v7980_v8  ;;  %v10290_v8 = vand.u32 4294901760, %v8068_v12 }
 0x27b   :  { %6289 = vmatprep.subr.mxu1 %v10276_v58  ;;  %6173 = vmatpush3.msra.mxu0 %v8101_v29 }
 0x27c   :  { %6228 = vmatprep.mubr.msk.f32.mxu1 %vm7253_vm1, %v10276_v58  ;;  %6290 = vmatpush3.msra.mxu1 %v7916_v38  ;;  %v10280_v38 = vand.u32 4294901760, %v7925_v44  ;;  %v10282_v44 = vand.u32 4294901760, %v7953_v7  ;;  %v10286_v7 = vand.u32 4294901760, %v8011_v9  ;;  %v10294_v9 = vand.u32 4294901760, %v8127_v60 }
 0x27d   :  { %6174 = vmatprep.subr.mxu0 %v10276_v58  ;;  %6229 = vmatmul.mubr.f32.gmra.mxu1 %v1590_v46 }
 0x27e   :  { %6291 = vmatprep.subr.mxu1 %v10276_v58  ;;  %6175 = vmatpush3.msra.mxu0 %v8119_v56 }
 0x27f   :  { %6292 = vmatpush3.msra.mxu1 %v7927_v45  ;;  %6176 = vmatprep.subr.mxu0 %v10276_v58  ;;  %v10283_v45 = vand.u32 4294901760, %v7970_v51  ;;  %v10289_v51 = vand.u32 4294901760, %v8055_v39  ;;  %v122_v39 = vld [vmem:[%s10154_s10 + $0x68] sm:$0xff] }
 0x280   :  { %6293 = vmatprep.subr.mxu1 %v10276_v58  ;;  %6177 = vmatpush3.msra.mxu0 %v8127_v60 }
 0x281   :  { %6178 = vmatprep.mubr.msk.f32.mxu0 %vm7253_vm1, %v10276_v58  ;;  %6231 = vmatprep.mubr.msk.f32.mxu1 %vm7253_vm1, %v10276_v58 }
 0x282   :  { %6294 = vmatpush3.msra.mxu1 %v7941_v55  ;;  %6179 = vmatmul.mubr.f32.vlgmr.msra.gmra.mxu0 %v8169_v10  ;;  %v10285_v55 = vand.u32 4294901760, %v7993_v16  ;;  %v10292_v16 = vand.u32 4294901760, %v8101_v29 }
 0x283   :  { %6232 = vmatmul.mubr.f32.gmra.mxu1 %v1600_v24  ;;  %6240 = vmatprep.subr.mxu0 %v10276_v58  ;;  %v118_v24 = vld [vmem:[%s10154_s10 + $0x48] sm:$0xff] }
 0x284   :  { %6295 = vmatprep.subr.mxu1 %v10276_v58  ;;  %6241 = vmatpush3.msra.mxu0 %v10279_v32  ;;  %v8525_v62 = vand.u32 4294901760, %v118_v24 }
 0x285   :  { %6296 = vmatpush3.msra.mxu1 %v7956_v11  ;;  %6242 = vmatprep.subr.mxu0 %v10276_v58  ;;  %v10287_v11 = vand.u32 4294901760, %v8026_v15 }
 0x286   :  { %6297 = vmatprep.subr.mxu1 %v10276_v58  ;;  %6181 = vmatprep.mubr.msk.f32.mxu0 %vm7253_vm1, %v10276_v58 }
 0x287   :  { %6234 = vmatprep.mubr.msk.f32.mxu1 %vm7253_vm1, %v10276_v58  ;;  %6243 = vmatpush3.msra.mxu0 %v10280_v38 }
 0x288   :  { %6298 = vmatpush3.msra.mxu1 %v7966_v36  ;;  %6182 = vmatmul.mubr.f32.gmra.mxu0 %v8165_v63  ;;  %v10288_v36 = vand.u32 4294901760, %v8044_v26 }
 0x289   :  { %6235 = vmatmul.mubr.f32.gmra.mxu1 %v1610_v2  ;;  %6244 = vmatprep.subr.mxu0 %v10276_v58 }
 0x28a   :  { %6299 = vmatprep.subr.mxu1 %v10276_v58  ;;  %6245 = vmatpush3.msra.mxu0 %v10281_v37 }
 0x28b   :  { %6300 = vmatpush3.msra.mxu1 %v7982_v59  ;;  %6246 = vmatprep.subr.mxu0 %v10276_v58  ;;  %v10291_v59 = vand.u32 4294901760, %v8086_v19  ;;  %v121_v19 = vld [vmem:[%s10154_s10 + $0x60] sm:$0xff] }
 0x28c   :  { %6301 = vmatprep.subr.mxu1 %v10276_v58  ;;  %6184 = vmatprep.mubr.msk.f32.mxu0 %vm7253_vm1, %v10276_v58 }
 0x28d   :  { %6237 = vmatprep.mubr.msk.f32.mxu1 %vm7253_vm1, %v10276_v58  ;;  %6247 = vmatpush3.msra.mxu0 %v10282_v44  ;;  %v8556_v44 = vand.u32 4294901760, %v116_v52 }
 0x28e   :  { %6302 = vmatpush3.msra.mxu1 %v7995_v30  ;;  %6185 = vmatmul.mubr.f32.gmra.mxu0 %v8194_v42  ;;  %v10293_v30 = vand.u32 4294901760, %v8119_v56  ;;  %v120_v56 = vld [vmem:[%s10154_s10 + $0x58] sm:$0xff] }
 0x28f   :  { %6238 = vmatmul.mubr.f32.gmra.mxu1 %v1620_v20  ;;  %6248 = vmatprep.subr.mxu0 %v10276_v58  ;;  %v8499_v10 = vand.u32 4294901760, %v120_v56  ;;  %v8536_v20 = vsub.f32 %v118_v24, %v8525_v62 }
 0x290   :  { %6303 = vmatprep.subr.mxu1 %v10276_v58  ;;  %6249 = vmatpush3.msra.mxu0 %v10283_v45 }
 0x291   :  { %6304 = vmatpush3.msra.mxu1 %v8013_v40  ;;  %6250 = vmatprep.subr.mxu0 %v10276_v58  ;;  %v124_v40 = vld [vmem:[%s10154_s10 + $0x78] sm:$0xff]  ;;  %v8513_v4 = vsub.f32 %v120_v56, %v8499_v10  ;;  %v10195_v38 = vand.u32 4294901760, %v8536_v20 }
 0x292   :  { %6305 = vmatprep.subr.mxu1 %v10276_v58  ;;  %6187 = vmatprep.mubr.msk.f32.mxu0 %vm7253_vm1, %v10276_v58  ;;  %v8451_v15 = vand.u32 4294901760, %v124_v40 }
 0x293   :  { %6251 = vmatpush3.msra.mxu0 %v10284_v54  ;;  %6306 = vmatpush3.msra.mxu1 %v8029_v17  ;;  %v123_v17 = vld [vmem:[%s10154_s10 + $0x70] sm:$0xff]  ;;  %v10197_v2 = vand.u32 4294901760, %v8513_v4 }
 0x294   :  { %6188 = vmatmul.mubr.f32.gmra.mxu0 %v8216_v18  ;;  %6252 = vmatprep.subr.mxu0 %v10276_v58  ;;  %v8459_v26 = vand.u32 4294901760, %v123_v17  ;;  %v115_v54 = vld [vmem:[%s10154_s10 + $0x30] sm:$0xff] }
 0x295   :  { %6307 = vmatprep.subr.mxu1 %v10276_v58  ;;  %6253 = vmatpush3.msra.mxu0 %v10285_v55  ;;  %v2500_v43 = vsub.f32 %v8513_v4, %v10197_v2 }
 0x296   :  { %6308 = vmatpush3.msra.mxu1 %v8040_v25  ;;  %6254 = vmatprep.subr.mxu0 %v10276_v58  ;;  %v8457_v25 = vsub.f32 %v124_v40, %v8451_v15  ;;  %v8468_v12 = vsub.f32 %v123_v17, %v8459_v26  ;;  %v113_v17 = vld [vmem:[%s10154_s10 + $0x20] sm:$0xff] }
 0x297   :  { %6309 = vmatprep.subr.mxu1 %v10276_v58  ;;  %6190 = vmatprep.mubr.msk.f32.mxu0 %vm7253_vm1, %v10276_v58  ;;  %v2501_v45 = vand.u32 4294901760, %v2500_v43  ;;  %v8600_v56 = vand.u32 4294901760, %v113_v17 }
 0x298   :  { %6255 = vmatpush3.msra.mxu0 %v10286_v7  ;;  %6310 = vmatpush3.msra.mxu1 %v8057_v48  ;;  %v10201_v48 = vand.u32 4294901760, %v8457_v25  ;;  %v10200_v29 = vand.u32 4294901760, %v8468_v12  ;;  %v2514_v7 = vsub.f32 %v8536_v20, %v10195_v38 }
 0x299   :  { %6191 = vmatmul.mubr.f32.gmra.mxu0 %v8236_v41  ;;  %6256 = vmatprep.subr.mxu0 %v10276_v58  ;;  %v117_v41 = vld [vmem:[%s10154_s10 + $0x40] sm:$0xff] }
 0x29a   :  { %6311 = vmatprep.subr.mxu1 %v10276_v58  ;;  %6257 = vmatpush3.msra.mxu0 %v10287_v11  ;;  %v8538_v61 = vand.u32 4294901760, %v117_v41 }
 0x29b   :  { %6312 = vmatpush3.msra.mxu1 %v8070_v23  ;;  %6258 = vmatprep.subr.mxu0 %v10276_v58  ;;  %v8470_v23 = vand.u32 4294901760, %v122_v39 }
 0x29c   :  { %6313 = vmatprep.subr.mxu1 %v10276_v58  ;;  %6259 = vmatpush3.msra.mxu0 %v10288_v36  ;;  %v8554_v37 = vsub.f32 %v117_v41, %v8538_v61  ;;  %v8569_v36 = vsub.f32 %v116_v52, %v8556_v44 }
 0x29d   :  { %6314 = vmatpush3.msra.mxu1 %v8088_v34  ;;  %6260 = vmatprep.subr.mxu0 %v10276_v58  ;;  %v2472_v34 = vsub.f32 %v8457_v25, %v10201_v48 }
 0x29e   :  { %6315 = vmatprep.subr.mxu1 %v10276_v58  ;;  %6261 = vmatpush3.msra.mxu0 %v10289_v51  ;;  %v10194_v11 = vand.u32 4294901760, %v8554_v37  ;;  %v8572_v51 = vand.u32 4294901760, %v115_v54 }
 0x29f   :  { %6316 = vmatpush3.msra.mxu1 %v8104_v0  ;;  %6262 = vmatprep.subr.mxu0 %v10276_v58  ;;  %v8482_v0 = vsub.f32 %v122_v39, %v8470_v23  ;;  %v2473_v60 = vand.u32 4294901760, %v2472_v34 }
 0x2a0   :  { %6317 = vmatprep.subr.mxu1 %v10276_v58  ;;  %6263 = vmatpush3.msra.mxu0 %v10290_v8  ;;  %v114_v8 = vld [vmem:[%s10154_s10 + $0x28] sm:$0xff]  ;;  %v8587_v40 = vsub.f32 %v115_v54, %v8572_v51 }
 0x2a1   :  { %6318 = vmatpush3.msra.mxu1 %v8115_v33  ;;  %6319 = vmatprep.mubr.msk.f32.mxu1 %vm7253_vm1, %v10276_v58  ;;  %v8484_v33 = vand.u32 4294901760, %v121_v19 }
 0x2a2   :  { %6264 = vmatprep.subr.mxu0 %v10276_v58  ;;  %6320 = vmatmul.mubr.f32.vlgmr.msra.gmra.mxu1 %v8162_v5 }
 0x2a3   :  { %6265 = vmatpush3.msra.mxu0 %v10291_v59  ;;  %6322 = vmatprep.mubr.msk.f32.mxu1 %vm7253_vm1, %v10276_v58  ;;  %v8496_v63 = vsub.f32 %v121_v19, %v8484_v33  ;;  %v2515_v59 = vand.u32 4294901760, %v2514_v7 }
 0x2a4   :  { %6266 = vmatprep.subr.mxu0 %v10276_v58  ;;  %6272 = vmatprep.mubr.msk.f32.mxu0 %vm7253_vm1, %v10276_v58 }
 0x2a5   :  { %6267 = vmatpush3.msra.mxu0 %v10292_v16  ;;  %6381 = vmatprep.subr.mxu1 %v10276_v58  ;;  %v10198_v42 = vand.u32 4294901760, %v8496_v63  ;;  %v2521_v16 = vsub.f32 %v8554_v37, %v10194_v11 }
 0x2a6   :  { %6268 = vmatprep.subr.mxu0 %v10276_v58  ;;  %6323 = vmatmul.mubr.f32.gmra.mxu1 %v8156_v3 }
 0x2a7   :  { %6269 = vmatpush3.msra.mxu0 %v10293_v30  ;;  %6325 = vmatprep.mubr.msk.f32.mxu1 %vm7253_vm1, %v10276_v58  ;;  %v2493_v13 = vsub.f32 %v8496_v63, %v10198_v42  ;;  %v10192_v30 = vand.u32 4294901760, %v8569_v36  ;;  %v2522_v39 = vand.u32 4294901760, %v2521_v16  ;;  %v109_v16 = vld [vmem:[%s10154_s10] sm:$0xff] }
 0x2a8   :  { %6270 = vmatprep.subr.mxu0 %v10276_v58  ;;  %6382 = vmatpush3.msra.mxu1 %v2473_v60  ;;  %v10191_v60 = vand.u32 4294901760, %v8587_v40 }
 0x2a9   :  { %6271 = vmatpush3.msra.mxu0 %v10294_v9  ;;  %6383 = vmatprep.subr.mxu1 %v10276_v58  ;;  %v2494_v47 = vand.u32 4294901760, %v2493_v13  ;;  %v8583_v9 = vand.u32 4294901760, %v114_v8  ;;  %v2528_v19 = vsub.f32 %v8569_v36, %v10192_v30  ;;  %v111_v13 = vld [vmem:[%s10154_s10 + $0x10] sm:$0xff] }
 0x2aa   :  { %6273 = vmatmul.mubr.f32.vlgmr.msra.gmra.mxu0 %v8162_v5  ;;  %6326 = vmatmul.mubr.f32.gmra.mxu1 %v8174_v49  ;;  %v10199_v5 = vand.u32 4294901760, %v8482_v0  ;;  %v8631_v52 = vand.u32 4294901760, %v111_v13 }
 0x2ab   :  { %6275 = vmatprep.mubr.msk.f32.mxu0 %vm7253_vm1, %v10276_v58  ;;  %6328 = vmatprep.mubr.msk.f32.mxu1 %vm7253_vm1, %v10276_v58  ;;  %v8598_v34 = vsub.f32 %v114_v8, %v8583_v9 }
 0x2ac   :  { %6334 = vmatprep.subr.mxu0 %v10276_v58  ;;  %v2486_v46 = vsub.f32 %v8482_v0, %v10199_v5  ;;  %v8644_v8 = vsub.f32 %v111_v13, %v8631_v52 }
 0x2ad   :  { %6335 = vmatpush3.msra.mxu0 %v8451_v15 }
 0x2ae   :  { %6276 = vmatmul.mubr.f32.gmra.mxu0 %v8156_v3  ;;  %6329 = vmatmul.mubr.f32.gmra.mxu1 %v8200_v53  ;;  %v2479_v3 = vsub.f32 %v8468_v12, %v10200_v29  ;;  %v2487_v18 = vand.u32 4294901760, %v2486_v46  ;;  %v8611_v46 = vsub.f32 %v113_v17, %v8600_v56 }
 0x2af   :  { %6278 = vmatprep.mubr.msk.f32.mxu0 %vm7253_vm1, %v10276_v58  ;;  %6331 = vmatprep.mubr.msk.f32.mxu1 %vm7253_vm1, %v10276_v58 }
 0x2b0   :  { %6336 = vmatprep.subr.mxu0 %v10276_v58  ;;  %v2480_v35 = vand.u32 4294901760, %v2479_v3  ;;  %v112_v3 = vld [vmem:[%s10154_s10 + $0x18] sm:$0xff] }
 0x2b1   :  { %6337 = vmatpush3.msra.mxu0 %v8459_v26  ;;  %v8613_v24 = vand.u32 4294901760, %v112_v3 }
 0x2b2   :  { %6279 = vmatmul.mubr.f32.gmra.mxu0 %v8174_v49  ;;  %6332 = vmatmul.mubr.f32.gmra.mxu1 %v8221_v1  ;;  %v119_v49 = vld [vmem:[%s10154_s10 + $0x50] sm:$0xff] }
 0x2b3   :  { %6281 = vmatprep.mubr.msk.f32.mxu0 %vm7253_vm1, %v10276_v58  ;;  %6413 = vmatprep.mubr.msk.f32.mxu1 %vm7253_vm1, %v10276_v58  ;;  %v8629_v43 = vsub.f32 %v112_v3, %v8613_v24  ;;  %v8658_v3 = vand.u32 4294901760, %v109_v16 }
 0x2b4   :  { %6338 = vmatprep.subr.mxu0 %v10276_v58  ;;  %6384 = vmatpush3.msra.mxu1 %v2480_v35  ;;  %v10190_v35 = vand.u32 4294901760, %v8598_v34 }
 0x2b5   :  { %6339 = vmatpush3.msra.mxu0 %v8470_v23  ;;  %6385 = vmatprep.subr.mxu1 %v10276_v58  ;;  %v10187_v7 = vand.u32 4294901760, %v8629_v43 }
 0x2b6   :  { %6282 = vmatmul.mubr.f32.gmra.mxu0 %v8200_v53  ;;  %6340 = vmatprep.subr.mxu0 %v10276_v58  ;;  %v8509_v53 = vand.u32 4294901760, %v119_v49  ;;  %v2542_v41 = vsub.f32 %v8598_v34, %v10190_v35 }
 0x2b7   :  { %6284 = vmatprep.mubr.msk.f32.mxu0 %vm7253_vm1, %v10276_v58  ;;  %6341 = vmatpush3.msra.mxu0 %v8484_v33 }
 0x2b8   :  { %6342 = vmatprep.subr.mxu0 %v10276_v58  ;;  %6386 = vmatpush3.msra.mxu1 %v2487_v18  ;;  %v2535_v18 = vsub.f32 %v8587_v40, %v10191_v60  ;;  %v2543_v54 = vand.u32 4294901760, %v2542_v41  ;;  %v8670_v41 = vsub.f32 %v109_v16, %v8658_v3 }
 0x2b9   :  { %6343 = vmatpush3.msra.mxu0 %v8499_v10  ;;  %6387 = vmatprep.subr.mxu1 %v10276_v58 }
 0x2ba   :  { %6285 = vmatmul.mubr.f32.gmra.mxu0 %v8221_v1  ;;  %v8523_v1 = vsub.f32 %v119_v49, %v8509_v53  ;;  %6344 = vmatprep.subr.mxu0 %v10276_v58  ;;  %v2529_v49 = vand.u32 4294901760, %v2528_v19  ;;  %v10186_v19 = vand.u32 4294901760, %v8644_v8 }
 0x2bb   :  { %6366 = vmatprep.mubr.msk.f32.mxu0 %vm7253_vm1, %v10276_v58  ;;  %6345 = vmatpush3.msra.mxu0 %v8509_v53 }
 0x2bc   :  { %v10196_v50 = vand.u32 4294901760, %v8523_v1  ;;  %6346 = vmatprep.subr.mxu0 %v10276_v58  ;;  %6388 = vmatpush3.msra.mxu1 %v2494_v47  ;;  %v10189_v47 = vand.u32 4294901760, %v8611_v46  ;;  %v2563_v13 = vsub.f32 %v8644_v8, %v10186_v19 }
 0x2bd   :  { %6347 = vmatpush3.msra.mxu0 %v8525_v62  ;;  %6389 = vmatprep.subr.mxu1 %v10276_v58 }
 0x2be   :  { %v2507_v32 = vsub.f32 %v8523_v1, %v10196_v50  ;;  %6348 = vmatprep.subr.mxu0 %v10276_v58  ;;  %6390 = vmatpush3.msra.mxu1 %v2501_v45  ;;  %v110_v45 = vld [vmem:[%s10154_s10 + $0x8] sm:$0xff] }
 0x2bf   :  { %6349 = vmatpush3.msra.mxu0 %v8538_v61  ;;  %6391 = vmatprep.subr.mxu1 %v10276_v58 }
 0x2c0   :  { %v2508_v55 = vand.u32 4294901760, %v2507_v32  ;;  %6350 = vmatprep.subr.mxu0 %v10276_v58  ;;  %v2536_v32 = vand.u32 4294901760, %v2535_v18 }
 0x2c1   :  { %6351 = vmatpush3.msra.mxu0 %v8556_v44 }
 0x2c2   :  { %6352 = vmatprep.subr.mxu0 %v10276_v58  ;;  %6392 = vmatpush3.msra.mxu1 %v2508_v55  ;;  %v2549_v55 = vsub.f32 %v8611_v46, %v10189_v47 }
 0x2c3   :  { %6353 = vmatpush3.msra.mxu0 %v8572_v51  ;;  %6393 = vmatprep.subr.mxu1 %v10276_v58 }
 0x2c4   :  { %6354 = vmatprep.subr.mxu0 %v10276_v58  ;;  %6394 = vmatpush3.msra.mxu1 %v2515_v59  ;;  %v8647_v59 = vand.u32 4294901760, %v110_v45  ;;  %v2550_v17 = vand.u32 4294901760, %v2549_v55 }
 0x2c5   :  { %6355 = vmatpush3.msra.mxu0 %v8583_v9  ;;  %6395 = vmatprep.subr.mxu1 %v10276_v58 }
 0x2c6   :  { %6356 = vmatprep.subr.mxu0 %v10276_v58  ;;  %6396 = vmatpush3.msra.mxu1 %v2522_v39  ;;  %v2556_v39 = vsub.f32 %v8629_v43, %v10187_v7 }
 0x2c7   :  { %6357 = vmatpush3.msra.mxu0 %v8600_v56  ;;  %6397 = vmatprep.subr.mxu1 %v10276_v58 }
 0x2c8   :  { %6358 = vmatprep.subr.mxu0 %v10276_v58  ;;  %6398 = vmatpush3.msra.mxu1 %v2529_v49  ;;  %v8662_v49 = vsub.f32 %v110_v45, %v8647_v59  ;;  %v2557_v18 = vand.u32 4294901760, %v2556_v39  ;;  %v2564_v45 = vand.u32 4294901760, %v2563_v13 }
 0x2c9   :  { %6359 = vmatpush3.msra.mxu0 %v8613_v24  ;;  %6399 = vmatprep.subr.mxu1 %v10276_v58 }
 0x2ca   :  { %6360 = vmatprep.subr.mxu0 %v10276_v58  ;;  %6400 = vmatpush3.msra.mxu1 %v2536_v32  ;;  %v10188_v32 = vand.u32 4294901760, %v8662_v49 }
 0x2cb   :  { %6361 = vmatpush3.msra.mxu0 %v8631_v52  ;;  %6401 = vmatprep.subr.mxu1 %v10276_v58 }
 0x2cc   :  { %6362 = vmatprep.subr.mxu0 %v10276_v58  ;;  %6402 = vmatpush3.msra.mxu1 %v2543_v54  ;;  %v10193_v54 = vand.u32 4294901760, %v8670_v41  ;;  %v2570_v55 = vsub.f32 %v8662_v49, %v10188_v32 }
 0x2cd   :  { %6363 = vmatpush3.msra.mxu0 %v8647_v59  ;;  %6403 = vmatprep.subr.mxu1 %v10276_v58 }
 0x2ce   :  { %6364 = vmatprep.subr.mxu0 %v10276_v58  ;;  %6404 = vmatpush3.msra.mxu1 %v2550_v17  ;;  %v2577_v17 = vsub.f32 %v8670_v41, %v10193_v54  ;;  %v2571_v39 = vand.u32 4294901760, %v2570_v55 }
 0x2cf   :  { %6365 = vmatpush3.msra.mxu0 %v8658_v3  ;;  %6405 = vmatprep.subr.mxu1 %v10276_v58 }
 0x2d0   :  { %6428 = vmatprep.subr.mxu0 %v10276_v58  ;;  %6406 = vmatpush3.msra.mxu1 %v2557_v18  ;;  %v2578_v13 = vand.u32 4294901760, %v2577_v17 }
 0x2d1   :  { %6407 = vmatprep.subr.mxu1 %v10276_v58 }
 0x2d2   :  { %6408 = vmatpush3.msra.mxu1 %v2564_v45 }
 0x2d3   :  { %6409 = vmatprep.subr.mxu1 %v10276_v58 }
 0x2d4   :  { %6410 = vmatpush3.msra.mxu1 %v2571_v39 }
 0x2d5   :  { %6411 = vmatprep.subr.mxu1 %v10276_v58 }
 0x2d6   :  { %6412 = vmatpush3.msra.mxu1 %v2578_v13 }
 0x2d7   :  { %6475 = vmatprep.subr.mxu1 %v10276_v58 }
 0x311   :  { %v1775_v16 = vpop.f32.mrf.mxu1 }
 0x313   :  { %v6133_v19 = vpop.f32.mrf.mxu1 }
 0x315   :  { %v1781_v7 = vpop.f32.mrf.mxu1 }
 0x317   :  { %v6136_v18 = vpop.f32.mrf.mxu1 }
 0x319   :  { %v1584_v32 = vpop.f32.mrf.mxu0 }
 0x31a   :  { %v1776_v47 = vadd.f32 %v1775_v16, %v1584_v32  ;;  %v1787_v35 = vpop.f32.mrf.mxu1 }
 0x31b   :  { %v6086_v60 = vpop.f32.mrf.mxu0 }
 0x31c   :  { %v6139_v30 = vpop.f32.mrf.mxu1 }
 0x31f   :  { %v1594_v54 = vpop.f32.mrf.mxu0 }
 0x320   :  { %v1782_v45 = vadd.f32 %v1781_v7, %v1594_v54  ;;  %v1793_v55 = vpop.f32.mrf.mxu1 }
 0x321   :  { %v6089_v19 = vpop.f32.mrf.mxu0 }
 0x322   :  { %v6142_v11 = vpop.f32.mrf.mxu1 }
 0x325   :  { %v1604_v38 = vpop.f32.mrf.mxu0 }
 0x326   :  { %v1788_v17 = vadd.f32 %v1787_v35, %v1604_v38  ;;  %v1799_v39 = vpop.f32.mrf.mxu1 }
 0x327   :  { %v6092_v50 = vpop.f32.mrf.mxu0 }
 0x328   :  { %v6145_v2 = vpop.f32.mrf.mxu1 }
 0x32b   :  { %v1614_v42 = vpop.f32.mrf.mxu0 }
 0x32c   :  { %v1794_v13 = vadd.f32 %v1793_v55, %v1614_v42 }
 0x32d   :  { %v6095_v18 = vpop.f32.mrf.mxu0 }
 0x330   :  { %v1624_v5 = vpop.f32.mrf.mxu0 }
 0x331   :  { %v1800_v29 = vadd.f32 %v1799_v39, %v1624_v5 }
 0x332   :  { %v6098_v48 = vpop.f32.mrf.mxu0 }
 0x338   :  { %v2020_v32 = vpop.f32.mrf.mxu1 }
 0x33a   :  { %v6227_v16 = vpop.f32.mrf.mxu1 }
 0x33d   :  { %v2028_v60 = vpop.f32.mrf.mxu1 }
 0x33f   :  { %v6230_v30 = vpop.f32.mrf.mxu1 }
 0x342   :  { %v1903_v57 = vpop.f32.mrf.mxu0 }
 0x343   :  { %v2036_v7 = vpop.f32.mrf.mxu1 }
 0x344   :  { %v6180_v54 = vpop.f32.mrf.mxu0 }
 0x345   :  { %v6233_v19 = vpop.f32.mrf.mxu1 }
 0x348   :  { %v1910_v11 = vpop.f32.mrf.mxu0 }
 0x349   :  { %v1911_v14 = vadd.f32 %v1910_v11, %v1782_v45  ;;  %v2044_v38 = vpop.f32.mrf.mxu1  ;;  %v1904_v11 = vadd.f32 %v1903_v57, %v1776_v47 }
 0x34a   :  { %v6183_v35 = vpop.f32.mrf.mxu0 }
 0x34b   :  { %v6236_v50 = vpop.f32.mrf.mxu1  ;;  %v2029_v2 = vadd.f32 %v2028_v60, %v1911_v14  ;;  %v2021_v14 = vadd.f32 %v2020_v32, %v1904_v11 }
 0x34e   :  { %v1917_v28 = vpop.f32.mrf.mxu0 }
 0x34f   :  { %v1918_v42 = vadd.f32 %v1917_v28, %v1788_v17  ;;  %v2052_v55 = vpop.f32.mrf.mxu1 }
 0x350   :  { %v6186_v18 = vpop.f32.mrf.mxu0 }
 0x351   :  { %v6239_v5 = vpop.f32.mrf.mxu1  ;;  %v2037_v48 = vadd.f32 %v2036_v7, %v1918_v42  ;;  %v5092_v7 = vld [vmem:[%s10150_s6] ss:$0 sm:$0xff] }
 0x354   :  { %v1924_v39 = vpop.f32.mrf.mxu0 }
 0x355   :  { %v1925_v16 = vadd.f32 %v1924_v39, %v1794_v13 }
 0x356   :  { %v6189_v6 = vpop.f32.mrf.mxu0 }
 0x357   :  { %v2045_v30 = vadd.f32 %v2044_v38, %v1925_v16 }
 0x359   :  { %v1931_v31 = vpop.f32.mrf.mxu0 }
 0x35a   :  { %v1932_v21 = vadd.f32 %v1931_v31, %v1800_v29 }
 0x35b   :  { %v6192_v54 = vpop.f32.mrf.mxu0 }
 0x35c   :  { %v2053_v19 = vadd.f32 %v2052_v55, %v1932_v21 }
 0x362   :  { %v2282_v27 = vpop.f32.mrf.mxu1 }
 0x364   :  { %v6321_v45 = vpop.f32.mrf.mxu1 }
 0x366   :  { %v2288_v35 = vpop.f32.mrf.mxu1 }
 0x368   :  { %v6324_v50 = vpop.f32.mrf.mxu1 }
 0x36a   :  { %v2171_v60 = vpop.f32.mrf.mxu0  ;;  %v2294_v28 = vpop.f32.mrf.mxu1 }
 0x36b   :  { %v2172_v17 = vadd.f32 %v2171_v60, %v2021_v14 }
 0x36c   :  { %v6274_v13 = vpop.f32.mrf.mxu0  ;;  %v6327_v6 = vpop.f32.mrf.mxu1 }
 0x36d   :  { %v2283_v38 = vadd.f32 %v2282_v27, %v2172_v17  ;;  %v5093_v27 = vld [vmem:[%s10151_s7] ss:$0 sm:$0xff] }
 0x36e   :  { %v2177_v42 = vpop.f32.mrf.mxu0  ;;  %v2300_v31 = vpop.f32.mrf.mxu1 }
 0x36f   :  { %v2316_v29 = vadd.f32 %v5092_v7, %v2283_v38  ;;  %v2178_v17 = vadd.f32 %v2177_v42, %v2029_v2 }
 0x370   :  { %v6277_v21 = vpop.f32.mrf.mxu0  ;;  %v6330_v55 = vpop.f32.mrf.mxu1 }
 0x371   :  { %v2317_v18 = vsub.f32 0.0, %v2316_v29 }
 0x372   :  { %v2183_v57 = vpop.f32.mrf.mxu0  ;;  %v2306_v47 = vpop.f32.mrf.mxu1 }
 0x373   :  { %v2318_v5 = vmul.f32 1.442695, %v2317_v18  ;;  %v2184_v7 = vadd.f32 %v2183_v57, %v2037_v48  ;;  %v2289_v18 = vadd.f32 %v2288_v35, %v2178_v17 }
 0x374   :  { %v6280_v32 = vpop.f32.mrf.mxu0  ;;  %v6333_v39 = vpop.f32.mrf.mxu1 }
 0x375   :  { %7217 = vpow2.f32 %v2318_v5  ;;  %v2295_v5 = vadd.f32 %v2294_v28, %v2184_v7 }
 0x376   :  { %v2189_v16 = vpop.f32.mrf.mxu0 }
 0x377   :  { %v2190_v6 = vadd.f32 %v2189_v16, %v2045_v30 }
 0x378   :  { %v6283_v54 = vpop.f32.mrf.mxu0 }
 0x379   :  { %v2301_v39 = vadd.f32 %v2300_v31, %v2190_v6 }
 0x37a   :  { %v2195_v45 = vpop.f32.mrf.mxu0 }
 0x37b   :  { %v2196_v38 = vadd.f32 %v2195_v45, %v2053_v19 }
 0x37c   :  { %v6286_v11 = vpop.f32.mrf.mxu0 }
 0x37d   :  { %v2307_v54 = vadd.f32 %v2306_v47, %v2196_v38 }
 0x382   :  { %v7218_v50 = vpop.eup %7217 }
 0x383   :  { %v2320_v14 = vadd.f32 1.0, %v7218_v50 }
 0x385   :  { %7219 = vrcp.f32 %v2320_v14 }
 0x392   :  { %v7220_v60 = vpop.eup %7219 }
 0x393   :  { %v2330_v13 = vsub.f32 1.0, %v7220_v60  ;;  %v2329_v29 = vmul.f32 %v7220_v60, %v5093_v27 }
 0x395   :  { %v2331_v21 = vmul.f32 %v7220_v60, %v2330_v13  ;;  %v8694_v55 = vand.u32 4294901760, %v2329_v29 }
 0x397   :  { %v2332_v32 = vmul.f32 %v5093_v27, %v2331_v21  ;;  %v8697_v11 = vsub.f32 %v2329_v29, %v8694_v55  ;;  %6414 = vmatmul.mubr.f32.vlgmr.msra.gmra.mxu1 %v8694_v55 }
 0x398   :  { %6476 = vmatpush3.msra.mxu1 %v8451_v15  ;;  %6416 = vmatprep.mubr.msk.f32.mxu1 %vm7253_vm1, %v10276_v58 }
 0x399   :  { %v2333_v2 = vmul.f32 %v2332_v32, %v2289_v18  ;;  %v2334_v48 = vmul.f32 %v2332_v32, %v2295_v5  ;;  %v2335_v30 = vmul.f32 %v2332_v32, %v2301_v39  ;;  %v2336_v19 = vmul.f32 %v2332_v32, %v2307_v54  ;;  %6477 = vmatprep.subr.mxu1 %v10276_v58 }
 0x39a   :  { %6478 = vmatpush3.msra.mxu1 %v8459_v26  ;;  %v2420_v35 = vand.u32 4294901760, %v8697_v11 }
 0x39b   :  { %v8706_v28 = vand.u32 4294901760, %v2333_v2  ;;  %6479 = vmatprep.subr.mxu1 %v10276_v58  ;;  %v8709_v42 = vand.u32 4294901760, %v2334_v48  ;;  %v8733_v14 = vand.u32 4294901760, %v2335_v30  ;;  %v8750_v7 = vand.u32 4294901760, %v2336_v19 }
 0x39c   :  { %6480 = vmatpush3.msra.mxu1 %v8470_v23  ;;  %v2421_v31 = vsub.f32 %v8697_v11, %v2420_v35 }
 0x39d   :  { %v8716_v57 = vsub.f32 %v2333_v2, %v8706_v28  ;;  %6481 = vmatprep.subr.mxu1 %v10276_v58  ;;  %6417 = vmatmul.mubr.f32.gmra.mxu1 %v8706_v28  ;;  %v8725_v45 = vsub.f32 %v2334_v48, %v8709_v42  ;;  %v8745_v17 = vsub.f32 %v2335_v30, %v8733_v14  ;;  %v103_v48 = vld [vmem:[%s10153_s9 + $0x50] sm:$0xff] }
 0x39e   :  { %v2422_v47 = vand.u32 4294901760, %v2421_v31  ;;  %6482 = vmatpush3.msra.mxu1 %v8484_v33  ;;  %6419 = vmatprep.mubr.msk.f32.mxu1 %vm7253_vm1, %v10276_v58  ;;  %v8765_v38 = vsub.f32 %v2336_v19, %v8750_v7  ;;  %v102_v31 = vld [vmem:[%s10153_s9 + $0x48] sm:$0xff] }
 0x39f   :  { %v2430_v16 = vand.u32 4294901760, %v8716_v57  ;;  %6483 = vmatprep.subr.mxu1 %v10276_v58  ;;  %v2440_v60 = vand.u32 4294901760, %v8725_v45  ;;  %v2450_v6 = vand.u32 4294901760, %v8745_v17 }
 0x3a0   :  { %6367 = vmatmul.mubr.f32.vlgmr.msra.gmra.mxu0 %v2422_v47  ;;  %6484 = vmatpush3.msra.mxu1 %v8499_v10  ;;  %v2460_v18 = vand.u32 4294901760, %v8765_v38 }
 0x3a1   :  { %6429 = vmatpush3.msra.mxu0 %v8457_v25  ;;  %v2431_v50 = vsub.f32 %v8716_v57, %v2430_v16  ;;  %6485 = vmatprep.subr.mxu1 %v10276_v58  ;;  %v2441_v13 = vsub.f32 %v8725_v45, %v2440_v60  ;;  %v2451_v21 = vsub.f32 %v8745_v17, %v2450_v6 }
 0x3a2   :  { %6430 = vmatprep.subr.mxu0 %v10276_v58  ;;  %6420 = vmatmul.mubr.f32.gmra.mxu1 %v8709_v42  ;;  %v2461_v32 = vsub.f32 %v8765_v38, %v2460_v18 }
 0x3a3   :  { %6431 = vmatpush3.msra.mxu0 %v8468_v12  ;;  %6486 = vmatpush3.msra.mxu1 %v8509_v53  ;;  %v2432_v27 = vand.u32 4294901760, %v2431_v50  ;;  %v2442_v29 = vand.u32 4294901760, %v2441_v13  ;;  %v2452_v5 = vand.u32 4294901760, %v2451_v21 }
 0x3a4   :  { %6432 = vmatprep.subr.mxu0 %v10276_v58  ;;  %6487 = vmatprep.subr.mxu1 %v10276_v58  ;;  %v2462_v39 = vand.u32 4294901760, %v2461_v32  ;;  %v99_v32 = vld [vmem:[%s10153_s9 + $0x30] sm:$0xff] }
 0x3a5   :  { %6433 = vmatpush3.msra.mxu0 %v8482_v0  ;;  %6488 = vmatpush3.msra.mxu1 %v8525_v62 }
 0x3a6   :  { %6369 = vmatprep.mubr.msk.f32.mxu0 %vm7253_vm1, %v10276_v58  ;;  %6422 = vmatprep.mubr.msk.f32.mxu1 %vm7253_vm1, %v10276_v58 }
 0x3a7   :  { %6434 = vmatprep.subr.mxu0 %v10276_v58  ;;  %6489 = vmatprep.subr.mxu1 %v10276_v58 }
 0x3a8   :  { %6370 = vmatmul.mubr.f32.gmra.mxu0 %v2432_v27  ;;  %6423 = vmatmul.mubr.f32.gmra.mxu1 %v8733_v14 }
 0x3a9   :  { %6435 = vmatpush3.msra.mxu0 %v8496_v63  ;;  %6490 = vmatpush3.msra.mxu1 %v8538_v61 }
 0x3aa   :  { %6436 = vmatprep.subr.mxu0 %v10276_v58  ;;  %6491 = vmatprep.subr.mxu1 %v10276_v58 }
 0x3ab   :  { %6437 = vmatpush3.msra.mxu0 %v8513_v4  ;;  %6492 = vmatpush3.msra.mxu1 %v8556_v44 }
 0x3ac   :  { %6372 = vmatprep.mubr.msk.f32.mxu0 %vm7253_vm1, %v10276_v58  ;;  %6425 = vmatprep.mubr.msk.f32.mxu1 %vm7253_vm1, %v10276_v58 }
 0x3ad   :  { %6438 = vmatprep.subr.mxu0 %v10276_v58  ;;  %6493 = vmatprep.subr.mxu1 %v10276_v58 }
 0x3ae   :  { %6373 = vmatmul.mubr.f32.gmra.mxu0 %v2442_v29  ;;  %6426 = vmatmul.mubr.f32.gmra.mxu1 %v8750_v7 }
 0x3af   :  { %6439 = vmatpush3.msra.mxu0 %v8523_v1  ;;  %6494 = vmatpush3.msra.mxu1 %v8572_v51 }
 0x3b0   :  { %6440 = vmatprep.subr.mxu0 %v10276_v58  ;;  %6495 = vmatprep.subr.mxu1 %v10276_v58 }
 0x3b1   :  { %6441 = vmatpush3.msra.mxu0 %v8536_v20  ;;  %6496 = vmatpush3.msra.mxu1 %v8583_v9 }
 0x3b2   :  { %6375 = vmatprep.mubr.msk.f32.mxu0 %vm7253_vm1, %v10276_v58  ;;  %6442 = vmatprep.subr.mxu0 %v10276_v58 }
 0x3b3   :  { %6497 = vmatprep.subr.mxu1 %v10276_v58  ;;  %6376 = vmatmul.mubr.f32.gmra.mxu0 %v2452_v5 }
 0x3b4   :  { %6498 = vmatpush3.msra.mxu1 %v8600_v56  ;;  %6443 = vmatpush3.msra.mxu0 %v8554_v37 }
 0x3b5   :  { %6499 = vmatprep.subr.mxu1 %v10276_v58  ;;  %6444 = vmatprep.subr.mxu0 %v10276_v58 }
 0x3b6   :  { %6500 = vmatpush3.msra.mxu1 %v8613_v24  ;;  %6445 = vmatpush3.msra.mxu0 %v8569_v36 }
 0x3b7   :  { %6378 = vmatprep.mubr.msk.f32.mxu0 %vm7253_vm1, %v10276_v58  ;;  %6446 = vmatprep.subr.mxu0 %v10276_v58 }
 0x3b8   :  { %6501 = vmatprep.subr.mxu1 %v10276_v58  ;;  %6379 = vmatmul.mubr.f32.gmra.mxu0 %v2462_v39 }
 0x3b9   :  { %6502 = vmatpush3.msra.mxu1 %v8631_v52  ;;  %6447 = vmatpush3.msra.mxu0 %v8587_v40 }
 0x3ba   :  { %6503 = vmatprep.subr.mxu1 %v10276_v58  ;;  %6448 = vmatprep.subr.mxu0 %v10276_v58 }
 0x3bb   :  { %6504 = vmatpush3.msra.mxu1 %v8647_v59  ;;  %6449 = vmatpush3.msra.mxu0 %v8598_v34 }
 0x3bc   :  { %6505 = vmatprep.subr.mxu1 %v10276_v58  ;;  %6450 = vmatprep.subr.mxu0 %v10276_v58 }
 0x3bd   :  { %6506 = vmatpush3.msra.mxu1 %v8658_v3  ;;  %6451 = vmatpush3.msra.mxu0 %v8611_v46 }
 0x3be   :  { %6507 = vmatprep.mubr.msk.f32.mxu1 %vm7253_vm1, %v10276_v58  ;;  %6452 = vmatprep.subr.mxu0 %v10276_v58 }
 0x3bf   :  { %6508 = vmatmul.mubr.f32.vlgmr.msra.gmra.mxu1 %v2420_v35  ;;  %6569 = vmatprep.subr.mxu1 %v10276_v58 }
 0x3c0   :  { %6453 = vmatpush3.msra.mxu0 %v8629_v43  ;;  %6570 = vmatpush3.msra.mxu1 %v8451_v15  ;;  %v10295_v15 = vand.u32 4294901760, %v8457_v25  ;;  %v10297_v25 = vand.u32 4294901760, %v8482_v0  ;;  %v10300_v0 = vand.u32 4294901760, %v8523_v1  ;;  %v10306_v1 = vand.u32 4294901760, %v8611_v46 }
 0x3c1   :  { %6454 = vmatprep.subr.mxu0 %v10276_v58  ;;  %6571 = vmatprep.subr.mxu1 %v10276_v58 }
 0x3c2   :  { %6455 = vmatpush3.msra.mxu0 %v8644_v8  ;;  %6510 = vmatprep.mubr.msk.f32.mxu1 %vm7253_vm1, %v10276_v58 }
 0x3c3   :  { %6572 = vmatpush3.msra.mxu1 %v8459_v26  ;;  %6456 = vmatprep.subr.mxu0 %v10276_v58  ;;  %v10296_v26 = vand.u32 4294901760, %v8468_v12  ;;  %v10298_v12 = vand.u32 4294901760, %v8496_v63  ;;  %v10302_v63 = vand.u32 4294901760, %v8554_v37  ;;  %v10310_v37 = vand.u32 4294901760, %v8670_v41 }
 0x3c4   :  { %6511 = vmatmul.mubr.f32.gmra.mxu1 %v2430_v16  ;;  %6573 = vmatprep.subr.mxu1 %v10276_v58 }
 0x3c5   :  { %6457 = vmatpush3.msra.mxu0 %v8662_v49  ;;  %6574 = vmatpush3.msra.mxu1 %v8470_v23  ;;  %v10299_v23 = vand.u32 4294901760, %v8513_v4  ;;  %v10305_v4 = vand.u32 4294901760, %v8598_v34  ;;  %v106_v34 = vld [vmem:[%s10153_s9 + $0x68] sm:$0xff] }
 0x3c6   :  { %6458 = vmatprep.subr.mxu0 %v10276_v58  ;;  %6575 = vmatprep.subr.mxu1 %v10276_v58 }
 0x3c7   :  { %6459 = vmatpush3.msra.mxu0 %v8670_v41  ;;  %6460 = vmatprep.mubr.msk.f32.mxu0 %vm7253_vm1, %v10276_v58 }
 0x3c8   :  { %6513 = vmatprep.mubr.msk.f32.mxu1 %vm7253_vm1, %v10276_v58  ;;  %6576 = vmatpush3.msra.mxu1 %v8484_v33  ;;  %v10301_v33 = vand.u32 4294901760, %v8536_v20  ;;  %v10308_v20 = vand.u32 4294901760, %v8644_v8 }
 0x3c9   :  { %6461 = vmatmul.mubr.f32.vlgmr.msra.gmra.mxu0 %v8697_v11  ;;  %6514 = vmatmul.mubr.f32.gmra.mxu1 %v2440_v60 }
 0x3ca   :  { %6522 = vmatprep.subr.mxu0 %v10276_v58  ;;  %6577 = vmatprep.subr.mxu1 %v10276_v58 }
 0x3cb   :  { %6523 = vmatpush3.msra.mxu0 %v10295_v15  ;;  %6578 = vmatpush3.msra.mxu1 %v8499_v10  ;;  %v10303_v10 = vand.u32 4294901760, %v8569_v36 }
 0x3cc   :  { %6524 = vmatprep.subr.mxu0 %v10276_v58  ;;  %6579 = vmatprep.subr.mxu1 %v10276_v58 }
 0x3cd   :  { %6463 = vmatprep.mubr.msk.f32.mxu0 %vm7253_vm1, %v10276_v58  ;;  %6516 = vmatprep.mubr.msk.f32.mxu1 %vm7253_vm1, %v10276_v58 }
 0x3ce   :  { %6525 = vmatpush3.msra.mxu0 %v10296_v26  ;;  %6580 = vmatpush3.msra.mxu1 %v8509_v53  ;;  %v10304_v53 = vand.u32 4294901760, %v8587_v40 }
 0x3cf   :  { %6464 = vmatmul.mubr.f32.gmra.mxu0 %v8716_v57  ;;  %6517 = vmatmul.mubr.f32.gmra.mxu1 %v2450_v6  ;;  %v100_v6 = vld [vmem:[%s10153_s9 + $0x38] sm:$0xff] }
 0x3d0   :  { %6526 = vmatprep.subr.mxu0 %v10276_v58  ;;  %6581 = vmatprep.subr.mxu1 %v10276_v58 }
 0x3d1   :  { %6527 = vmatpush3.msra.mxu0 %v10297_v25  ;;  %6582 = vmatpush3.msra.mxu1 %v8525_v62  ;;  %v10307_v62 = vand.u32 4294901760, %v8629_v43  ;;  %v105_v43 = vld [vmem:[%s10153_s9 + $0x60] sm:$0xff] }
 0x3d2   :  { %6528 = vmatprep.subr.mxu0 %v10276_v58  ;;  %6583 = vmatprep.subr.mxu1 %v10276_v58 }
 0x3d3   :  { %6466 = vmatprep.mubr.msk.f32.mxu0 %vm7253_vm1, %v10276_v58  ;;  %6519 = vmatprep.mubr.msk.f32.mxu1 %vm7253_vm1, %v10276_v58 }
 0x3d4   :  { %6529 = vmatpush3.msra.mxu0 %v10298_v12  ;;  %6584 = vmatpush3.msra.mxu1 %v8538_v61  ;;  %v10309_v61 = vand.u32 4294901760, %v8662_v49  ;;  %v104_v49 = vld [vmem:[%s10153_s9 + $0x58] sm:$0xff]  ;;  %v9097_v12 = vand.u32 4294901760, %v99_v32 }
 0x3d5   :  { %6467 = vmatmul.mubr.f32.gmra.mxu0 %v8725_v45  ;;  %6520 = vmatmul.mubr.f32.gmra.mxu1 %v2460_v18  ;;  %v9024_v2 = vand.u32 4294901760, %v104_v49  ;;  %v9050_v45 = vand.u32 4294901760, %v102_v31  ;;  %v9081_v18 = vand.u32 4294901760, %v100_v6 }
 0x3d6   :  { %6530 = vmatprep.subr.mxu0 %v10276_v58  ;;  %6585 = vmatprep.subr.mxu1 %v10276_v58 }
 0x3d7   :  { %6531 = vmatpush3.msra.mxu0 %v10299_v23  ;;  %6586 = vmatpush3.msra.mxu1 %v8556_v44  ;;  %v108_v44 = vld [vmem:[%s10153_s9 + $0x78] sm:$0xff]  ;;  %v9094_v25 = vsub.f32 %v100_v6, %v9081_v18  ;;  %v98_v23 = vld [vmem:[%s10153_s9 + $0x28] sm:$0xff] }
 0x3d8   :  { %6532 = vmatprep.subr.mxu0 %v10276_v58  ;;  %6587 = vmatprep.subr.mxu1 %v10276_v58  ;;  %v8976_v36 = vand.u32 4294901760, %v108_v44 }
 0x3d9   :  { %6469 = vmatprep.mubr.msk.f32.mxu0 %vm7253_vm1, %v10276_v58  ;;  %6533 = vmatpush3.msra.mxu0 %v10300_v0 }
 0x3da   :  { %6588 = vmatpush3.msra.mxu1 %v8572_v51  ;;  %6470 = vmatmul.mubr.f32.gmra.mxu0 %v8745_v17  ;;  %v107_v51 = vld [vmem:[%s10153_s9 + $0x70] sm:$0xff]  ;;  %v9061_v17 = vsub.f32 %v102_v31, %v9050_v45 }
 0x3db   :  { %6534 = vmatprep.subr.mxu0 %v10276_v58  ;;  %6589 = vmatprep.subr.mxu1 %v10276_v58  ;;  %v8984_v40 = vand.u32 4294901760, %v107_v51 }
 0x3dc   :  { %6535 = vmatpush3.msra.mxu0 %v10301_v33  ;;  %6590 = vmatpush3.msra.mxu1 %v8583_v9  ;;  %v8982_v9 = vsub.f32 %v108_v44, %v8976_v36  ;;  %v10219_v29 = vand.u32 4294901760, %v9061_v17  ;;  %v96_v44 = vld [vmem:[%s10153_s9 + $0x18] sm:$0xff] }
 0x3dd   :  { %6536 = vmatprep.subr.mxu0 %v10276_v58  ;;  %6591 = vmatprep.subr.mxu1 %v10276_v58  ;;  %v8993_v46 = vsub.f32 %v107_v51, %v8984_v40 }
 0x3de   :  { %6472 = vmatprep.mubr.msk.f32.mxu0 %vm7253_vm1, %v10276_v58  ;;  %6537 = vmatpush3.msra.mxu0 %v10302_v63  ;;  %v3343_v15 = vsub.f32 %v9061_v17, %v10219_v29  ;;  %v10217_v63 = vand.u32 4294901760, %v9094_v25 }
 0x3df   :  { %6592 = vmatpush3.msra.mxu1 %v8600_v56  ;;  %6473 = vmatmul.mubr.f32.gmra.mxu0 %v8765_v38  ;;  %v10225_v56 = vand.u32 4294901760, %v8982_v9  ;;  %v10224_v8 = vand.u32 4294901760, %v8993_v46 }
 0x3e0   :  { %6538 = vmatprep.subr.mxu0 %v10276_v58  ;;  %6593 = vmatprep.subr.mxu1 %v10276_v58  ;;  %v3344_v0 = vand.u32 4294901760, %v3343_v15 }
 0x3e1   :  { %6539 = vmatpush3.msra.mxu0 %v10303_v10  ;;  %6594 = vmatpush3.msra.mxu1 %v8613_v24  ;;  %v8995_v24 = vand.u32 4294901760, %v106_v34  ;;  %v9108_v10 = vand.u32 4294901760, %v98_v23 }
 0x3e2   :  { %6540 = vmatprep.subr.mxu0 %v10276_v58  ;;  %6595 = vmatprep.subr.mxu1 %v10276_v58 }
 0x3e3   :  { %6541 = vmatpush3.msra.mxu0 %v10304_v53  ;;  %6596 = vmatpush3.msra.mxu1 %v8631_v52  ;;  %v3301_v52 = vsub.f32 %v8982_v9, %v10225_v56  ;;  %v9112_v53 = vsub.f32 %v99_v32, %v9097_v12 }
 0x3e4   :  { %6542 = vmatprep.subr.mxu0 %v10276_v58  ;;  %6597 = vmatprep.subr.mxu1 %v10276_v58 }
 0x3e5   :  { %6543 = vmatpush3.msra.mxu0 %v10305_v4  ;;  %6598 = vmatpush3.msra.mxu1 %v8647_v59  ;;  %v9007_v59 = vsub.f32 %v106_v34, %v8995_v24  ;;  %v3302_v41 = vand.u32 4294901760, %v3301_v52  ;;  %v97_v4 = vld [vmem:[%s10153_s9 + $0x20] sm:$0xff]  ;;  %v9138_v52 = vand.u32 4294901760, %v96_v44 }
 0x3e6   :  { %6544 = vmatprep.subr.mxu0 %v10276_v58  ;;  %6599 = vmatprep.subr.mxu1 %v10276_v58 }
 0x3e7   :  { %6545 = vmatpush3.msra.mxu0 %v10306_v1  ;;  %6600 = vmatpush3.msra.mxu1 %v8658_v3  ;;  %v9009_v3 = vand.u32 4294901760, %v105_v43  ;;  %v10223_v54 = vand.u32 4294901760, %v9007_v59 }
 0x3e8   :  { %6601 = vmatprep.mubr.msk.f32.mxu1 %vm7253_vm1, %v10276_v58  ;;  %6546 = vmatprep.subr.mxu0 %v10276_v58 }
 0x3e9   :  { %6602 = vmatmul.mubr.f32.vlgmr.msra.gmra.mxu1 %v8694_v55  ;;  %6547 = vmatpush3.msra.mxu0 %v10307_v62  ;;  %v9021_v11 = vsub.f32 %v105_v43, %v9009_v3  ;;  %v3315_v19 = vsub.f32 %v9007_v59, %v10223_v54  ;;  %v3357_v62 = vsub.f32 %v9094_v25, %v10217_v63 }
 0x3ea   :  { %6604 = vmatprep.mubr.msk.f32.mxu1 %vm7253_vm1, %v10276_v58  ;;  %6548 = vmatprep.subr.mxu0 %v10276_v58 }
 0x3eb   :  { %6554 = vmatprep.mubr.msk.f32.mxu0 %vm7253_vm1, %v10276_v58  ;;  %6549 = vmatpush3.msra.mxu0 %v10308_v20  ;;  %v10222_v35 = vand.u32 4294901760, %v9021_v11  ;;  %v3316_v57 = vand.u32 4294901760, %v3315_v19  ;;  %v9123_v20 = vsub.f32 %v98_v23, %v9108_v10  ;;  %v3358_v51 = vand.u32 4294901760, %v3357_v62 }
 0x3ec   :  { %6663 = vmatprep.subr.mxu1 %v10276_v58  ;;  %6550 = vmatprep.subr.mxu0 %v10276_v58 }
 0x3ed   :  { %6605 = vmatmul.mubr.f32.gmra.mxu1 %v8706_v28  ;;  %6551 = vmatpush3.msra.mxu0 %v10309_v61  ;;  %v3322_v47 = vsub.f32 %v9021_v11, %v10222_v35  ;;  %v9125_v61 = vand.u32 4294901760, %v97_v4  ;;  %v10215_v34 = vand.u32 4294901760, %v9123_v20 }
 0x3ee   :  { %6607 = vmatprep.mubr.msk.f32.mxu1 %vm7253_vm1, %v10276_v58  ;;  %6552 = vmatprep.subr.mxu0 %v10276_v58 }
 0x3ef   :  { %6553 = vmatpush3.msra.mxu0 %v10310_v37  ;;  %6664 = vmatpush3.msra.mxu1 %v3302_v41  ;;  %v3323_v27 = vand.u32 4294901760, %v3322_v47  ;;  %v10216_v37 = vand.u32 4294901760, %v9112_v53  ;;  %v9136_v43 = vsub.f32 %v97_v4, %v9125_v61  ;;  %v95_v41 = vld [vmem:[%s10153_s9 + $0x10] sm:$0xff] }
 0x3f0   :  { %6555 = vmatmul.mubr.f32.vlgmr.msra.gmra.mxu0 %v8694_v55  ;;  %6616 = vmatprep.subr.mxu0 %v10276_v58  ;;  %v3308_v55 = vsub.f32 %v8993_v46, %v10224_v8  ;;  %v9156_v19 = vand.u32 4294901760, %v95_v41 }
 0x3f1   :  { %6608 = vmatmul.mubr.f32.gmra.mxu1 %v8709_v42  ;;  %6557 = vmatprep.mubr.msk.f32.mxu0 %vm7253_vm1, %v10276_v58 }
 0x3f2   :  { %6610 = vmatprep.mubr.msk.f32.mxu1 %vm7253_vm1, %v10276_v58  ;;  %6617 = vmatpush3.msra.mxu0 %v8976_v36  ;;  %v3309_v30 = vand.u32 4294901760, %v3308_v55  ;;  %v3371_v55 = vsub.f32 %v9123_v20, %v10215_v34 }
 0x3f3   :  { %6618 = vmatprep.subr.mxu0 %v10276_v58  ;;  %6665 = vmatprep.subr.mxu1 %v10276_v58 }
 0x3f4   :  { %6558 = vmatmul.mubr.f32.gmra.mxu0 %v8706_v28  ;;  %v9034_v28 = vand.u32 4294901760, %v103_v48  ;;  %6666 = vmatpush3.msra.mxu1 %v3309_v30  ;;  %v9154_v30 = vsub.f32 %v96_v44, %v9138_v52  ;;  %v3372_v47 = vand.u32 4294901760, %v3371_v55 }
 0x3f5   :  { %6611 = vmatmul.mubr.f32.gmra.mxu1 %v8733_v14  ;;  %6560 = vmatprep.mubr.msk.f32.mxu0 %vm7253_vm1, %v10276_v58 }
 0x3f6   :  { %6613 = vmatprep.mubr.msk.f32.mxu1 %vm7253_vm1, %v10276_v58  ;;  %6619 = vmatpush3.msra.mxu0 %v8984_v40  ;;  %v9048_v16 = vsub.f32 %v103_v48, %v9034_v28  ;;  %v10214_v48 = vand.u32 4294901760, %v9136_v43  ;;  %10311 = vst [vmem:[#allocation14_spill] sm:$0xff] %v9154_v30 }
 0x3f7   :  { %6620 = vmatprep.subr.mxu0 %v10276_v58  ;;  %6667 = vmatprep.subr.mxu1 %v10276_v58 }
 0x3f8   :  { %6561 = vmatmul.mubr.f32.gmra.mxu0 %v8709_v42  ;;  %v9038_v42 = vsub.f32 %v104_v49, %v9024_v2  ;;  %6668 = vmatpush3.msra.mxu1 %v3316_v57  ;;  %v10220_v60 = vand.u32 4294901760, %v9048_v16  ;;  %v3364_v49 = vsub.f32 %v9112_v53, %v10216_v37  ;;  %v94_v57 = vld [vmem:[%s10153_s9 + $0x8] sm:$0xff] }
 0x3f9   :  { %6614 = vmatmul.mubr.f32.gmra.mxu1 %v8750_v7  ;;  %6563 = vmatprep.mubr.msk.f32.mxu0 %vm7253_vm1, %v10276_v58  ;;  %v9172_v6 = vand.u32 4294901760, %v94_v57 }
 0x3fa   :  { %6695 = vmatprep.mubr.msk.f32.mxu1 %vm7253_vm1, %v10276_v58  ;;  %6621 = vmatpush3.msra.mxu0 %v8995_v24  ;;  %v10221_v50 = vand.u32 4294901760, %v9038_v42  ;;  %v3336_v38 = vsub.f32 %v9048_v16, %v10220_v60  ;;  %v3365_v31 = vand.u32 4294901760, %v3364_v49 }
 0x3fb   :  { %6622 = vmatprep.subr.mxu0 %v10276_v58  ;;  %6669 = vmatprep.subr.mxu1 %v10276_v58  ;;  %v9187_v23 = vsub.f32 %v94_v57, %v9172_v6 }
 0x3fc   :  { %6564 = vmatmul.mubr.f32.gmra.mxu0 %v8733_v14  ;;  %v101_v14 = vld [vmem:[%s10153_s9 + $0x40] sm:$0xff]  ;;  %v3329_v13 = vsub.f32 %v9038_v42, %v10221_v50  ;;  %6670 = vmatpush3.msra.mxu1 %v3323_v27  ;;  %v3337_v39 = vand.u32 4294901760, %v3336_v38  ;;  %v10213_v27 = vand.u32 4294901760, %v9154_v30 }
 0x3fd   :  { %6566 = vmatprep.mubr.msk.f32.mxu0 %vm7253_vm1, %v10276_v58  ;;  %6623 = vmatpush3.msra.mxu0 %v9009_v3  ;;  %v93_v38 = vld [vmem:[%s10153_s9] sm:$0xff]  ;;  %10313 = vst [vmem:[#allocation16_spill] sm:$0xff] %v9187_v23 }
 0x3fe   :  { %6624 = vmatprep.subr.mxu0 %v10276_v58  ;;  %6671 = vmatprep.subr.mxu1 %v10276_v58  ;;  %v3330_v5 = vand.u32 4294901760, %v3329_v13  ;;  %v9169_v13 = vsub.f32 %v95_v41, %v9156_v19  ;;  %v3385_v32 = vsub.f32 %v9154_v30, %v10213_v27  ;;  %v9183_v15 = vand.u32 4294901760, %v93_v38 }
 0x3ff   :  { %6625 = vmatpush3.msra.mxu0 %v9024_v2 }
 0x400   :  { %6567 = vmatmul.mubr.f32.gmra.mxu0 %v8750_v7  ;;  %6626 = vmatprep.subr.mxu0 %v10276_v58  ;;  %v9063_v7 = vand.u32 4294901760, %v101_v14  ;;  %10312 = vst [vmem:[#allocation15_spill] sm:$0xff] %v9169_v13  ;;  %v9195_v4 = vsub.f32 %v93_v38, %v9183_v15 }
 0x401   :  { %6648 = vmatprep.mubr.msk.f32.mxu0 %vm7253_vm1, %v10276_v58  ;;  %6627 = vmatpush3.msra.mxu0 %v9034_v28 }
 0x402   :  { %6628 = vmatprep.subr.mxu0 %v10276_v58  ;;  %v9079_v21 = vsub.f32 %v101_v14, %v9063_v7  ;;  %6672 = vmatpush3.msra.mxu1 %v3330_v5  ;;  %v3378_v14 = vsub.f32 %v9136_v43, %v10214_v48  ;;  %10314 = vst [vmem:[#allocation17_spill] sm:$0xff] %v9195_v4  ;;  %v10210_v44 = vand.u32 4294901760, %v9195_v4 }
 0x403   :  { %6629 = vmatpush3.msra.mxu0 %v9050_v45  ;;  %6673 = vmatprep.subr.mxu1 %v10276_v58 }
 0x404   :  { %6630 = vmatprep.subr.mxu0 %v10276_v58  ;;  %v10218_v26 = vand.u32 4294901760, %v9079_v21  ;;  %6674 = vmatpush3.msra.mxu1 %v3337_v39  ;;  %v3379_v5 = vand.u32 4294901760, %v3378_v14  ;;  %v10212_v39 = vand.u32 4294901760, %v9169_v13  ;;  %v3406_v49 = vsub.f32 %v9195_v4, %v10210_v44 }
 0x405   :  { %6631 = vmatpush3.msra.mxu0 %v9063_v7  ;;  %6675 = vmatprep.subr.mxu1 %v10276_v58 }
 0x406   :  { %6632 = vmatprep.subr.mxu0 %v10276_v58  ;;  %v3350_v33 = vsub.f32 %v9079_v21, %v10218_v26  ;;  %6676 = vmatpush3.msra.mxu1 %v3344_v0  ;;  %v3386_v0 = vand.u32 4294901760, %v3385_v32  ;;  %v3407_v55 = vand.u32 4294901760, %v3406_v49 }
 0x407   :  { %6633 = vmatpush3.msra.mxu0 %v9081_v18  ;;  %6677 = vmatprep.subr.mxu1 %v10276_v58 }
 0x408   :  { %6634 = vmatprep.subr.mxu0 %v10276_v58  ;;  %v3351_v1 = vand.u32 4294901760, %v3350_v33  ;;  %v3392_v33 = vsub.f32 %v9169_v13, %v10212_v39 }
 0x409   :  { %6635 = vmatpush3.msra.mxu0 %v9097_v12 }
 0x40a   :  { %6636 = vmatprep.subr.mxu0 %v10276_v58  ;;  %6678 = vmatpush3.msra.mxu1 %v3351_v1  ;;  %v10211_v1 = vand.u32 4294901760, %v9187_v23  ;;  %v3393_v62 = vand.u32 4294901760, %v3392_v33 }
 0x40b   :  { %6637 = vmatpush3.msra.mxu0 %v9108_v10  ;;  %6679 = vmatprep.subr.mxu1 %v10276_v58 }
 0x40c   :  { %6638 = vmatprep.subr.mxu0 %v10276_v58  ;;  %6680 = vmatpush3.msra.mxu1 %v3358_v51  ;;  %v3399_v51 = vsub.f32 %v9187_v23, %v10211_v1 }
 0x40d   :  { %6639 = vmatpush3.msra.mxu0 %v9125_v61  ;;  %6681 = vmatprep.subr.mxu1 %v10276_v58 }
 0x40e   :  { %6640 = vmatprep.subr.mxu0 %v10276_v58  ;;  %6682 = vmatpush3.msra.mxu1 %v3365_v31  ;;  %v3400_v41 = vand.u32 4294901760, %v3399_v51 }
 0x40f   :  { %6641 = vmatpush3.msra.mxu0 %v9138_v52  ;;  %6683 = vmatprep.subr.mxu1 %v10276_v58 }
 0x410   :  { %6642 = vmatprep.subr.mxu0 %v10276_v58  ;;  %6684 = vmatpush3.msra.mxu1 %v3372_v47 }
 0x411   :  { %6643 = vmatpush3.msra.mxu0 %v9156_v19  ;;  %6685 = vmatprep.subr.mxu1 %v10276_v58 }
 0x412   :  { %6644 = vmatprep.subr.mxu0 %v10276_v58  ;;  %6686 = vmatpush3.msra.mxu1 %v3379_v5 }
 0x413   :  { %6645 = vmatpush3.msra.mxu0 %v9172_v6  ;;  %6687 = vmatprep.subr.mxu1 %v10276_v58 }
 0x414   :  { %6646 = vmatprep.subr.mxu0 %v10276_v58  ;;  %6688 = vmatpush3.msra.mxu1 %v3386_v0 }
 0x415   :  { %6647 = vmatpush3.msra.mxu0 %v9183_v15  ;;  %6689 = vmatprep.subr.mxu1 %v10276_v58 }
 0x416   :  { %6710 = vmatprep.subr.mxu0 %v10276_v58  ;;  %6690 = vmatpush3.msra.mxu1 %v3393_v62 }
 0x417   :  { %6691 = vmatprep.subr.mxu1 %v10276_v58 }
 0x418   :  { %6692 = vmatpush3.msra.mxu1 %v3400_v41 }
 0x419   :  { %6693 = vmatprep.subr.mxu1 %v10276_v58 }
 0x41a   :  { %6694 = vmatpush3.msra.mxu1 %v3407_v55 }
 0x41b   :  { %6757 = vmatprep.subr.mxu1 %v10276_v58 }
 0x457   :  { %v2615_v31 = vpop.f32.mrf.mxu1 }
 0x459   :  { %v6415_v57 = vpop.f32.mrf.mxu1 }
 0x45d   :  { %v2621_v47 = vpop.f32.mrf.mxu1 }
 0x45f   :  { %v6418_v38 = vpop.f32.mrf.mxu1 }
 0x460   :  { %v2424_v14 = vpop.f32.mrf.mxu0 }
 0x461   :  { %v2616_v5 = vadd.f32 %v2615_v31, %v2424_v14 }
 0x462   :  { %v6368_v32 = vpop.f32.mrf.mxu0  ;;  %v2627_v0 = vpop.f32.mrf.mxu1 }
 0x464   :  { %v6421_v33 = vpop.f32.mrf.mxu1 }
 0x468   :  { %v2434_v62 = vpop.f32.mrf.mxu0  ;;  %v2633_v44 = vpop.f32.mrf.mxu1 }
 0x469   :  { %v2622_v51 = vadd.f32 %v2621_v47, %v2434_v62 }
 0x46a   :  { %v6371_v1 = vpop.f32.mrf.mxu0  ;;  %v6424_v49 = vpop.f32.mrf.mxu1 }
 0x46e   :  { %v2444_v41 = vpop.f32.mrf.mxu0  ;;  %v2639_v27 = vpop.f32.mrf.mxu1 }
 0x46f   :  { %v2628_v39 = vadd.f32 %v2627_v0, %v2444_v41 }
 0x470   :  { %v6374_v55 = vpop.f32.mrf.mxu0  ;;  %v6427_v48 = vpop.f32.mrf.mxu1 }
 0x473   :  { %v2454_v34 = vpop.f32.mrf.mxu0 }
 0x474   :  { %v2634_v37 = vadd.f32 %v2633_v44, %v2454_v34 }
 0x475   :  { %v6377_v57 = vpop.f32.mrf.mxu0 }
 0x478   :  { %v2464_v63 = vpop.f32.mrf.mxu0 }
 0x479   :  { %v2640_v26 = vadd.f32 %v2639_v27, %v2464_v63 }
 0x47a   :  { %v6380_v38 = vpop.f32.mrf.mxu0 }
 0x47f   :  { %v2860_v31 = vpop.f32.mrf.mxu1 }
 0x481   :  { %v6509_v14 = vpop.f32.mrf.mxu1 }
 0x484   :  { %v2868_v32 = vpop.f32.mrf.mxu1 }
 0x486   :  { %v6512_v33 = vpop.f32.mrf.mxu1 }
 0x489   :  { %v2743_v29 = vpop.f32.mrf.mxu0  ;;  %v2876_v47 = vpop.f32.mrf.mxu1 }
 0x48a   :  { %v2744_v35 = vadd.f32 %v2743_v29, %v2616_v5 }
 0x48b   :  { %v6462_v62 = vpop.f32.mrf.mxu0  ;;  %v6515_v1 = vpop.f32.mrf.mxu1 }
 0x48c   :  { %v2861_v62 = vadd.f32 %v2860_v31, %v2744_v35  ;;  %v3151_v1 = vsub.f32 1.0, %v8150_v22 }
 0x48f   :  { %v2750_v49 = vpop.f32.mrf.mxu0  ;;  %v2884_v60 = vpop.f32.mrf.mxu1 }
 0x490   :  { %v2751_v8 = vadd.f32 %v2750_v49, %v2622_v51 }
 0x491   :  { %v6465_v0 = vpop.f32.mrf.mxu0  ;;  %v6518_v41 = vpop.f32.mrf.mxu1 }
 0x492   :  { %v2869_v13 = vadd.f32 %v2868_v32, %v2751_v8  ;;  %v10315_v8 = vld [vmem:[#allocation10_spill] sm:$0xff] }
 0x495   :  { %v2757_v55 = vpop.f32.mrf.mxu0  ;;  %v2892_v48 = vpop.f32.mrf.mxu1 }
 0x497   :  { %v6468_v50 = vpop.f32.mrf.mxu0  ;;  %v6521_v34 = vpop.f32.mrf.mxu1 }
 0x498   :  { %v2758_v50 = vadd.f32 %v2757_v55, %v2628_v39 }
 0x49a   :  { %v2764_v44 = vpop.f32.mrf.mxu0 }
 0x49b   :  { %v2765_v31 = vadd.f32 %v2764_v44, %v2634_v37 }
 0x49c   :  { %v6471_v57 = vpop.f32.mrf.mxu0 }
 0x49d   :  { %v3152_v57 = vmul.f32 %v8150_v22, %v3151_v1  ;;  %v2885_v1 = vadd.f32 %v2884_v60, %v2765_v31  ;;  %v10317_v31 = vld [vmem:[#allocation12_spill] sm:$0xff] }
 0x49f   :  { %v2771_v63 = vpop.f32.mrf.mxu0 }
 0x4a1   :  { %v6474_v27 = vpop.f32.mrf.mxu0 }
 0x4a9   :  { %v3122_v38 = vpop.f32.mrf.mxu1 }
 0x4ab   :  { %v6603_v14 = vpop.f32.mrf.mxu1 }
 0x4ad   :  { %v3128_v33 = vpop.f32.mrf.mxu1 }
 0x4af   :  { %v6606_v54 = vpop.f32.mrf.mxu1 }
 0x4b0   :  { %v3011_v56 = vpop.f32.mrf.mxu0 }
 0x4b1   :  { %v3134_v0 = vpop.f32.mrf.mxu1  ;;  %v3012_v41 = vadd.f32 %v3011_v56, %v2861_v62 }
 0x4b2   :  { %v6556_v4 = vpop.f32.mrf.mxu0 }
 0x4b3   :  { %v6609_v23 = vpop.f32.mrf.mxu1  ;;  %v3123_v34 = vadd.f32 %v3122_v38, %v3012_v41  ;;  %v2877_v4 = vadd.f32 %v2876_v47, %v2758_v50  ;;  %v10316_v41 = vld [vmem:[#allocation11_spill] sm:$0xff] }
 0x4b4   :  { %v3017_v27 = vpop.f32.mrf.mxu0 }
 0x4b5   :  { %v3140_v30 = vpop.f32.mrf.mxu1  ;;  %v3150_v29 = vmul.f32 %v8150_v22, %v3123_v34  ;;  %v9216_v5 = vmul.f32 %v3152_v57, %v3123_v34  ;;  %v3018_v54 = vadd.f32 %v3017_v27, %v2869_v13  ;;  %v2772_v13 = vadd.f32 %v2771_v63, %v2640_v26 }
 0x4b6   :  { %v6559_v35 = vpop.f32.mrf.mxu0 }
 0x4b7   :  { %v6612_v51 = vpop.f32.mrf.mxu1  ;;  %v9218_v49 = vand.u32 4294901760, %v3150_v29  ;;  %v3129_v56 = vadd.f32 %v3128_v33, %v3018_v54  ;;  %v3154_v32 = vmul.f32 %v9216_v5, %v10315_v8  ;;  %v3155_v50 = vmul.f32 %v9216_v5, %v10316_v41 }
 0x4b8   :  { %v3023_v23 = vpop.f32.mrf.mxu0 }
 0x4b9   :  { %v3146_v39 = vpop.f32.mrf.mxu1  ;;  %v9221_v55 = vsub.f32 %v3150_v29, %v9218_v49  ;;  %v3158_v38 = vmul.f32 %v8150_v22, %v3129_v56  ;;  %v3024_v14 = vadd.f32 %v3023_v23, %v2877_v4  ;;  %6696 = vmatmul.mubr.f32.vlgmr.msra.gmra.mxu1 %v9218_v49  ;;  %v3156_v56 = vmul.f32 %v9216_v5, %v10317_v31  ;;  %v10319_v31 = vld [vmem:[#allocation14_spill] sm:$0xff] }
 0x4ba   :  { %6758 = vmatpush3.msra.mxu1 %v8976_v36  ;;  %v6562_v37 = vpop.f32.mrf.mxu0  ;;  %6698 = vmatprep.mubr.msk.f32.mxu1 %vm7253_vm1, %v10276_v58 }
 0x4bb   :  { %v6615_v44 = vpop.f32.mrf.mxu1  ;;  %v3249_v47 = vand.u32 4294901760, %v9221_v55  ;;  %v3162_v33 = vadd.f32 %v3158_v38, %v3154_v32  ;;  %v3135_v62 = vadd.f32 %v3134_v0, %v3024_v14  ;;  %6759 = vmatprep.subr.mxu1 %v10276_v58  ;;  %v2893_v0 = vadd.f32 %v2892_v48, %v2772_v13 }
 0x4bc   :  { %6760 = vmatpush3.msra.mxu1 %v8984_v40  ;;  %v3029_v26 = vpop.f32.mrf.mxu0  ;;  %v10318_v44 = vld [vmem:[#allocation13_spill] sm:$0xff] }
 0x4bd   :  { %v3250_v63 = vsub.f32 %v9221_v55, %v3249_v47  ;;  %v3159_v34 = vmul.f32 %v8150_v22, %v3135_v62  ;;  %v3030_v57 = vadd.f32 %v3029_v26, %v2885_v1  ;;  %6761 = vmatprep.subr.mxu1 %v10276_v58  ;;  %v9240_v27 = vand.u32 4294901760, %v3162_v33 }
 0x4be   :  { %6762 = vmatpush3.msra.mxu1 %v8995_v24  ;;  %v6565_v60 = vpop.f32.mrf.mxu0 }
 0x4bf   :  { %v3251_v29 = vand.u32 4294901760, %v3250_v63  ;;  %v3163_v54 = vadd.f32 %v3159_v34, %v3155_v50  ;;  %v3141_v35 = vadd.f32 %v3140_v30, %v3030_v57  ;;  %6763 = vmatprep.subr.mxu1 %v10276_v58  ;;  %6699 = vmatmul.mubr.f32.gmra.mxu1 %v9240_v27  ;;  %v9246_v51 = vsub.f32 %v3162_v33, %v9240_v27 }
 0x4c0   :  { %6764 = vmatpush3.msra.mxu1 %v9009_v3  ;;  %v3035_v4 = vpop.f32.mrf.mxu0  ;;  %6701 = vmatprep.mubr.msk.f32.mxu1 %vm7253_vm1, %v10276_v58  ;;  %v3157_v33 = vmul.f32 %v9216_v5, %v10318_v44 }
 0x4c1   :  { %v3160_v48 = vmul.f32 %v8150_v22, %v3141_v35  ;;  %v3036_v23 = vadd.f32 %v3035_v4, %v2893_v0  ;;  %6765 = vmatprep.subr.mxu1 %v10276_v58  ;;  %6649 = vmatmul.mubr.f32.vlgmr.msra.gmra.mxu0 %v3251_v29  ;;  %v9255_v30 = vand.u32 4294901760, %v3163_v54  ;;  %v3259_v8 = vand.u32 4294901760, %v9246_v51 }
 0x4c2   :  { %6711 = vmatpush3.msra.mxu0 %v8982_v9  ;;  %6766 = vmatpush3.msra.mxu1 %v9024_v2  ;;  %v6568_v32 = vpop.f32.mrf.mxu0 }
 0x4c3   :  { %v3164_v38 = vadd.f32 %v3160_v48, %v3156_v56  ;;  %v3147_v14 = vadd.f32 %v3146_v39, %v3036_v23  ;;  %6712 = vmatprep.subr.mxu0 %v10276_v58  ;;  %6767 = vmatprep.subr.mxu1 %v10276_v58  ;;  %v3260_v13 = vsub.f32 %v9246_v51, %v3259_v8  ;;  %v10320_v56 = vld [vmem:[#allocation15_spill] sm:$0xff]  ;;  %v87_v32 = vld [vmem:[%s10152_s8 + $0x50] sm:$0xff] }
 0x4c4   :  { %6702 = vmatmul.mubr.f32.gmra.mxu1 %v9255_v30  ;;  %6713 = vmatpush3.msra.mxu0 %v8993_v46  ;;  %v9268_v37 = vsub.f32 %v3163_v54, %v9255_v30 }
 0x4c5   :  { %v3161_v39 = vmul.f32 %v8150_v22, %v3147_v14  ;;  %6768 = vmatpush3.msra.mxu1 %v9034_v28  ;;  %6714 = vmatprep.subr.mxu0 %v10276_v58  ;;  %v3261_v62 = vand.u32 4294901760, %v3260_v13  ;;  %v9275_v1 = vand.u32 4294901760, %v3164_v38 }
 0x4c6   :  { %6769 = vmatprep.subr.mxu1 %v10276_v58  ;;  %6715 = vmatpush3.msra.mxu0 %v9007_v59  ;;  %v3269_v41 = vand.u32 4294901760, %v9268_v37 }
 0x4c7   :  { %v3165_v50 = vadd.f32 %v3161_v39, %v3157_v33  ;;  %6770 = vmatpush3.msra.mxu1 %v9050_v45  ;;  %6651 = vmatprep.mubr.msk.f32.mxu0 %vm7253_vm1, %v10276_v58  ;;  %v9284_v22 = vsub.f32 %v3164_v38, %v9275_v1  ;;  %v86_v33 = vld [vmem:[%s10152_s8 + $0x48] sm:$0xff] }
 0x4c8   :  { %6704 = vmatprep.mubr.msk.f32.mxu1 %vm7253_vm1, %v10276_v58  ;;  %6716 = vmatprep.subr.mxu0 %v10276_v58  ;;  %v3270_v5 = vsub.f32 %v9268_v37, %v3269_v41 }
 0x4c9   :  { %6771 = vmatprep.subr.mxu1 %v10276_v58  ;;  %6652 = vmatmul.mubr.f32.gmra.mxu0 %v3261_v62  ;;  %v9293_v26 = vand.u32 4294901760, %v3165_v50  ;;  %v3279_v63 = vand.u32 4294901760, %v9284_v22 }
 0x4ca   :  { %6705 = vmatmul.mubr.f32.gmra.mxu1 %v9275_v1  ;;  %6717 = vmatpush3.msra.mxu0 %v9021_v11  ;;  %v3271_v34 = vand.u32 4294901760, %v3270_v5 }
 0x4cb   :  { %6772 = vmatpush3.msra.mxu1 %v9063_v7  ;;  %6718 = vmatprep.subr.mxu0 %v10276_v58  ;;  %v9301_v57 = vsub.f32 %v3165_v50, %v9293_v26  ;;  %v3280_v60 = vsub.f32 %v9284_v22, %v3279_v63 }
 0x4cc   :  { %6773 = vmatprep.subr.mxu1 %v10276_v58  ;;  %6719 = vmatpush3.msra.mxu0 %v9038_v42 }
 0x4cd   :  { %6774 = vmatpush3.msra.mxu1 %v9081_v18  ;;  %6654 = vmatprep.mubr.msk.f32.mxu0 %vm7253_vm1, %v10276_v58  ;;  %v3289_v0 = vand.u32 4294901760, %v9301_v57  ;;  %v3281_v29 = vand.u32 4294901760, %v3280_v60  ;;  %v84_v60 = vld [vmem:[%s10152_s8 + $0x38] sm:$0xff] }
 0x4ce   :  { %6707 = vmatprep.mubr.msk.f32.mxu1 %vm7253_vm1, %v10276_v58  ;;  %6720 = vmatprep.subr.mxu0 %v10276_v58 }
 0x4cf   :  { %6775 = vmatprep.subr.mxu1 %v10276_v58  ;;  %6655 = vmatmul.mubr.f32.gmra.mxu0 %v3271_v34  ;;  %v3290_v54 = vsub.f32 %v9301_v57, %v3289_v0 }
 0x4d0   :  { %6708 = vmatmul.mubr.f32.gmra.mxu1 %v9293_v26  ;;  %6721 = vmatpush3.msra.mxu0 %v9048_v16 }
 0x4d1   :  { %6776 = vmatpush3.msra.mxu1 %v9097_v12  ;;  %6722 = vmatprep.subr.mxu0 %v10276_v58  ;;  %v3291_v35 = vand.u32 4294901760, %v3290_v54 }
 0x4d2   :  { %6777 = vmatprep.subr.mxu1 %v10276_v58  ;;  %6723 = vmatpush3.msra.mxu0 %v9061_v17 }
 0x4d3   :  { %6778 = vmatpush3.msra.mxu1 %v9108_v10  ;;  %6657 = vmatprep.mubr.msk.f32.mxu0 %vm7253_vm1, %v10276_v58 }
 0x4d4   :  { %6724 = vmatprep.subr.mxu0 %v10276_v58  ;;  %6779 = vmatprep.subr.mxu1 %v10276_v58 }
 0x4d5   :  { %6658 = vmatmul.mubr.f32.gmra.mxu0 %v3281_v29  ;;  %6780 = vmatpush3.msra.mxu1 %v9125_v61 }
 0x4d6   :  { %6725 = vmatpush3.msra.mxu0 %v9079_v21  ;;  %6781 = vmatprep.subr.mxu1 %v10276_v58 }
 0x4d7   :  { %6726 = vmatprep.subr.mxu0 %v10276_v58  ;;  %6782 = vmatpush3.msra.mxu1 %v9138_v52 }
 0x4d8   :  { %6727 = vmatpush3.msra.mxu0 %v9094_v25  ;;  %6660 = vmatprep.mubr.msk.f32.mxu0 %vm7253_vm1, %v10276_v58 }
 0x4d9   :  { %6728 = vmatprep.subr.mxu0 %v10276_v58  ;;  %6783 = vmatprep.subr.mxu1 %v10276_v58 }
 0x4da   :  { %6661 = vmatmul.mubr.f32.gmra.mxu0 %v3291_v35  ;;  %6784 = vmatpush3.msra.mxu1 %v9156_v19  ;;  %v9617_v35 = vand.u32 4294901760, %v84_v60 }
 0x4db   :  { %6729 = vmatpush3.msra.mxu0 %v9112_v53  ;;  %6785 = vmatprep.subr.mxu1 %v10276_v58 }
 0x4dc   :  { %6730 = vmatprep.subr.mxu0 %v10276_v58  ;;  %6786 = vmatpush3.msra.mxu1 %v9172_v6 }
 0x4dd   :  { %6731 = vmatpush3.msra.mxu0 %v9123_v20  ;;  %6787 = vmatprep.subr.mxu1 %v10276_v58 }
 0x4de   :  { %6732 = vmatprep.subr.mxu0 %v10276_v58  ;;  %6788 = vmatpush3.msra.mxu1 %v9183_v15 }
 0x4df   :  { %6733 = vmatpush3.msra.mxu0 %v9136_v43  ;;  %6789 = vmatprep.mubr.msk.f32.mxu1 %vm7253_vm1, %v10276_v58 }
 0x4e0   :  { %6734 = vmatprep.subr.mxu0 %v10276_v58  ;;  %6790 = vmatmul.mubr.f32.vlgmr.msra.gmra.mxu1 %v3249_v47  ;;  %v10321_v47 = vld [vmem:[#allocation16_spill] sm:$0xff] }
 0x4e1   :  { %6851 = vmatprep.subr.mxu1 %v10276_v58  ;;  %6735 = vmatpush3.msra.mxu0 %v10319_v31 }
 0x4e2   :  { %6852 = vmatpush3.msra.mxu1 %v8976_v36  ;;  %6736 = vmatprep.subr.mxu0 %v10276_v58  ;;  %v10322_v36 = vld [vmem:[#allocation17_spill] sm:$0xff] }
 0x4e3   :  { %6853 = vmatprep.subr.mxu1 %v10276_v58  ;;  %6737 = vmatpush3.msra.mxu0 %v10320_v56 }
 0x4e4   :  { %6792 = vmatprep.mubr.msk.f32.mxu1 %vm7253_vm1, %v10276_v58  ;;  %6854 = vmatpush3.msra.mxu1 %v8984_v40  ;;  %v10323_v40 = vand.u32 4294901760, %v8982_v9  ;;  %v10325_v9 = vand.u32 4294901760, %v9007_v59  ;;  %v10327_v59 = vand.u32 4294901760, %v9038_v42  ;;  %v10332_v42 = vand.u32 4294901760, %v9112_v53 }
 0x4e5   :  { %6738 = vmatprep.subr.mxu0 %v10276_v58  ;;  %6793 = vmatmul.mubr.f32.gmra.mxu1 %v3259_v8 }
 0x4e6   :  { %6855 = vmatprep.subr.mxu1 %v10276_v58  ;;  %6739 = vmatpush3.msra.mxu0 %v10321_v47 }
 0x4e7   :  { %6856 = vmatpush3.msra.mxu1 %v8995_v24  ;;  %6740 = vmatprep.subr.mxu0 %v10276_v58  ;;  %v10324_v24 = vand.u32 4294901760, %v8993_v46  ;;  %v10326_v46 = vand.u32 4294901760, %v9021_v11  ;;  %v10329_v11 = vand.u32 4294901760, %v9061_v17  ;;  %v10335_v17 = vand.u32 4294901760, %v10319_v31 }
 0x4e8   :  { %6857 = vmatprep.subr.mxu1 %v10276_v58  ;;  %6741 = vmatpush3.msra.mxu0 %v10322_v36 }
 0x4e9   :  { %6742 = vmatprep.mubr.msk.f32.mxu0 %vm7253_vm1, %v10276_v58  ;;  %6795 = vmatprep.mubr.msk.f32.mxu1 %vm7253_vm1, %v10276_v58 }
 0x4ea   :  { %6858 = vmatpush3.msra.mxu1 %v9009_v3  ;;  %6743 = vmatmul.mubr.f32.vlgmr.msra.gmra.mxu0 %v9221_v55  ;;  %v10328_v3 = vand.u32 4294901760, %v9048_v16  ;;  %v10333_v16 = vand.u32 4294901760, %v9123_v20 }
 0x4eb   :  { %6796 = vmatmul.mubr.f32.gmra.mxu1 %v3269_v41  ;;  %6804 = vmatprep.subr.mxu0 %v10276_v58  ;;  %v9586_v41 = vand.u32 4294901760, %v86_v33 }
 0x4ec   :  { %6859 = vmatprep.subr.mxu1 %v10276_v58  ;;  %6805 = vmatpush3.msra.mxu0 %v10323_v40 }
 0x4ed   :  { %6860 = vmatpush3.msra.mxu1 %v9024_v2  ;;  %6806 = vmatprep.subr.mxu0 %v10276_v58  ;;  %v10330_v2 = vand.u32 4294901760, %v9079_v21  ;;  %v10337_v21 = vand.u32 4294901760, %v10321_v47 }
 0x4ee   :  { %6861 = vmatprep.subr.mxu1 %v10276_v58  ;;  %6745 = vmatprep.mubr.msk.f32.mxu0 %vm7253_vm1, %v10276_v58 }
 0x4ef   :  { %6798 = vmatprep.mubr.msk.f32.mxu1 %vm7253_vm1, %v10276_v58  ;;  %6807 = vmatpush3.msra.mxu0 %v10324_v24  ;;  %v9630_v24 = vsub.f32 %v84_v60, %v9617_v35  ;;  %v77_v60 = vld [vmem:[%s10152_s8] sm:$0xff] }
 0x4f0   :  { %6862 = vmatpush3.msra.mxu1 %v9034_v28  ;;  %6746 = vmatmul.mubr.f32.gmra.mxu0 %v9246_v51  ;;  %v10331_v28 = vand.u32 4294901760, %v9094_v25  ;;  %v92_v25 = vld [vmem:[%s10152_s8 + $0x78] sm:$0xff] }
 0x4f1   :  { %6799 = vmatmul.mubr.f32.gmra.mxu1 %v3279_v63  ;;  %6808 = vmatprep.subr.mxu0 %v10276_v58  ;;  %v88_v51 = vld [vmem:[%s10152_s8 + $0x58] sm:$0xff]  ;;  %v9597_v63 = vsub.f32 %v86_v33, %v9586_v41  ;;  %v78_v33 = vld [vmem:[%s10152_s8 + $0x8] sm:$0xff] }
 0x4f2   :  { %6863 = vmatprep.subr.mxu1 %v10276_v58  ;;  %6809 = vmatpush3.msra.mxu0 %v10325_v9  ;;  %v9560_v8 = vand.u32 4294901760, %v88_v51 }
 0x4f3   :  { %6864 = vmatpush3.msra.mxu1 %v9050_v45  ;;  %6810 = vmatprep.subr.mxu0 %v10276_v58  ;;  %v10334_v45 = vand.u32 4294901760, %v9136_v43  ;;  %v10243_v29 = vand.u32 4294901760, %v9597_v63 }
 0x4f4   :  { %6865 = vmatprep.subr.mxu1 %v10276_v58  ;;  %6748 = vmatprep.mubr.msk.f32.mxu0 %vm7253_vm1, %v10276_v58  ;;  %v9574_v44 = vsub.f32 %v88_v51, %v9560_v8  ;;  %v79_v51 = vld [vmem:[%s10152_s8 + $0x10] sm:$0xff] }
 0x4f5   :  { %6801 = vmatprep.mubr.msk.f32.mxu1 %vm7253_vm1, %v10276_v58  ;;  %6811 = vmatpush3.msra.mxu0 %v10326_v46  ;;  %v82_v46 = vld [vmem:[%s10152_s8 + $0x28] sm:$0xff] }
 0x4f6   :  { %6866 = vmatpush3.msra.mxu1 %v9063_v7  ;;  %6749 = vmatmul.mubr.f32.gmra.mxu0 %v9268_v37  ;;  %v10336_v7 = vand.u32 4294901760, %v10320_v56  ;;  %v9570_v37 = vand.u32 4294901760, %v87_v32  ;;  %v10245_v50 = vand.u32 4294901760, %v9574_v44  ;;  %v83_v56 = vld [vmem:[%s10152_s8 + $0x30] sm:$0xff] }
 0x4f7   :  { %6802 = vmatmul.mubr.f32.gmra.mxu1 %v3289_v0  ;;  %6812 = vmatprep.subr.mxu0 %v10276_v58  ;;  %v9633_v9 = vand.u32 4294901760, %v83_v56 }
 0x4f8   :  { %6867 = vmatprep.subr.mxu1 %v10276_v58  ;;  %6813 = vmatpush3.msra.mxu0 %v10327_v59 }
 0x4f9   :  { %6868 = vmatpush3.msra.mxu1 %v9081_v18  ;;  %6814 = vmatprep.subr.mxu0 %v10276_v58  ;;  %v10338_v18 = vand.u32 4294901760, %v10322_v36  ;;  %v4172_v36 = vsub.f32 %v9597_v63, %v10243_v29  ;;  %v10343_v29 = vlaneseq }
 0x4fa   :  { %6869 = vmatprep.subr.mxu1 %v10276_v58  ;;  %6751 = vmatprep.mubr.msk.f32.mxu0 %vm7253_vm1, %v10276_v58 }
 0x4fb   :  { %6815 = vmatpush3.msra.mxu0 %v10328_v3  ;;  %6870 = vmatpush3.msra.mxu1 %v9097_v12  ;;  %v9512_v12 = vand.u32 4294901760, %v92_v25  ;;  %v4173_v59 = vand.u32 4294901760, %v4172_v36 }
 0x4fc   :  { %6752 = vmatmul.mubr.f32.gmra.mxu0 %v9284_v22  ;;  %6816 = vmatprep.subr.mxu0 %v10276_v58  ;;  %v85_v22 = vld [vmem:[%s10152_s8 + $0x40] sm:$0xff] }
 0x4fd   :  { %6871 = vmatprep.subr.mxu1 %v10276_v58  ;;  %6817 = vmatpush3.msra.mxu0 %v10329_v11  ;;  %v9518_v53 = vsub.f32 %v92_v25, %v9512_v12  ;;  %v9599_v34 = vand.u32 4294901760, %v85_v22  ;;  %v10241_v11 = vand.u32 4294901760, %v9630_v24 }
 0x4fe   :  { %6872 = vmatpush3.msra.mxu1 %v9108_v10  ;;  %6818 = vmatprep.subr.mxu0 %v10276_v58  ;;  %v91_v10 = vld [vmem:[%s10152_s8 + $0x70] sm:$0xff] }
 0x4ff   :  { %6873 = vmatprep.subr.mxu1 %v10276_v58  ;;  %6754 = vmatprep.mubr.msk.f32.mxu0 %vm7253_vm1, %v10276_v58  ;;  %v9520_v20 = vand.u32 4294901760, %v91_v10  ;;  %v10249_v43 = vand.u32 4294901760, %v9518_v53  ;;  %v9615_v54 = vsub.f32 %v85_v22, %v9599_v34 }
 0x500   :  { %6819 = vmatpush3.msra.mxu0 %v10330_v2  ;;  %6874 = vmatpush3.msra.mxu1 %v9125_v61  ;;  %v90_v61 = vld [vmem:[%s10152_s8 + $0x68] sm:$0xff]  ;;  %v9644_v2 = vand.u32 4294901760, %v82_v46 }
 0x501   :  { %6755 = vmatmul.mubr.f32.gmra.mxu0 %v9301_v57  ;;  %6820 = vmatprep.subr.mxu0 %v10276_v58  ;;  %v4158_v57 = vsub.f32 %v9574_v44, %v10245_v50  ;;  %v10242_v40 = vand.u32 4294901760, %v9615_v54 }
 0x502   :  { %6875 = vmatprep.subr.mxu1 %v10276_v58  ;;  %6821 = vmatpush3.msra.mxu0 %v10331_v28  ;;  %v9648_v28 = vsub.f32 %v83_v56, %v9633_v9 }
 0x503   :  { %6876 = vmatpush3.msra.mxu1 %v9138_v52  ;;  %6822 = vmatprep.subr.mxu0 %v10276_v58  ;;  %v9529_v52 = vsub.f32 %v91_v10, %v9520_v20  ;;  %v4159_v31 = vand.u32 4294901760, %v4158_v57  ;;  %v4179_v3 = vsub.f32 %v9615_v54, %v10242_v40  ;;  %v9708_v57 = vand.u32 4294901760, %v78_v33 }
 0x504   :  { %6877 = vmatprep.subr.mxu1 %v10276_v58  ;;  %6823 = vmatpush3.msra.mxu0 %v10332_v42  ;;  %v81_v42 = vld [vmem:[%s10152_s8 + $0x20] sm:$0xff] }
 0x505   :  { %6878 = vmatpush3.msra.mxu1 %v9156_v19  ;;  %6824 = vmatprep.subr.mxu0 %v10276_v58  ;;  %v9531_v19 = vand.u32 4294901760, %v90_v61  ;;  %v9723_v36 = vsub.f32 %v78_v33, %v9708_v57 }
 0x506   :  { %6879 = vmatprep.subr.mxu1 %v10276_v58  ;;  %6825 = vmatpush3.msra.mxu0 %v10333_v16  ;;  %v4180_v16 = vand.u32 4294901760, %v4179_v3 }
 0x507   :  { %6880 = vmatpush3.msra.mxu1 %v9172_v6  ;;  %6826 = vmatprep.subr.mxu0 %v10276_v58  ;;  %v89_v6 = vld [vmem:[%s10152_s8 + $0x60] sm:$0xff]  ;;  %v9543_v55 = vsub.f32 %v90_v61, %v9531_v19  ;;  %10341 = vst [vmem:[#allocation12_spill] sm:$0xff] %v9723_v36 }
 0x508   :  { %6881 = vmatprep.subr.mxu1 %v10276_v58  ;;  %6827 = vmatpush3.msra.mxu0 %v10334_v45  ;;  %v4186_v45 = vsub.f32 %v9630_v24, %v10241_v11 }
 0x509   :  { %6882 = vmatpush3.msra.mxu1 %v9183_v15  ;;  %6883 = vmatprep.mubr.msk.f32.mxu1 %vm7253_vm1, %v10276_v58  ;;  %v4130_v15 = vsub.f32 %v9518_v53, %v10249_v43  ;;  %v10247_v23 = vand.u32 4294901760, %v9543_v55 }
 0x50a   :  { %6828 = vmatprep.subr.mxu0 %v10276_v58  ;;  %6884 = vmatmul.mubr.f32.vlgmr.msra.gmra.mxu1 %v9218_v49  ;;  %v4187_v25 = vand.u32 4294901760, %v4186_v45 }
 0x50b   :  { %6829 = vmatpush3.msra.mxu0 %v10335_v17  ;;  %6886 = vmatprep.mubr.msk.f32.mxu1 %vm7253_vm1, %v10276_v58  ;;  %v4131_v4 = vand.u32 4294901760, %v4130_v15  ;;  %v4144_v14 = vsub.f32 %v9543_v55, %v10247_v23  ;;  %v9659_v17 = vsub.f32 %v82_v46, %v9644_v2 }
 0x50c   :  { %6830 = vmatprep.subr.mxu0 %v10276_v58  ;;  %6836 = vmatprep.mubr.msk.f32.mxu0 %vm7253_vm1, %v10276_v58 }
 0x50d   :  { %6831 = vmatpush3.msra.mxu0 %v10336_v7  ;;  %6945 = vmatprep.subr.mxu1 %v10276_v58  ;;  %v4145_v39 = vand.u32 4294901760, %v4144_v14  ;;  %v9661_v7 = vand.u32 4294901760, %v81_v42  ;;  %v10239_v10 = vand.u32 4294901760, %v9659_v17 }
 0x50e   :  { %6832 = vmatprep.subr.mxu0 %v10276_v58  ;;  %6887 = vmatmul.mubr.f32.gmra.mxu1 %v9240_v27 }
 0x50f   :  { %6833 = vmatpush3.msra.mxu0 %v10337_v21  ;;  %6889 = vmatprep.mubr.msk.f32.mxu1 %vm7253_vm1, %v10276_v58  ;;  %v10240_v21 = vand.u32 4294901760, %v9648_v28  ;;  %v9672_v61 = vsub.f32 %v81_v42, %v9661_v7  ;;  %v10235_v42 = vand.u32 4294901760, %v9723_v36 }
 0x510   :  { %6834 = vmatprep.subr.mxu0 %v10276_v58  ;;  %6946 = vmatpush3.msra.mxu1 %v4131_v4  ;;  %v4200_v4 = vsub.f32 %v9659_v17, %v10239_v10 }
 0x511   :  { %6835 = vmatpush3.msra.mxu0 %v10338_v18  ;;  %6947 = vmatprep.subr.mxu1 %v10276_v58  ;;  %v80_v18 = vld [vmem:[%s10152_s8 + $0x18] sm:$0xff]  ;;  %v4193_v15 = vsub.f32 %v9648_v28, %v10240_v21 }
 0x512   :  { %6837 = vmatmul.mubr.f32.vlgmr.msra.gmra.mxu0 %v9218_v49  ;;  %6890 = vmatmul.mubr.f32.gmra.mxu1 %v9255_v30  ;;  %v10248_v49 = vand.u32 4294901760, %v9529_v52 }
 0x513   :  { %6839 = vmatprep.mubr.msk.f32.mxu0 %vm7253_vm1, %v10276_v58  ;;  %6892 = vmatprep.mubr.msk.f32.mxu1 %vm7253_vm1, %v10276_v58  ;;  %v4194_v14 = vand.u32 4294901760, %v4193_v15 }
 0x514   :  { %6898 = vmatprep.subr.mxu0 %v10276_v58  ;;  %v4137_v48 = vsub.f32 %v9529_v52, %v10248_v49 }
 0x515   :  { %6899 = vmatpush3.msra.mxu0 %v9512_v12 }
 0x516   :  { %6840 = vmatmul.mubr.f32.gmra.mxu0 %v9240_v27  ;;  %6893 = vmatmul.mubr.f32.gmra.mxu1 %v9275_v1  ;;  %v9545_v27 = vand.u32 4294901760, %v89_v6  ;;  %v4138_v38 = vand.u32 4294901760, %v4137_v48  ;;  %v10238_v48 = vand.u32 4294901760, %v9672_v61 }
 0x517   :  { %6842 = vmatprep.mubr.msk.f32.mxu0 %vm7253_vm1, %v10276_v58  ;;  %6895 = vmatprep.mubr.msk.f32.mxu1 %vm7253_vm1, %v10276_v58 }
 0x518   :  { %6900 = vmatprep.subr.mxu0 %v10276_v58  ;;  %6948 = vmatpush3.msra.mxu1 %v4138_v38  ;;  %v9692_v38 = vand.u32 4294901760, %v79_v51 }
 0x519   :  { %6901 = vmatpush3.msra.mxu0 %v9520_v20  ;;  %6949 = vmatprep.subr.mxu1 %v10276_v58 }
 0x51a   :  { %6843 = vmatmul.mubr.f32.gmra.mxu0 %v9255_v30  ;;  %6896 = vmatmul.mubr.f32.gmra.mxu1 %v9293_v26  ;;  %v9557_v30 = vsub.f32 %v89_v6, %v9545_v27  ;;  %v9674_v6 = vand.u32 4294901760, %v80_v18 }
 0x51b   :  { %6845 = vmatprep.mubr.msk.f32.mxu0 %vm7253_vm1, %v10276_v58  ;;  %6977 = vmatprep.mubr.msk.f32.mxu1 %vm7253_vm1, %v10276_v58 }
 0x51c   :  { %6902 = vmatprep.subr.mxu0 %v10276_v58  ;;  %v10246_v13 = vand.u32 4294901760, %v9557_v30  ;;  %6950 = vmatpush3.msra.mxu1 %v4145_v39  ;;  %v4201_v39 = vand.u32 4294901760, %v4200_v4 }
 0x51d   :  { %6903 = vmatpush3.msra.mxu0 %v9531_v19  ;;  %6951 = vmatprep.subr.mxu1 %v10276_v58 }
 0x51e   :  { %6846 = vmatmul.mubr.f32.gmra.mxu0 %v9275_v1  ;;  %6904 = vmatprep.subr.mxu0 %v10276_v58  ;;  %v4151_v62 = vsub.f32 %v9557_v30, %v10246_v13  ;;  %v9584_v1 = vsub.f32 %v87_v32, %v9570_v37  ;;  %v9690_v32 = vsub.f32 %v80_v18, %v9674_v6  ;;  %v10345_v13 = vld [vmem:[#allocation6_spill] sm:$0xff] }
 0x51f   :  { %6848 = vmatprep.mubr.msk.f32.mxu0 %vm7253_vm1, %v10276_v58  ;;  %6905 = vmatpush3.msra.mxu0 %v9545_v27  ;;  %v4228_v18 = vsub.f32 %v9723_v36, %v10235_v42  ;;  %v3980_v23 = vsub.f32 1.0, %v10345_v13 }
 0x520   :  { %6906 = vmatprep.subr.mxu0 %v10276_v58  ;;  %v4152_v5 = vand.u32 4294901760, %v4151_v62  ;;  %10339 = vst [vmem:[#allocation10_spill] sm:$0xff] %v9690_v32  ;;  %v4207_v62 = vsub.f32 %v9672_v61, %v10238_v48  ;;  %v10237_v22 = vand.u32 4294901760, %v9690_v32 }
 0x521   :  { %6907 = vmatpush3.msra.mxu0 %v9560_v8  ;;  %v4229_v15 = vand.u32 4294901760, %v4228_v18 }
 0x522   :  { %6849 = vmatmul.mubr.f32.gmra.mxu0 %v9293_v26  ;;  %6908 = vmatprep.subr.mxu0 %v10276_v58  ;;  %v10244_v26 = vand.u32 4294901760, %v9584_v1 }
 0x523   :  { %6930 = vmatprep.mubr.msk.f32.mxu0 %vm7253_vm1, %v10276_v58  ;;  %6909 = vmatpush3.msra.mxu0 %v9570_v37 }
 0x524   :  { %6910 = vmatprep.subr.mxu0 %v10276_v58  ;;  %6952 = vmatpush3.msra.mxu1 %v4152_v5  ;;  %v4165_v0 = vsub.f32 %v9584_v1, %v10244_v26  ;;  %v9705_v5 = vsub.f32 %v79_v51, %v9692_v38 }
 0x525   :  { %6911 = vmatpush3.msra.mxu0 %v9586_v41  ;;  %6953 = vmatprep.subr.mxu1 %v10276_v58 }
 0x526   :  { %6912 = vmatprep.subr.mxu0 %v10276_v58  ;;  %v4166_v47 = vand.u32 4294901760, %v4165_v0  ;;  %6954 = vmatpush3.msra.mxu1 %v4159_v31  ;;  %10340 = vst [vmem:[#allocation11_spill] sm:$0xff] %v9705_v5  ;;  %v4208_v0 = vand.u32 4294901760, %v4207_v62  ;;  %v4214_v31 = vsub.f32 %v9690_v32, %v10237_v22  ;;  %v10236_v56 = vand.u32 4294901760, %v9705_v5 }
 0x527   :  { %6913 = vmatpush3.msra.mxu0 %v9599_v34  ;;  %6955 = vmatprep.subr.mxu1 %v10276_v58 }
 0x528   :  { %6914 = vmatprep.subr.mxu0 %v10276_v58  ;;  %6956 = vmatpush3.msra.mxu1 %v4166_v47  ;;  %v9719_v47 = vand.u32 4294901760, %v77_v60  ;;  %v4215_v46 = vand.u32 4294901760, %v4214_v31 }
 0x529   :  { %6915 = vmatpush3.msra.mxu0 %v9617_v35  ;;  %6957 = vmatprep.subr.mxu1 %v10276_v58 }
 0x52a   :  { %6916 = vmatprep.subr.mxu0 %v10276_v58  ;;  %6958 = vmatpush3.msra.mxu1 %v4173_v59  ;;  %v4221_v59 = vsub.f32 %v9705_v5, %v10236_v56  ;;  %v9731_v3 = vsub.f32 %v77_v60, %v9719_v47  ;;  %v3981_v5 = vmul.f32 %v10345_v13, %v3980_v23  ;;  %v10346_v23 = vld [vmem:[#allocation5_spill] sm:$0xff] }
 0x52b   :  { %6917 = vmatpush3.msra.mxu0 %v9633_v9  ;;  %6959 = vmatprep.subr.mxu1 %v10276_v58 }
 0x52c   :  { %6918 = vmatprep.subr.mxu0 %v10276_v58  ;;  %6960 = vmatpush3.msra.mxu1 %v4180_v16  ;;  %10342 = vst [vmem:[#allocation13_spill] sm:$0xff] %v9731_v3  ;;  %v4222_v16 = vand.u32 4294901760, %v4221_v59  ;;  %v10234_v45 = vand.u32 4294901760, %v9731_v3 }
 0x52d   :  { %6919 = vmatpush3.msra.mxu0 %v9644_v2  ;;  %6961 = vmatprep.subr.mxu1 %v10276_v58 }
 0x52e   :  { %6920 = vmatprep.subr.mxu0 %v10276_v58  ;;  %6962 = vmatpush3.msra.mxu1 %v4187_v25  ;;  %v4235_v25 = vsub.f32 %v9731_v3, %v10234_v45 }
 0x52f   :  { %6921 = vmatpush3.msra.mxu0 %v9661_v7  ;;  %6963 = vmatprep.subr.mxu1 %v10276_v58 }
 0x530   :  { %6922 = vmatprep.subr.mxu0 %v10276_v58  ;;  %6964 = vmatpush3.msra.mxu1 %v4194_v14  ;;  %v4236_v51 = vand.u32 4294901760, %v4235_v25 }
 0x531   :  { %6923 = vmatpush3.msra.mxu0 %v9674_v6  ;;  %6965 = vmatprep.subr.mxu1 %v10276_v58 }
 0x532   :  { %6924 = vmatprep.subr.mxu0 %v10276_v58  ;;  %6966 = vmatpush3.msra.mxu1 %v4201_v39 }
 0x533   :  { %6925 = vmatpush3.msra.mxu0 %v9692_v38  ;;  %6967 = vmatprep.subr.mxu1 %v10276_v58 }
 0x534   :  { %6926 = vmatprep.subr.mxu0 %v10276_v58  ;;  %6968 = vmatpush3.msra.mxu1 %v4208_v0 }
 0x535   :  { %6927 = vmatpush3.msra.mxu0 %v9708_v57  ;;  %6969 = vmatprep.subr.mxu1 %v10276_v58 }
 0x536   :  { %6928 = vmatprep.subr.mxu0 %v10276_v58  ;;  %6970 = vmatpush3.msra.mxu1 %v4215_v46 }
 0x537   :  { %6929 = vmatpush3.msra.mxu0 %v9719_v47  ;;  %6971 = vmatprep.subr.mxu1 %v10276_v58 }
 0x538   :  { %6992 = vmatprep.subr.mxu0 %v10276_v58  ;;  %6972 = vmatpush3.msra.mxu1 %v4222_v16 }
 0x539   :  { %6973 = vmatprep.subr.mxu1 %v10276_v58 }
 0x53a   :  { %6974 = vmatpush3.msra.mxu1 %v4229_v15 }
 0x53b   :  { %6975 = vmatprep.subr.mxu1 %v10276_v58 }
 0x53c   :  { %6976 = vmatpush3.msra.mxu1 %v4236_v51 }
 0x53d   :  { %7039 = vmatprep.subr.mxu1 %v10276_v58 }
 0x579   :  { %v3444_v4 = vpop.f32.mrf.mxu1 }
 0x57b   :  { %v6697_v14 = vpop.f32.mrf.mxu1 }
 0x57f   :  { %v3450_v33 = vpop.f32.mrf.mxu1 }
 0x581   :  { %v3253_v39 = vpop.f32.mrf.mxu0  ;;  %v6700_v62 = vpop.f32.mrf.mxu1 }
 0x582   :  { %v3445_v60 = vadd.f32 %v3444_v4, %v3253_v39 }
 0x583   :  { %v6650_v0 = vpop.f32.mrf.mxu0 }
 0x584   :  { %v3456_v31 = vpop.f32.mrf.mxu1 }
 0x586   :  { %v6703_v46 = vpop.f32.mrf.mxu1 }
 0x589   :  { %v3263_v59 = vpop.f32.mrf.mxu0 }
 0x58a   :  { %v3451_v16 = vadd.f32 %v3450_v33, %v3263_v59  ;;  %v3462_v18 = vpop.f32.mrf.mxu1 }
 0x58b   :  { %v6653_v45 = vpop.f32.mrf.mxu0 }
 0x58c   :  { %v6706_v25 = vpop.f32.mrf.mxu1 }
 0x58f   :  { %v3273_v15 = vpop.f32.mrf.mxu0 }
 0x590   :  { %v3457_v42 = vadd.f32 %v3456_v31, %v3273_v15  ;;  %v3468_v56 = vpop.f32.mrf.mxu1 }
 0x591   :  { %v6656_v51 = vpop.f32.mrf.mxu0 }
 0x592   :  { %v6709_v22 = vpop.f32.mrf.mxu1 }
 0x595   :  { %v3283_v48 = vpop.f32.mrf.mxu0 }
 0x596   :  { %v3463_v10 = vadd.f32 %v3462_v18, %v3283_v48 }
 0x597   :  { %v6659_v14 = vpop.f32.mrf.mxu0 }
 0x59a   :  { %v3293_v21 = vpop.f32.mrf.mxu0 }
 0x59b   :  { %v9749_v11 = vadd.f32 %v3468_v56, %v3293_v21 }
 0x59c   :  { %v6662_v4 = vpop.f32.mrf.mxu0 }
 0x5a0   :  { %v3689_v39 = vpop.f32.mrf.mxu1 }
 0x5a2   :  { %v6791_v62 = vpop.f32.mrf.mxu1 }
 0x5a5   :  { %v3697_v0 = vpop.f32.mrf.mxu1 }
 0x5a7   :  { %v6794_v46 = vpop.f32.mrf.mxu1 }
 0x5a8   :  { %v9756_v46 = vand.u32 127, %v10343_v29 }
 0x5aa   :  { %v3572_v33 = vpop.f32.mrf.mxu0  ;;  %10344 = vst [vmem:[#allocation14_spill] sm:$0xff] %v9756_v46  ;;  %vm4810_vm4 = vcmp.eq.s32.totalorder %v9756_v46, 0  ;;  %vm4828_vm5 = vcmp.eq.s32.totalorder %v9756_v46, 1 }
 0x5ab   :  { %v3705_v59 = vpop.f32.mrf.mxu1 }
 0x5ac   :  { %v6744_v45 = vpop.f32.mrf.mxu0 }
 0x5ad   :  { %v6797_v25 = vpop.f32.mrf.mxu1  ;;  %v7229_v45 = vld [vmem:[%s10144_s0] sm:$0xff]  ;;  %s7258_s0 = smov 125  }
 0x5ae   :  { %4819 = vrot.lane.b32.xlu0 %v7229_v45, %s7255_s19  ;;  %v5094_v25 = vsel %vm4810_vm4, 1.0, %v10276_v58 }
 0x5b0   :  { %v3579_v40 = vpop.f32.mrf.mxu0 }
 0x5b1   :  { %v9751_v31 = vpop.f32.mrf.mxu1  ;;  %v3580_v26 = vadd.f32 %v3579_v40, %v3451_v16 }
 0x5b2   :  { %v6747_v15 = vpop.f32.mrf.mxu0 }
 0x5b3   :  { %v6800_v22 = vpop.f32.mrf.mxu1  ;;  %v5095_v15 = vsel %vm4828_vm5, 1.0, %v10276_v58 }
 0x5b4   :  { %v4813_v22 = vmul.f32 0.2, %v5094_v25 }
 0x5b6   :  { %v3586_v51 = vpop.f32.mrf.mxu0  ;;  %4815 = vrot.lane.b32.xlu0 %v4813_v22, %s7256_s20  ;;  %v3698_v22 = vadd.f32 %v3697_v0, %v3580_v26 }
 0x5b7   :  { %v9753_v48 = vpop.f32.mrf.mxu1 }
 0x5b8   :  { %v6750_v18 = vpop.f32.mrf.mxu0 }
 0x5b9   :  { %v6803_v21 = vpop.f32.mrf.mxu1  ;;  %v4831_v18 = vmul.f32 0.2, %v5095_v15  ;;  %v3587_v15 = vadd.f32 %v3586_v51, %v3457_v42 }
 0x5bb   :  { %4833 = vrot.lane.b32.xlu1 %v4831_v18, %s7256_s20 }
 0x5bc   :  { %v3593_v56 = vpop.f32.mrf.mxu0 }
 0x5be   :  { %v6753_v14 = vpop.f32.mrf.mxu0 }
 0x5bf   :  { %v3573_v14 = vadd.f32 %v3572_v33, %v3445_v60 }
 0x5c1   :  { %v3600_v4 = vpop.f32.mrf.mxu0  ;;  %v3690_v50 = vadd.f32 %v3689_v39, %v3573_v14 }
 0x5c3   :  { %v6756_v62 = vpop.f32.mrf.mxu0 }
 0x5ca   :  { %v3951_v21 = vpop.f32.mrf.mxu1 }
 0x5cc   :  { %v6885_v29 = vpop.f32.mrf.mxu1 }
 0x5cd   :  { %v3594_v29 = vadd.f32 %v3593_v56, %v3463_v10 }
 0x5ce   :  { %v3957_v62 = vpop.f32.mrf.mxu1 }
 0x5d0   :  { %v6888_v45 = vpop.f32.mrf.mxu1 }
 0x5d2   :  { %v3840_v49 = vpop.f32.mrf.mxu0  ;;  %v3963_v43 = vpop.f32.mrf.mxu1 }
 0x5d3   :  { %v3841_v46 = vadd.f32 %v3840_v49, %v3690_v50  ;;  %v3706_v50 = vadd.f32 %v3705_v59, %v3587_v15 }
 0x5d4   :  { %v6838_v3 = vpop.f32.mrf.mxu0  ;;  %v6891_v25 = vpop.f32.mrf.mxu1 }
 0x5d5   :  { %v3952_v36 = vadd.f32 %v3951_v21, %v3841_v46  ;;  %v3714_v21 = vadd.f32 %v9751_v31, %v3594_v29  ;;  %v10348_v29 = vld [vmem:[#allocation8_spill] sm:$0xff] }
 0x5d6   :  { %v3846_v32 = vpop.f32.mrf.mxu0  ;;  %v3969_v18 = vpop.f32.mrf.mxu1 }
 0x5d7   :  { %v3979_v60 = vmul.f32 %v10345_v13, %v3952_v36  ;;  %v9771_v33 = vmul.f32 %v3981_v5, %v3952_v36  ;;  %v3847_v40 = vadd.f32 %v3846_v32, %v3698_v22  ;;  %v3601_v32 = vadd.f32 %v3600_v4, %v9749_v11 }
 0x5d8   :  { %v6841_v16 = vpop.f32.mrf.mxu0  ;;  %v6894_v39 = vpop.f32.mrf.mxu1 }
 0x5d9   :  { %v9773_v14 = vand.u32 4294901760, %v3979_v60  ;;  %v3958_v49 = vadd.f32 %v3957_v62, %v3847_v40  ;;  %v3983_v26 = vmul.f32 %v9771_v33, %v10346_v23  ;;  %v10347_v62 = vld [vmem:[#allocation7_spill] sm:$0xff]  ;;  %v3722_v22 = vadd.f32 %v9753_v48, %v3601_v32 }
 0x5da   :  { %v3852_v3 = vpop.f32.mrf.mxu0  ;;  %v3975_v42 = vpop.f32.mrf.mxu1  ;;  %v3984_v45 = vmul.f32 %v9771_v33, %v10347_v62 }
 0x5db   :  { %v9776_v51 = vsub.f32 %v3979_v60, %v9773_v14  ;;  %v3987_v0 = vmul.f32 %v10345_v13, %v3958_v49  ;;  %v3853_v5 = vadd.f32 %v3852_v3, %v3706_v50  ;;  %6978 = vmatmul.mubr.f32.vlgmr.msra.gmra.mxu1 %v9773_v14  ;;  %v3985_v49 = vmul.f32 %v9771_v33, %v10348_v29  ;;  %v10350_v29 = vld [vmem:[#allocation10_spill] sm:$0xff] }
 0x5dc   :  { %7040 = vmatpush3.msra.mxu1 %v9512_v12  ;;  %v6844_v10 = vpop.f32.mrf.mxu0  ;;  %v6897_v36 = vpop.f32.mrf.mxu1  ;;  %6980 = vmatprep.mubr.msk.f32.mxu1 %vm7253_vm1, %v10276_v58 }
 0x5dd   :  { %v4078_v59 = vand.u32 4294901760, %v9776_v51  ;;  %v3991_v56 = vadd.f32 %v3987_v0, %v3983_v26  ;;  %v3964_v46 = vadd.f32 %v3963_v43, %v3853_v5  ;;  %7041 = vmatprep.subr.mxu1 %v10276_v58  ;;  %v10349_v36 = vld [vmem:[#allocation9_spill] sm:$0xff] }
 0x5de   :  { %7042 = vmatpush3.msra.mxu1 %v9520_v20  ;;  %v3858_v11 = vpop.f32.mrf.mxu0 }
 0x5df   :  { %v4079_v4 = vsub.f32 %v9776_v51, %v4078_v59  ;;  %v3988_v25 = vmul.f32 %v10345_v13, %v3964_v46  ;;  %v3859_v15 = vadd.f32 %v3858_v11, %v3714_v21  ;;  %7043 = vmatprep.subr.mxu1 %v10276_v58  ;;  %v9797_v43 = vand.u32 4294901760, %v3991_v56 }
 0x5e0   :  { %7044 = vmatpush3.msra.mxu1 %v9531_v19  ;;  %v6847_v31 = vpop.f32.mrf.mxu0 }
 0x5e1   :  { %v4080_v60 = vand.u32 4294901760, %v4079_v4  ;;  %v3992_v40 = vadd.f32 %v3988_v25, %v3984_v45  ;;  %v3970_v16 = vadd.f32 %v3969_v18, %v3859_v15  ;;  %7045 = vmatprep.subr.mxu1 %v10276_v58  ;;  %6981 = vmatmul.mubr.f32.gmra.mxu1 %v9797_v43  ;;  %v9804_v39 = vsub.f32 %v3991_v56, %v9797_v43 }
 0x5e2   :  { %7046 = vmatpush3.msra.mxu1 %v9545_v27  ;;  %v3864_v50 = vpop.f32.mrf.mxu0  ;;  %6983 = vmatprep.mubr.msk.f32.mxu1 %vm7253_vm1, %v10276_v58  ;;  %v3986_v56 = vmul.f32 %v9771_v33, %v10349_v36 }
 0x5e3   :  { %v3989_v48 = vmul.f32 %v10345_v13, %v3970_v16  ;;  %v3865_v3 = vadd.f32 %v3864_v50, %v3722_v22  ;;  %7047 = vmatprep.subr.mxu1 %v10276_v58  ;;  %6931 = vmatmul.mubr.f32.vlgmr.msra.gmra.mxu0 %v4080_v60  ;;  %v9813_v18 = vand.u32 4294901760, %v3992_v40  ;;  %v4088_v23 = vand.u32 4294901760, %v9804_v39 }
 0x5e4   :  { %6993 = vmatpush3.msra.mxu0 %v9518_v53  ;;  %7048 = vmatpush3.msra.mxu1 %v9560_v8  ;;  %v6850_v26 = vpop.f32.mrf.mxu0 }
 0x5e5   :  { %v3993_v0 = vadd.f32 %v3989_v48, %v3985_v49  ;;  %v3976_v5 = vadd.f32 %v3975_v42, %v3865_v3  ;;  %6994 = vmatprep.subr.mxu0 %v10276_v58  ;;  %7049 = vmatprep.subr.mxu1 %v10276_v58  ;;  %v4089_v32 = vsub.f32 %v9804_v39, %v4088_v23  ;;  %v10351_v49 = vld [vmem:[#allocation11_spill] sm:$0xff] }
 0x5e6   :  { %6984 = vmatmul.mubr.f32.gmra.mxu1 %v9813_v18  ;;  %6995 = vmatpush3.msra.mxu0 %v9529_v52  ;;  %v9826_v10 = vsub.f32 %v3992_v40, %v9813_v18 }
 0x5e7   :  { %v3990_v42 = vmul.f32 %v10345_v13, %v3976_v5  ;;  %7050 = vmatpush3.msra.mxu1 %v9570_v37  ;;  %6996 = vmatprep.subr.mxu0 %v10276_v58  ;;  %v4090_v46 = vand.u32 4294901760, %v4089_v32  ;;  %v9833_v21 = vand.u32 4294901760, %v3993_v0 }
 0x5e8   :  { %7051 = vmatprep.subr.mxu1 %v10276_v58  ;;  %6997 = vmatpush3.msra.mxu0 %v9543_v55  ;;  %v4098_v62 = vand.u32 4294901760, %v9826_v10 }
 0x5e9   :  { %v3994_v45 = vadd.f32 %v3990_v42, %v3986_v56  ;;  %7052 = vmatpush3.msra.mxu1 %v9586_v41  ;;  %6933 = vmatprep.mubr.msk.f32.mxu0 %vm7253_vm1, %v10276_v58  ;;  %v9842_v13 = vsub.f32 %v3993_v0, %v9833_v21 }
 0x5ea   :  { %6986 = vmatprep.mubr.msk.f32.mxu1 %vm7253_vm1, %v10276_v58  ;;  %6998 = vmatprep.subr.mxu0 %v10276_v58  ;;  %v4099_v33 = vsub.f32 %v9826_v10, %v4098_v62 }
 0x5eb   :  { %7053 = vmatprep.subr.mxu1 %v10276_v58  ;;  %6934 = vmatmul.mubr.f32.gmra.mxu0 %v4090_v46  ;;  %v9851_v11 = vand.u32 4294901760, %v3994_v45  ;;  %v4108_v4 = vand.u32 4294901760, %v9842_v13 }
 0x5ec   :  { %6987 = vmatmul.mubr.f32.gmra.mxu1 %v9833_v21  ;;  %6999 = vmatpush3.msra.mxu0 %v9557_v30  ;;  %v4100_v25 = vand.u32 4294901760, %v4099_v33 }
 0x5ed   :  { %7054 = vmatpush3.msra.mxu1 %v9599_v34  ;;  %7000 = vmatprep.subr.mxu0 %v10276_v58  ;;  %v9859_v15 = vsub.f32 %v3994_v45, %v9851_v11  ;;  %v4109_v31 = vsub.f32 %v9842_v13, %v4108_v4 }
 0x5ee   :  { %7055 = vmatprep.subr.mxu1 %v10276_v58  ;;  %7001 = vmatpush3.msra.mxu0 %v9574_v44 }
 0x5ef   :  { %7056 = vmatpush3.msra.mxu1 %v9617_v35  ;;  %6936 = vmatprep.mubr.msk.f32.mxu0 %vm7253_vm1, %v10276_v58  ;;  %v4118_v22 = vand.u32 4294901760, %v9859_v15  ;;  %v4110_v60 = vand.u32 4294901760, %v4109_v31 }
 0x5f0   :  { %6989 = vmatprep.mubr.msk.f32.mxu1 %vm7253_vm1, %v10276_v58  ;;  %7002 = vmatprep.subr.mxu0 %v10276_v58 }
 0x5f1   :  { %7057 = vmatprep.subr.mxu1 %v10276_v58  ;;  %6937 = vmatmul.mubr.f32.gmra.mxu0 %v4100_v25  ;;  %v4119_v40 = vsub.f32 %v9859_v15, %v4118_v22 }
 0x5f2   :  { %6990 = vmatmul.mubr.f32.gmra.mxu1 %v9851_v11  ;;  %7003 = vmatpush3.msra.mxu0 %v9584_v1 }
 0x5f3   :  { %7058 = vmatpush3.msra.mxu1 %v9633_v9  ;;  %7004 = vmatprep.subr.mxu0 %v10276_v58  ;;  %v4120_v16 = vand.u32 4294901760, %v4119_v40 }
 0x5f4   :  { %7059 = vmatprep.subr.mxu1 %v10276_v58  ;;  %7005 = vmatpush3.msra.mxu0 %v9597_v63 }
 0x5f5   :  { %7060 = vmatpush3.msra.mxu1 %v9644_v2  ;;  %6939 = vmatprep.mubr.msk.f32.mxu0 %vm7253_vm1, %v10276_v58 }
 0x5f6   :  { %7006 = vmatprep.subr.mxu0 %v10276_v58  ;;  %7061 = vmatprep.subr.mxu1 %v10276_v58 }
 0x5f7   :  { %6940 = vmatmul.mubr.f32.gmra.mxu0 %v4110_v60  ;;  %7062 = vmatpush3.msra.mxu1 %v9661_v7 }
 0x5f8   :  { %7007 = vmatpush3.msra.mxu0 %v9615_v54  ;;  %7063 = vmatprep.subr.mxu1 %v10276_v58 }
 0x5f9   :  { %7008 = vmatprep.subr.mxu0 %v10276_v58  ;;  %7064 = vmatpush3.msra.mxu1 %v9674_v6 }
 0x5fa   :  { %7009 = vmatpush3.msra.mxu0 %v9630_v24  ;;  %6942 = vmatprep.mubr.msk.f32.mxu0 %vm7253_vm1, %v10276_v58 }
 0x5fb   :  { %7010 = vmatprep.subr.mxu0 %v10276_v58  ;;  %7065 = vmatprep.subr.mxu1 %v10276_v58 }
 0x5fc   :  { %6943 = vmatmul.mubr.f32.gmra.mxu0 %v4120_v16  ;;  %7066 = vmatpush3.msra.mxu1 %v9692_v38 }
 0x5fd   :  { %7011 = vmatpush3.msra.mxu0 %v9648_v28  ;;  %7067 = vmatprep.subr.mxu1 %v10276_v58 }
 0x5fe   :  { %7012 = vmatprep.subr.mxu0 %v10276_v58  ;;  %7068 = vmatpush3.msra.mxu1 %v9708_v57 }
 0x5ff   :  { %7013 = vmatpush3.msra.mxu0 %v9659_v17  ;;  %7069 = vmatprep.subr.mxu1 %v10276_v58 }
 0x600   :  { %7014 = vmatprep.subr.mxu0 %v10276_v58  ;;  %7070 = vmatpush3.msra.mxu1 %v9719_v47 }
 0x601   :  { %7015 = vmatpush3.msra.mxu0 %v9672_v61  ;;  %7071 = vmatprep.mubr.msk.f32.mxu1 %vm7253_vm1, %v10276_v58 }
 0x602   :  { %7016 = vmatprep.subr.mxu0 %v10276_v58  ;;  %7072 = vmatmul.mubr.f32.vlgmr.msra.gmra.mxu1 %v4078_v59  ;;  %v10352_v59 = vld [vmem:[#allocation12_spill] sm:$0xff] }
 0x603   :  { %7133 = vmatprep.subr.mxu1 %v10276_v58  ;;  %7017 = vmatpush3.msra.mxu0 %v10350_v29 }
 0x604   :  { %7134 = vmatpush3.msra.mxu1 %v9512_v12  ;;  %7018 = vmatprep.subr.mxu0 %v10276_v58  ;;  %v10353_v12 = vld [vmem:[#allocation13_spill] sm:$0xff] }
 0x605   :  { %7135 = vmatprep.subr.mxu1 %v10276_v58  ;;  %7019 = vmatpush3.msra.mxu0 %v10351_v49 }
 0x606   :  { %7074 = vmatprep.mubr.msk.f32.mxu1 %vm7253_vm1, %v10276_v58  ;;  %7136 = vmatpush3.msra.mxu1 %v9520_v20  ;;  %v10354_v20 = vand.u32 4294901760, %v9518_v53  ;;  %v10356_v53 = vand.u32 4294901760, %v9543_v55  ;;  %v10358_v55 = vand.u32 4294901760, %v9574_v44  ;;  %v10363_v44 = vand.u32 4294901760, %v9648_v28 }
 0x607   :  { %7020 = vmatprep.subr.mxu0 %v10276_v58  ;;  %7075 = vmatmul.mubr.f32.gmra.mxu1 %v4088_v23 }
 0x608   :  { %7137 = vmatprep.subr.mxu1 %v10276_v58  ;;  %7021 = vmatpush3.msra.mxu0 %v10352_v59 }
 0x609   :  { %7138 = vmatpush3.msra.mxu1 %v9531_v19  ;;  %7022 = vmatprep.subr.mxu0 %v10276_v58  ;;  %v10355_v19 = vand.u32 4294901760, %v9529_v52  ;;  %v10357_v52 = vand.u32 4294901760, %v9557_v30  ;;  %v10360_v30 = vand.u32 4294901760, %v9597_v63  ;;  %v10366_v63 = vand.u32 4294901760, %v10350_v29 }
 0x60a   :  { %7139 = vmatprep.subr.mxu1 %v10276_v58  ;;  %7023 = vmatpush3.msra.mxu0 %v10353_v12 }
 0x60b   :  { %7024 = vmatprep.mubr.msk.f32.mxu0 %vm7253_vm1, %v10276_v58  ;;  %7077 = vmatprep.mubr.msk.f32.mxu1 %vm7253_vm1, %v10276_v58 }
 0x60c   :  { %7140 = vmatpush3.msra.mxu1 %v9545_v27  ;;  %7025 = vmatmul.mubr.f32.vlgmr.msra.gmra.mxu0 %v9776_v51  ;;  %v10359_v27 = vand.u32 4294901760, %v9584_v1  ;;  %v10364_v1 = vand.u32 4294901760, %v9659_v17 }
 0x60d   :  { %7078 = vmatmul.mubr.f32.gmra.mxu1 %v4098_v62  ;;  %7086 = vmatprep.subr.mxu0 %v10276_v58 }
 0x60e   :  { %7141 = vmatprep.subr.mxu1 %v10276_v58  ;;  %7087 = vmatpush3.msra.mxu0 %v10354_v20 }
 0x60f   :  { %7142 = vmatpush3.msra.mxu1 %v9560_v8  ;;  %7088 = vmatprep.subr.mxu0 %v10276_v58  ;;  %v10361_v8 = vand.u32 4294901760, %v9615_v54  ;;  %v10368_v54 = vand.u32 4294901760, %v10352_v59 }
 0x610   :  { %7143 = vmatprep.subr.mxu1 %v10276_v58  ;;  %7027 = vmatprep.mubr.msk.f32.mxu0 %vm7253_vm1, %v10276_v58 }
 0x611   :  { %7080 = vmatprep.mubr.msk.f32.mxu1 %vm7253_vm1, %v10276_v58  ;;  %7089 = vmatpush3.msra.mxu0 %v10355_v19 }
 0x612   :  { %7144 = vmatpush3.msra.mxu1 %v9570_v37  ;;  %7028 = vmatmul.mubr.f32.gmra.mxu0 %v9804_v39  ;;  %v10362_v37 = vand.u32 4294901760, %v9630_v24  ;;  %v7257_v24 = vmov 4  }
 0x613   :  { %7081 = vmatmul.mubr.f32.gmra.mxu1 %v4108_v4  ;;  %7090 = vmatprep.subr.mxu0 %v10276_v58 }
 0x614   :  { %7145 = vmatprep.subr.mxu1 %v10276_v58  ;;  %7091 = vmatpush3.msra.mxu0 %v10356_v53 }
 0x615   :  { %7146 = vmatpush3.msra.mxu1 %v9586_v41  ;;  %7092 = vmatprep.subr.mxu0 %v10276_v58  ;;  %v10365_v41 = vand.u32 4294901760, %v9672_v61 }
 0x616   :  { %7147 = vmatprep.subr.mxu1 %v10276_v58  ;;  %7030 = vmatprep.mubr.msk.f32.mxu0 %vm7253_vm1, %v10276_v58 }
 0x617   :  { %7083 = vmatprep.mubr.msk.f32.mxu1 %vm7253_vm1, %v10276_v58  ;;  %7093 = vmatpush3.msra.mxu0 %v10357_v52 }
 0x618   :  { %7148 = vmatpush3.msra.mxu1 %v9599_v34  ;;  %7031 = vmatmul.mubr.f32.gmra.mxu0 %v9826_v10  ;;  %v10367_v34 = vand.u32 4294901760, %v10351_v49 }
 0x619   :  { %7084 = vmatmul.mubr.f32.gmra.mxu1 %v4118_v22  ;;  %7094 = vmatprep.subr.mxu0 %v10276_v58 }
 0x61a   :  { %7149 = vmatprep.subr.mxu1 %v10276_v58  ;;  %7095 = vmatpush3.msra.mxu0 %v10358_v55 }
 0x61b   :  { %7150 = vmatpush3.msra.mxu1 %v9617_v35  ;;  %7096 = vmatprep.subr.mxu0 %v10276_v58  ;;  %v10369_v35 = vand.u32 4294901760, %v10353_v12 }
 0x61c   :  { %7151 = vmatprep.subr.mxu1 %v10276_v58  ;;  %7033 = vmatprep.mubr.msk.f32.mxu0 %vm7253_vm1, %v10276_v58 }
 0x61d   :  { %7097 = vmatpush3.msra.mxu0 %v10359_v27  ;;  %7152 = vmatpush3.msra.mxu1 %v9633_v9 }
 0x61e   :  { %7034 = vmatmul.mubr.f32.gmra.mxu0 %v9842_v13  ;;  %7098 = vmatprep.subr.mxu0 %v10276_v58 }
 0x61f   :  { %7153 = vmatprep.subr.mxu1 %v10276_v58  ;;  %7099 = vmatpush3.msra.mxu0 %v10360_v30 }
 0x620   :  { %7154 = vmatpush3.msra.mxu1 %v9644_v2  ;;  %7100 = vmatprep.subr.mxu0 %v10276_v58 }
 0x621   :  { %7155 = vmatprep.subr.mxu1 %v10276_v58  ;;  %7036 = vmatprep.mubr.msk.f32.mxu0 %vm7253_vm1, %v10276_v58 }
 0x622   :  { %7101 = vmatpush3.msra.mxu0 %v10361_v8  ;;  %7156 = vmatpush3.msra.mxu1 %v9661_v7 }
 0x623   :  { %7037 = vmatmul.mubr.f32.gmra.mxu0 %v9859_v15  ;;  %7102 = vmatprep.subr.mxu0 %v10276_v58 }
 0x624   :  { %7157 = vmatprep.subr.mxu1 %v10276_v58  ;;  %7103 = vmatpush3.msra.mxu0 %v10362_v37 }
 0x625   :  { %7158 = vmatpush3.msra.mxu1 %v9674_v6  ;;  %7104 = vmatprep.subr.mxu0 %v10276_v58 }
 0x626   :  { %7159 = vmatprep.subr.mxu1 %v10276_v58  ;;  %7105 = vmatpush3.msra.mxu0 %v10363_v44 }
 0x627   :  { %7160 = vmatpush3.msra.mxu1 %v9692_v38  ;;  %7106 = vmatprep.subr.mxu0 %v10276_v58 }
 0x628   :  { %7161 = vmatprep.subr.mxu1 %v10276_v58  ;;  %7107 = vmatpush3.msra.mxu0 %v10364_v1 }
 0x629   :  { %7162 = vmatpush3.msra.mxu1 %v9708_v57  ;;  %7108 = vmatprep.subr.mxu0 %v10276_v58 }
 0x62a   :  { %7163 = vmatprep.subr.mxu1 %v10276_v58  ;;  %7109 = vmatpush3.msra.mxu0 %v10365_v41 }
 0x62b   :  { %7164 = vmatpush3.msra.mxu1 %v9719_v47  ;;  %7165 = vmatprep.mubr.msk.f32.mxu1 %vm7253_vm1, %v10276_v58 }
 0x62c   :  { %7110 = vmatprep.subr.mxu0 %v10276_v58  ;;  %7166 = vmatmul.mubr.f32.vlgmr.msra.gmra.mxu1 %v9773_v14 }
 0x62d   :  { %7111 = vmatpush3.msra.mxu0 %v10366_v63  ;;  %7168 = vmatprep.mubr.msk.f32.mxu1 %vm7253_vm1, %v10276_v58  ;;  %v10061_v63 = vpop.permute.xlu0 %4819 }
 0x62e   :  { %7112 = vmatprep.subr.mxu0 %v10276_v58  ;;  %7118 = vmatprep.mubr.msk.f32.mxu0 %vm7253_vm1, %v10276_v58 }
 0x62f   :  { %7113 = vmatpush3.msra.mxu0 %v10367_v34  ;;  %7195 = vset.pattern.permute.xlu0 %v7257_v24 }
 0x630   :  { %7114 = vmatprep.subr.mxu0 %v10276_v58  ;;  %7169 = vmatmul.mubr.f32.gmra.mxu1 %v9797_v43 }
 0x631   :  { %7115 = vmatpush3.msra.mxu0 %v10368_v54  ;;  %7171 = vmatprep.mubr.msk.f32.mxu1 %vm7253_vm1, %v10276_v58 }
 0x632   :  { %7116 = vmatprep.subr.mxu0 %v10276_v58  ;;  %7196 = vset.pattern.permute.xlu1 %v7257_v24 }
 0x633   :  { %7117 = vmatpush3.msra.mxu0 %v10369_v35 }
 0x634   :  { %7119 = vmatmul.mubr.f32.vlgmr.msra.gmra.mxu0 %v9773_v14  ;;  %7172 = vmatmul.mubr.f32.gmra.mxu1 %v9813_v18 }
 0x635   :  { %7121 = vmatprep.mubr.msk.f32.mxu0 %vm7253_vm1, %v10276_v58  ;;  %7174 = vmatprep.mubr.msk.f32.mxu1 %vm7253_vm1, %v10276_v58 }
 0x638   :  { %7122 = vmatmul.mubr.f32.gmra.mxu0 %v9797_v43  ;;  %7175 = vmatmul.mubr.f32.gmra.mxu1 %v9833_v21 }
 0x639   :  { %7124 = vmatprep.mubr.msk.f32.mxu0 %vm7253_vm1, %v10276_v58  ;;  %7177 = vmatprep.mubr.msk.f32.mxu1 %vm7253_vm1, %v10276_v58 }
 0x63c   :  { %7125 = vmatmul.mubr.f32.gmra.mxu0 %v9813_v18  ;;  %7178 = vmatmul.mubr.f32.gmra.mxu1 %v9851_v11 }
 0x63d   :  { %7127 = vmatprep.mubr.msk.f32.mxu0 %vm7253_vm1, %v10276_v58 }
 0x640   :  { %7128 = vmatmul.mubr.f32.gmra.mxu0 %v9833_v21 }
 0x641   :  { %7130 = vmatprep.mubr.msk.f32.mxu0 %vm7253_vm1, %v10276_v58 }
 0x644   :  { %7131 = vmatmul.mubr.f32.gmra.mxu0 %v9851_v11 }
 0x69b   :  { %v4273_v9 = vpop.f32.mrf.mxu1 }
 0x69d   :  { %v6979_v2 = vpop.f32.mrf.mxu1 }
 0x6a1   :  { %v4279_v28 = vpop.f32.mrf.mxu1 }
 0x6a3   :  { %v4082_v17 = vpop.f32.mrf.mxu0  ;;  %v6982_v7 = vpop.f32.mrf.mxu1 }
 0x6a4   :  { %v4274_v61 = vadd.f32 %v4273_v9, %v4082_v17 }
 0x6a5   :  { %v6932_v6 = vpop.f32.mrf.mxu0 }
 0x6a6   :  { %v4285_v38 = vpop.f32.mrf.mxu1  ;;  %v4816_v6 = vpop.permute.xlu0 %4815 }
 0x6a8   :  { %v6985_v57 = vpop.f32.mrf.mxu1 }
 0x6ab   :  { %v4092_v47 = vpop.f32.mrf.mxu0 }
 0x6ac   :  { %v4280_v14 = vadd.f32 %v4279_v28, %v4092_v47  ;;  %v4291_v51 = vpop.f32.mrf.mxu1 }
 0x6ad   :  { %v6935_v43 = vpop.f32.mrf.mxu0 }
 0x6ae   :  { %v6988_v39 = vpop.f32.mrf.mxu1 }
 0x6b1   :  { %v4102_v50 = vpop.f32.mrf.mxu0 }
 0x6b2   :  { %v4286_v48 = vadd.f32 %v4285_v38, %v4102_v50  ;;  %v4297_v3 = vpop.f32.mrf.mxu1 }
 0x6b3   :  { %v6938_v18 = vpop.f32.mrf.mxu0 }
 0x6b4   :  { %v6991_v23 = vpop.f32.mrf.mxu1 }
 0x6b7   :  { %v4112_v26 = vpop.f32.mrf.mxu0 }
 0x6b8   :  { %v4292_v0 = vadd.f32 %v4291_v51, %v4112_v26 }
 0x6b9   :  { %v6941_v5 = vpop.f32.mrf.mxu0 }
 0x6bc   :  { %v4122_v32 = vpop.f32.mrf.mxu0 }
 0x6bd   :  { %v4298_v10 = vadd.f32 %v4297_v3, %v4122_v32 }
 0x6be   :  { %v6944_v36 = vpop.f32.mrf.mxu0 }
 0x6bf   :  { %v10370_v36 = vld [vmem:[#allocation14_spill] sm:$0xff] }
 0x6c0   :  { %vm4842_vm7 = vcmp.eq.s32.totalorder %v10370_v36, 2  ;;  %vm4856_vm8 = vcmp.eq.s32.totalorder %v10370_v36, 3 }
 0x6c2   :  { %v4518_v56 = vpop.f32.mrf.mxu1 }
 0x6c4   :  { %v7073_v42 = vpop.f32.mrf.mxu1 }
 0x6c5   :  { %v5096_v42 = vsel %vm4842_vm7, 1.0, %v10276_v58 }
 0x6c7   :  { %v4526_v46 = vpop.f32.mrf.mxu1 }
 0x6c9   :  { %v7076_v21 = vpop.f32.mrf.mxu1 }
 0x6ca   :  { %v4845_v21 = vmul.f32 0.2, %v5096_v42 }
 0x6cc   :  { %v4401_v62 = vpop.f32.mrf.mxu0 }
 0x6cd   :  { %v4402_v45 = vadd.f32 %v4401_v62, %v4274_v61  ;;  %v4534_v13 = vpop.f32.mrf.mxu1 }
 0x6ce   :  { %v7026_v33 = vpop.f32.mrf.mxu0 }
 0x6cf   :  { %v7079_v11 = vpop.f32.mrf.mxu1  ;;  %v4519_v4 = vadd.f32 %v4518_v56, %v4402_v45  ;;  %v5097_v33 = vsel %vm4856_vm8, 1.0, %v10276_v58 }
 0x6d2   :  { %v4408_v25 = vpop.f32.mrf.mxu0 }
 0x6d3   :  { %v4542_v15 = vpop.f32.mrf.mxu1  ;;  %v4409_v41 = vadd.f32 %v4408_v25, %v4280_v14 }
 0x6d4   :  { %v7029_v31 = vpop.f32.mrf.mxu0 }
 0x6d5   :  { %v7082_v22 = vpop.f32.mrf.mxu1  ;;  %v4527_v28 = vadd.f32 %v4526_v46, %v4409_v41 }
 0x6d8   :  { %v4415_v60 = vpop.f32.mrf.mxu0 }
 0x6d9   :  { %v4416_v40 = vadd.f32 %v4415_v60, %v4286_v48  ;;  %v4550_v16 = vpop.f32.mrf.mxu1 }
 0x6da   :  { %v7032_v29 = vpop.f32.mrf.mxu0 }
 0x6db   :  { %v7085_v49 = vpop.f32.mrf.mxu1  ;;  %v4535_v59 = vadd.f32 %v4534_v13, %v4416_v40  ;;  %v4834_v13 = vpop.permute.xlu1 %4833 }
 0x6de   :  { %v4422_v12 = vpop.f32.mrf.mxu0 }
 0x6df   :  { %v4423_v20 = vadd.f32 %v4422_v12, %v4292_v0 }
 0x6e0   :  { %v7035_v19 = vpop.f32.mrf.mxu0 }
 0x6e1   :  { %v4543_v53 = vadd.f32 %v4542_v15, %v4423_v20 }
 0x6e3   :  { %v4429_v52 = vpop.f32.mrf.mxu0 }
 0x6e4   :  { %v4430_v55 = vadd.f32 %v4429_v52, %v4298_v10 }
 0x6e5   :  { %v7038_v27 = vpop.f32.mrf.mxu0 }
 0x6e6   :  { %v4551_v30 = vadd.f32 %v4550_v16, %v4430_v55 }
 0x6ec   :  { %v4780_v8 = vpop.f32.mrf.mxu1 }
 0x6ee   :  { %v7167_v37 = vpop.f32.mrf.mxu1 }
 0x6ef   :  { %v7259_v37 = vmov 5  }
 0x6f0   :  { %v4786_v44 = vpop.f32.mrf.mxu1 }
 0x6f2   :  { %v7170_v1 = vpop.f32.mrf.mxu1 }
 0x6f4   :  { %v4669_v34 = vpop.f32.mrf.mxu0  ;;  %v4792_v54 = vpop.f32.mrf.mxu1 }
 0x6f5   :  { %v4670_v35 = vadd.f32 %v4669_v34, %v4519_v4  ;;  %v4859_v4 = vmul.f32 0.2, %v5097_v33 }
 0x6f6   :  { %v7120_v24 = vpop.f32.mrf.mxu0  ;;  %v7173_v9 = vpop.f32.mrf.mxu1 }
 0x6f7   :  { %v10063_v2 = vadd.f32 %v4780_v8, %v4670_v35 }
 0x6f8   :  { %v4675_v17 = vpop.f32.mrf.mxu0  ;;  %v4798_v7 = vpop.f32.mrf.mxu1 }
 0x6f9   :  { %v4676_v61 = vadd.f32 %v4675_v17, %v4527_v28 }
 0x6fa   :  { %v7123_v38 = vpop.f32.mrf.mxu0  ;;  %v7176_v57 = vpop.f32.mrf.mxu1 }
 0x6fb   :  { %v4787_v47 = vadd.f32 %v4786_v44, %v4676_v61 }
 0x6fc   :  { %v4681_v51 = vpop.f32.mrf.mxu0  ;;  %v4804_v43 = vpop.f32.mrf.mxu1 }
 0x6fd   :  { %v4818_v14 = vadd.f32 %v4816_v6, %v4787_v47  ;;  %v4822_v39 = vmul.f32 %v10061_v63, %v4787_v47  ;;  %v4682_v62 = vadd.f32 %v4681_v51, %v4535_v59 }
 0x6fe   :  { %v7126_v50 = vpop.f32.mrf.mxu0  ;;  %v7179_v48 = vpop.f32.mrf.mxu1 }
 0x6ff   :  { %7221 = vrcp.f32 %v4818_v14  ;;  %v4824_v3 = vsel %vm4823_vm6, %v4822_v39, 0.0  ;;  %v4793_v45 = vadd.f32 %v4792_v54, %v4682_v62  ;;  %v7260_v54 = vmov 6  }
 0x700   :  { %4825 = vadd.xlane.f32.xlu1 %v4824_v3  ;;  %v4687_v18 = vpop.f32.mrf.mxu0 }
 0x701   :  { %v4688_v23 = vadd.f32 %v4687_v18, %v4543_v53  ;;  %v4836_v11 = vadd.f32 %v4834_v13, %v4793_v45  ;;  %v4837_v58 = vmul.f32 %v10061_v63, %v4793_v45 }
 0x702   :  { %v7129_v26 = vpop.f32.mrf.mxu0 }
 0x703   :  { %v10067_v0 = vadd.f32 %v4798_v7, %v4688_v23  ;;  %v4838_v16 = vsel %vm4823_vm6, %v4837_v58, 0.0 }
 0x704   :  { %v4693_v5 = vpop.f32.mrf.mxu0 }
 0x705   :  { %v4694_v32 = vadd.f32 %v4693_v5, %v4551_v30  ;;  %v4851_v6 = vmul.f32 %v10061_v63, %v10067_v0 }
 0x706   :  { %v7132_v10 = vpop.f32.mrf.mxu0 }
 0x707   :  { %v10070_v56 = vadd.f32 %v4804_v43, %v4694_v32  ;;  %v4852_v38 = vsel %vm4823_vm6, %v4851_v6, 0.0 }
 0x709   :  { %v4865_v26 = vmul.f32 %v10061_v63, %v10070_v56 }
 0x70c   :  { %v7222_v46 = vpop.eup %7221 }
 0x70d   :  { %4878 = vrot.lane.b32.xlu0 %v7222_v46, %s7255_s19 }
 0x711   :  { %4847 = vrot.lane.b32.xlu0 %v4845_v21, %s7256_s20 }
 0x715   :  { %4874 = vperm.xlu0 %7195, %v7222_v46  }
 0x719   :  { %4884 = vperm.xlu0 %7195, %v4836_v11  }
 0x71d   :  { %4861 = vrot.lane.b32.xlu0 %v4859_v4, %s7256_s20 }
 0x77f   :  { %v4879_v25 = vpop.permute.xlu0 %4878 }
 0x783   :  { %v4848_v60 = vpop.permute.xlu0 %4847 }
 0x784   :  { %v4850_v40 = vadd.f32 %v4848_v60, %v10067_v0  ;;  %v4866_v0 = vsel %vm4823_vm6, %v4865_v26, 0.0 }
 0x789   :  { %v4826_v15 = vpop.xlane.xlu1 %4825 }
 0x78a   :  { %v4827_v31 = vsub.f32 %v10063_v2, %v4826_v15 }
 0x78c   :  { %v10079_v22 = vmul.f32 %v4879_v25, %v4827_v31 }
 0x78e   :  { %4890 = vrot.lane.b32.xlu0 %v10079_v22, %s7256_s20 }
 0x790   :  { %v4875_v29 = vpop.permute.xlu0 %4874 }
 0x791   :  { %v10086_v59 = vmul.f32 %v4875_v29, %v4818_v14 }
 0x792   :  { %4901 = vperm.xlu0 %7195, %v4850_v40  }
 0x794   :  { %v4885_v49 = vpop.permute.xlu0 %4884 }
 0x795   :  { %v4887_v12 = vmul.f32 %v4885_v49, %v10086_v59 }
 0x796   :  { %7198 = vset.pattern.permute.xlu0 %v7260_v54 }
 0x797   :  { %v4888_v20 = vsub.f32 %v4836_v11, %v4887_v12 }
 0x798   :  { %v4862_v19 = vpop.permute.xlu0 %4861 }
 0x799   :  { %7223 = vrcp.f32 %v4888_v20  ;;  %v4864_v27 = vadd.f32 %v4862_v19, %v10070_v56 }
 0x7a6   :  { %v7224_v55 = vpop.eup %7223 }
 0x7b1   :  { %4839 = vadd.xlane.f32.xlu0 %v4838_v16 }
 0x800   :  { %v10089_v53 = vpop.permute.xlu0 %4890 }
 0x801   :  { %v4893_v52 = vmul.f32 %v10089_v53, %v4836_v11  ;;  %v4906_v28 = vmul.f32 %v10089_v53, %v4850_v40  ;;  %v4919_v56 = vmul.f32 %v10089_v53, %v4864_v27 }
 0x803   :  { %4895 = vrot.lane.b32.xlu1 %v4893_v52, %s7258_s0 }
 0x807   :  { %4933 = vrot.lane.b32.xlu1 %v7224_v55, %s7255_s19 }
 0x80b   :  { %4914 = vperm.xlu1 %7196, %v4864_v27  }
 0x80d   :  { %v4902_v30 = vpop.permute.xlu0 %4901 }
 0x80e   :  { %v4904_v8 = vmul.f32 %v4902_v30, %v10086_v59 }
 0x80f   :  { %7197 = vset.pattern.permute.xlu1 %v7259_v37 }
 0x810   :  { %4929 = vperm.xlu1 %7197, %v7224_v55   ;;  %v4905_v44 = vsub.f32 %v4850_v40, %v4904_v8 }
 0x814   :  { %4956 = vperm.xlu1 %7197, %v4905_v44  }
 0x83a   :  { %v4840_v1 = vpop.xlane.xlu0 %4839 }
 0x83b   :  { %v4841_v34 = vsub.f32 %v10063_v2, %v4840_v1 }
 0x875   :  { %v4896_v41 = vpop.permute.xlu1 %4895 }
 0x876   :  { %v4898_v35 = vsub.f32 %v4841_v34, %v4896_v41 }
 0x879   :  { %v4934_v24 = vpop.permute.xlu1 %4933 }
 0x87a   :  { %v10097_v9 = vmul.f32 %v4934_v24, %v4898_v35 }
 0x87c   :  { %4945 = vrot.lane.b32.xlu0 %v10097_v9, %s7256_s20 }
 0x880   :  { %4908 = vrot.lane.b32.xlu0 %v4906_v28, %s7261_s1 }
 0x886   :  { %v4915_v17 = vpop.permute.xlu1 %4914 }
 0x887   :  { %v4917_v7 = vmul.f32 %v4915_v17, %v10086_v59 }
 0x889   :  { %v4918_v61 = vsub.f32 %v4864_v27, %v4917_v7 }
 0x88b   :  { %4969 = vperm.xlu1 %7197, %v4918_v61   ;;  %v4930_v57 = vpop.permute.xlu1 %4929 }
 0x88c   :  { %v10107_v51 = vmul.f32 %v4930_v57, %v4888_v20 }
 0x88f   :  { %v4957_v47 = vpop.permute.xlu1 %4956 }
 0x890   :  { %v4959_v43 = vmul.f32 %v4957_v47, %v10107_v51 }
 0x892   :  { %v4960_v14 = vsub.f32 %v4905_v44, %v4959_v43 }
 0x894   :  { %7225 = vrcp.f32 %v4960_v14 }
 0x8a1   :  { %v7226_v48 = vpop.eup %7225 }
 0x8af   :  { %4853 = vadd.xlane.f32.xlu1 %v4852_v38 }
 0x8ee   :  { %v4946_v39 = vpop.permute.xlu0 %4945 }
 0x8ef   :  { %v4961_v50 = vmul.f32 %v4946_v39, %v4905_v44  ;;  %v4974_v45 = vmul.f32 %v4946_v39, %v4918_v61  ;;  %v4948_v8 = vmul.f32 %v4946_v39, %v10086_v59 }
 0x8f1   :  { %4963 = vrot.lane.b32.xlu0 %v4961_v50, %s7258_s0 }
 0x8f2   :  { %v4909_v32 = vpop.permute.xlu0 %4908 }
 0x8f5   :  { %4988 = vrot.lane.b32.xlu0 %v7226_v48, %s7255_s19 }
 0x8f9   :  { %4984 = vperm.xlu0 %7198, %v7226_v48  }
 0x906   :  { %v4970_v3 = vpop.permute.xlu1 %4969 }
 0x907   :  { %v4972_v18 = vmul.f32 %v4970_v3, %v10107_v51 }
 0x909   :  { %v4973_v23 = vsub.f32 %v4918_v61, %v4972_v18 }
 0x90b   :  { %5024 = vperm.xlu0 %7198, %v4973_v23  }
 0x92a   :  { %4867 = vadd.xlane.f32.xlu0 %v4866_v0 }
 0x938   :  { %v4854_v5 = vpop.xlane.xlu1 %4853 }
 0x939   :  { %v4855_v10 = vsub.f32 %v10063_v2, %v4854_v5 }
 0x93b   :  { %v4911_v42 = vsub.f32 %v4855_v10, %v4909_v32 }
 0x963   :  { %v4964_v36 = vpop.permute.xlu0 %4963 }
 0x964   :  { %v4966_v46 = vsub.f32 %v4911_v42, %v4964_v36 }
 0x967   :  { %v4989_v21 = vpop.permute.xlu0 %4988 }
 0x968   :  { %v10117_v62 = vmul.f32 %v4989_v21, %v4966_v46 }
 0x96a   :  { %5000 = vrot.lane.b32.xlu1 %v10117_v62, %s7256_s20 }
 0x96e   :  { %4939 = vperm.xlu1 %7197, %v10086_v59  }
 0x972   :  { %4921 = vrot.lane.b32.xlu1 %v4919_v56, %s7262_s21 }
 0x973   :  { %7199 = vset.pattern.permute.xlu1 %v7260_v54 }
 0x974   :  { %v4985_v13 = vpop.permute.xlu0 %4984 }
 0x975   :  { %v4987_v11 = vmul.f32 %v4985_v13, %v4960_v14 }
 0x976   :  { %4976 = vrot.lane.b32.xlu1 %v4974_v45, %s7261_s1 }
 0x986   :  { %v5025_v33 = vpop.permute.xlu0 %5024 }
 0x987   :  { %v5027_v4 = vmul.f32 %v5025_v33, %v4987_v11 }
 0x989   :  { %v5028_v25 = vsub.f32 %v4973_v23, %v5027_v4 }
 0x98b   :  { %7227 = vrcp.f32 %v5028_v25 }
 0x998   :  { %v7228_v60 = vpop.eup %7227 }
 0x9b3   :  { %v4868_v49 = vpop.xlane.xlu0 %4867 }
 0x9b4   :  { %v4869_v20 = vsub.f32 %v10063_v2, %v4868_v49 }
 0x9dc   :  { %v5001_v15 = vpop.permute.xlu1 %5000 }
 0x9dd   :  { %v5029_v31 = vmul.f32 %v5001_v15, %v4973_v23  ;;  %v5016_v44 = vmul.f32 %v5001_v15, %v10107_v51 }
 0x9df   :  { %5031 = vrot.lane.b32.xlu1 %v5029_v31, %s7258_s0 }
 0x9e3   :  { %5038 = vrot.lane.b32.xlu1 %v7228_v60, %s7255_s19 }
 0x9e7   :  { %5011 = vperm.xlu1 %7199, %v10107_v51  }
 0x9e9   :  { %v4940_v40 = vpop.permute.xlu1 %4939 }
 0x9ea   :  { %v4942_v58 = vmul.f32 %v4940_v40, %v10107_v51 }
 0x9ec   :  { %v4943_v16 = vsub.f32 %v10086_v59, %v4942_v58 }
 0x9ed   :  { %v4922_v29 = vpop.permute.xlu1 %4921 }
 0x9ee   :  { %4994 = vperm.xlu0 %7198, %v4943_v16   ;;  %v4924_v19 = vsub.f32 %v4869_v20, %v4922_v29  ;;  %v5003_v37 = vmul.f32 %v5001_v15, %v4943_v16 }
 0x9f1   :  { %v4977_v12 = vpop.permute.xlu1 %4976 }
 0x9f2   :  { %v4979_v52 = vsub.f32 %v4924_v19, %v4977_v12 }
 0xa51   :  { %v5032_v53 = vpop.permute.xlu1 %5031 }
 0xa52   :  { %v5034_v55 = vsub.f32 %v4979_v52, %v5032_v53 }
 0xa55   :  { %v5039_v27 = vpop.permute.xlu1 %5038 }
 0xa56   :  { %v5041_v30 = vmul.f32 %v5039_v27, %v5034_v55 }
 0xa58   :  { %5043 = vrot.lane.b32.xlu1 %v5041_v30, %s7256_s20 }
 0xa5c   :  { %4950 = vrot.lane.b32.xlu1 %v4948_v8, %s7263_s5 }
 0xa60   :  { %5005 = vrot.lane.b32.xlu1 %v5003_v37, %s7264_s22 }
 0xa62   :  { %v5012_v1 = vpop.permute.xlu1 %5011 }
 0xa63   :  { %v5014_v41 = vmul.f32 %v5012_v1, %v4987_v11 }
 0xa64   :  { %5018 = vrot.lane.b32.xlu1 %v5016_v44, %s7263_s5 }
 0xa65   :  { %v5015_v54 = vsub.f32 %v10107_v51, %v5014_v41 }
 0xa69   :  { %v4995_v2 = vpop.permute.xlu0 %4994 }
 0xa6a   :  { %v4997_v34 = vmul.f32 %v4995_v2, %v4987_v11 }
 0xa6c   :  { %v4998_v35 = vsub.f32 %v4943_v16, %v4997_v34 }
 0xaca   :  { %v5044_v24 = vpop.permute.xlu1 %5043 }
 0xacb   :  { %v5046_v28 = vmul.f32 %v5044_v24, %v4998_v35  ;;  %v5052_v17 = vmul.f32 %v5044_v24, %v5015_v54  ;;  %v5058_v59 = vmul.f32 %v5044_v24, %v4987_v11 }
 0xacd   :  { %5054 = vrot.lane.b32.xlu1 %v5052_v17, %s7264_s22  ;;  %5048 = vrot.lane.b32.xlu0 %v5046_v28, %s7265_s4 }
 0xace   :  { %v4951_v7 = vpop.permute.xlu1 %4950 }
 0xacf   :  { %v4953_v38 = vsub.f32 %v10079_v22, %v4951_v7 }
 0xad1   :  { %5060 = vrot.lane.b32.xlu0 %v5058_v59, %s7263_s5 }
 0xad2   :  { %v5006_v61 = vpop.permute.xlu1 %5005 }
 0xad3   :  { %v5008_v57 = vsub.f32 %v4953_v38, %v5006_v61 }
 0xad6   :  { %v5019_v6 = vpop.permute.xlu1 %5018 }
 0xad7   :  { %v5021_v47 = vsub.f32 %v10097_v9, %v5019_v6 }
 0xb3f   :  { %v5049_v43 = vpop.permute.xlu0 %5048  ;;  %v5055_v14 = vpop.permute.xlu1 %5054 }
 0xb40   :  { %v5051_v51 = vsub.f32 %v5008_v57, %v5049_v43  ;;  %v5057_v39 = vsub.f32 %v5021_v47, %v5055_v14 }
 0xb42   :  { %v5065_v3 = vsel %vm5064_vm9, %v5051_v51, %v5057_v39 }
 0xb43   :  { %v5061_v50 = vpop.permute.xlu0 %5060 }
 0xb44   :  { %v5063_v48 = vsub.f32 %v10117_v62, %v5061_v50 }
 0xb46   :  { %v5067_v18 = vsel %vm5066_vm10, %v5065_v3, %v5063_v48 }
 0xb47   :  { %v5069_v23 = vsel %vm5068_vm11, %v5067_v18, %v5041_v30 }
 0xb48   :  { %5071 = vrot.lane.b32.xlu1 %v5069_v23, %s7256_s20 }
 0xbba   :  { %v5072_v22 = vpop.permute.xlu1 %5071 }
 0xbbb   :  { %v5074_v9 = vsel %vm4823_vm6, %v10061_v63, %v5072_v22 }
 0xbbc   :  { %5075 = vst.msk [vmem:[#allocation2] sm:$0xff] %vm131_vm0, %v5074_v9 }
 0xbbd   :  { %7241 = shalt.err (!%p7238_p4)
}
 0xbbe   :  { %5085 = dma.vmem_to_hbm [thread:$0]  %s5083_s24, 128, %s10155_s11, [#allocation3]  }
 0xbbf   :  { %7250 = dma.done.wait [#allocation3], 128  }
 0xbc0   :  { %7251 = vsyncadd [#allocation3], 4294967168 }
 0xbc1   :  { %5089 = vsyncpa [#allocation3], 1 }

</bundles_post_ra>
